<compile_context>
chip_gen: v5e
topology: v5e:2x2
jax: 0.10.0
libtpu: 0.0.40
codegen_flags: <defaults>
</compile_context>

<pallas_src>
import math
import jax
import jax.numpy as jnp
from jax.experimental import pallas as pl
from jax.experimental.pallas import tpu as pltpu

# ---- config (small, consistent with LlamaConfig shape relations) ----
B = 2
T = 16
N_EMBD = 64
N_HEAD = 8
N_KV_HEAD = 4
HEAD_DIM = N_EMBD // N_HEAD          # 8
N_KV_GROUPS = N_HEAD // N_KV_HEAD    # 2
KV_DIM = N_KV_HEAD * HEAD_DIM        # 32
ROWS = B * T                         # batch folded into rows = 32
QKV_W = 2 * N_EMBD + 2 * KV_DIM + KV_DIM   # q, rot(q), k, rot(k), v = 224


def _rotate_half(x):
    d = x.shape[-1]
    return jnp.concatenate((-x[..., d // 2:], x[..., : d // 2]), axis=-1)


def llama_attn_kernel(x_ref, wqkv_ref, wo_ref, cos_ref, sin_ref, bias_ref,
                      o_ref):
    # ---- fused qkv (+ rotate-half images) projection: one MXU push --------
    qkv = jnp.dot(x_ref[...], wqkv_ref[...],
                  preferred_element_type=jnp.float32)          # (R, 224) f32
    c, kv = N_EMBD, KV_DIM
    q_base = qkv[:, 0:c]
    q_rot = qkv[:, c:2 * c]
    k_base = qkv[:, 2 * c:2 * c + kv]
    k_rot = qkv[:, 2 * c + kv:2 * c + 2 * kv]
    v = qkv[:, 2 * c + 2 * kv:]

    # ---- RoPE: pure element-wise (cos/sin pre-tiled to full width) --------
    cos = cos_ref[...]                                         # (R, C)
    sin = sin_ref[...]
    q = q_base * cos + q_rot * sin                 # (R, C), pre-scaled by 1/sqrt(hd)
    k = k_base * cos[:, :kv] + k_rot * sin[:, :kv]             # (R, KV)

    # ---- head-major layout, kv-head as the single batch dim ---------------
    q3 = pltpu.einshape("rhd->hrd", q.reshape(ROWS, N_HEAD, HEAD_DIM))
    k3 = pltpu.einshape("rhd->hrd", k.reshape(ROWS, N_KV_HEAD, HEAD_DIM))
    v3 = pltpu.einshape("rhd->hrd", v.reshape(ROWS, N_KV_HEAD, HEAD_DIM))
    # GQA: fold the query-group axis into query rows (row order = (g, b, t)).
    # q head h = n*G + g uses kv head n  (== repeat_interleave semantics of
    # torch SDPA's enable_gqa=True).
    qg = q3.reshape(N_KV_HEAD, N_KV_GROUPS * ROWS, HEAD_DIM)   # (Hkv, G*R, hd)

    # ---- attention: batched einsums + additive causal/batch bias ----------
    s = jnp.einsum("nqd,nsd->nqs",
                   qg.astype(jnp.bfloat16), k3.astype(jnp.bfloat16),
                   preferred_element_type=jnp.float32)         # (Hkv, G*R, R)
    s = s + bias_ref[...][None, :, :]          # causal within batch, -inf across
    m = jnp.max(s, axis=-1, keepdims=True)
    p = jnp.exp(s - m)
    l = jnp.sum(p, axis=-1, keepdims=True)
    p = p * pl.reciprocal(l, approx=True)                      # EUP, not VPU divide
    o = jnp.einsum("nqs,nsd->nqd",
                   p.astype(jnp.bfloat16), v3.astype(jnp.bfloat16),
                   preferred_element_type=jnp.float32)         # (Hkv, G*R, hd)

    # ---- back to (rows, C) and output projection ---------------------------
    o = pltpu.einshape("hrd->rhd", o.reshape(N_HEAD, ROWS, HEAD_DIM))
    attn = o.reshape(ROWS, N_EMBD)                             # (R, C), (h, d) order
    y = jnp.dot(attn.astype(jnp.bfloat16), wo_ref[...],
                preferred_element_type=jnp.float32)
    o_ref[...] = y.astype(o_ref.dtype)
    # TODO(synk): for much larger T, replace the materialized (Hkv, G*R, R)
    # score tensor with a KV-tiled online-softmax loop (flash-style); matters
    # first on v7x's 64 MiB VMEM.


def llama_attention(x, wq_t, wk_t, wv_t, wo_t, cos, sin):
    """x: (B, T, C) f32; w*_t: (in, out) f32; cos/sin: (T, head_dim) f32."""
    bn, tn, cn = x.shape
    rows = bn * tn
    scale = 1.0 / math.sqrt(HEAD_DIM)

    # --- one-time parameter prep (cache with the weights in a real model) ---
    # rotate_half is linear, so fold it (and the softmax scale) into the fused
    # projection weight: columns = [Wq*s | rot(Wq)*s | Wk | rot(Wk) | Wv].
    wq_rot = _rotate_half(wq_t.reshape(cn, N_HEAD, HEAD_DIM)).reshape(cn, cn)
    wk_rot = _rotate_half(wk_t.reshape(cn, N_KV_HEAD, HEAD_DIM)).reshape(cn, KV_DIM)
    wqkv = jnp.concatenate(
        [wq_t * scale, wq_rot * scale, wk_t, wk_rot, wv_t],
        axis=1).astype(jnp.bfloat16)                            # (C, 224)
    wo = wo_t.astype(jnp.bfloat16)

    # cos/sin tiled to (rows, C) so in-kernel RoPE is pure element-wise.
    cos_rc = jnp.tile(cos, (bn, N_HEAD)).astype(jnp.float32)    # (rows, C)
    sin_rc = jnp.tile(sin, (bn, N_HEAD)).astype(jnp.float32)

    # Additive attention bias: causal inside a batch, -inf across batches.
    # Query rows ordered (group, batch, t); key columns ordered (batch, s).
    qi = jnp.arange(N_KV_GROUPS * rows)
    ki = jnp.arange(rows)
    q_b, q_t = (qi % rows) // tn, qi % tn
    k_b, k_s = ki // tn, ki % tn
    ok = (q_b[:, None] == k_b[None, :]) & (q_t[:, None] >= k_s[None, :])
    bias = jnp.where(ok, 0.0, -1e30).astype(jnp.float32)        # (G*rows, rows)

    x2 = x.reshape(rows, cn).astype(jnp.bfloat16)

    out2 = pl.pallas_call(
        llama_attn_kernel,
        out_shape=jax.ShapeDtypeStruct((rows, cn), jnp.float32),
        grid=(1,),   # single step: batch folded into rows
        in_specs=[
            pl.BlockSpec((rows, cn), lambda i: (0, 0)),                 # x
            pl.BlockSpec((cn, QKV_W), lambda i: (0, 0)),                # Wqkv(+rot)
            pl.BlockSpec((cn, cn), lambda i: (0, 0)),                   # Wo
            pl.BlockSpec((rows, cn), lambda i: (0, 0)),                 # cos tile
            pl.BlockSpec((rows, cn), lambda i: (0, 0)),                 # sin tile
            pl.BlockSpec((N_KV_GROUPS * rows, rows), lambda i: (0, 0)),  # bias
        ],
        out_specs=pl.BlockSpec((rows, cn), lambda i: (0, 0)),
        compiler_params=pltpu.CompilerParams(
            dimension_semantics=("arbitrary",)),
    )(x2, wqkv, wo, cos_rc, sin_rc, bias)
    return out2.reshape(bn, tn, cn)


def reference(x, wq_t, wk_t, wv_t, wo_t, cos, sin):
    """Pure-JAX f32 mirror of the PyTorch forward (flash path, dropout=0)."""
    bn, tn, cn = x.shape
    q = (x @ wq_t).reshape(bn, tn, N_HEAD, HEAD_DIM).transpose(0, 2, 1, 3)
    k = (x @ wk_t).reshape(bn, tn, N_KV_HEAD, HEAD_DIM).transpose(0, 2, 1, 3)
    v = (x @ wv_t).reshape(bn, tn, N_KV_HEAD, HEAD_DIM).transpose(0, 2, 1, 3)
    q = q * cos + _rotate_half(q) * sin
    k = k * cos + _rotate_half(k) * sin
    k = jnp.repeat(k, N_KV_GROUPS, axis=1)      # GQA repeat_interleave
    v = jnp.repeat(v, N_KV_GROUPS, axis=1)
    s = jnp.einsum("bhtd,bhsd->bhts", q, k) / math.sqrt(HEAD_DIM)
    mask = jnp.tril(jnp.ones((tn, tn), dtype=bool))
    s = jnp.where(mask[None, None], s, -jnp.inf)
    p = jax.nn.softmax(s, axis=-1)
    out = jnp.einsum("bhts,bhsd->bhtd", p, v)
    out = out.transpose(0, 2, 1, 3).reshape(bn, tn, cn)
    return out @ wo_t


if __name__ == "__main__":
    key = jax.random.PRNGKey(0)
    kx, kq, kk, kv, ko = jax.random.split(key, 5)

    x = jax.random.normal(kx, (B, T, N_EMBD), dtype=jnp.float32)

    # Deterministic "Linear" weights: PyTorch weight is (out, in); pass W^T.
    std = 0.02
    wq_t = (std * jax.random.normal(kq, (N_EMBD, N_EMBD))).astype(jnp.float32)
    wk_t = (std * jax.random.normal(kk, (N_EMBD, KV_DIM))).astype(jnp.float32)
    wv_t = (std * jax.random.normal(kv, (N_EMBD, KV_DIM))).astype(jnp.float32)
    wo_t = (std * jax.random.normal(ko, (N_EMBD, N_EMBD))).astype(jnp.float32)

    # RoPE tables (Llama convention): freqs over half the head dim, duplicated.
    inv_freq = 1.0 / (10000.0 ** (jnp.arange(0, HEAD_DIM, 2, dtype=jnp.float32)
                                  / HEAD_DIM))
    pos = jnp.arange(T, dtype=jnp.float32)
    freqs = jnp.outer(pos, inv_freq)                        # (T, hd/2)
    emb = jnp.concatenate((freqs, freqs), axis=-1)          # (T, hd)
    cos = jnp.cos(emb).astype(jnp.float32)
    sin = jnp.sin(emb).astype(jnp.float32)

    out = llama_attention(x, wq_t, wk_t, wv_t, wo_t, cos, sin)
    out = jax.block_until_ready(out)

    ref = reference(x, wq_t, wk_t, wv_t, wo_t, cos, sin)
    assert out.shape == (B, T, N_EMBD)
    # bf16 MXU inputs (f32 accumulation) => relaxed tolerance vs f32 reference.
    assert jnp.allclose(out, ref, atol=2e-2, rtol=2e-2), (
        float(jnp.max(jnp.abs(out - ref))))

    print("KERNEL_OK")
</pallas_src>

<mosaic_0001>
module attributes {stable_mosaic.version = 11 : i64} {
  func.func @llama_attn_kernel(%arg0: i32, %arg1: memref<32x64xbf16, #tpu.memory_space<vmem>>, %arg2: memref<64x224xbf16, #tpu.memory_space<vmem>>, %arg3: memref<64x64xbf16, #tpu.memory_space<vmem>>, %arg4: memref<32x64xf32, #tpu.memory_space<vmem>>, %arg5: memref<32x64xf32, #tpu.memory_space<vmem>>, %arg6: memref<64x32xf32, #tpu.memory_space<vmem>>, %arg7: memref<32x64xf32, #tpu.memory_space<vmem>>) attributes {dimension_semantics = [#tpu.dimension_semantics<arbitrary>], iteration_bounds = array<i64: 1>, scalar_prefetch = 0 : i64, scratch_operands = 0 : i64, tpu.core_type = #tpu.core_type<tc>, window_params = [{pipeline_mode = #tpu.pipeline_mode<synchronous>, transform_indices = @transform_0, window_bounds = array<i64: 32, 64>}, {pipeline_mode = #tpu.pipeline_mode<synchronous>, transform_indices = @transform_1, window_bounds = array<i64: 64, 224>}, {pipeline_mode = #tpu.pipeline_mode<synchronous>, transform_indices = @transform_2, window_bounds = array<i64: 64, 64>}, {pipeline_mode = #tpu.pipeline_mode<synchronous>, transform_indices = @transform_3, window_bounds = array<i64: 32, 64>}, {pipeline_mode = #tpu.pipeline_mode<synchronous>, transform_indices = @transform_4, window_bounds = array<i64: 32, 64>}, {pipeline_mode = #tpu.pipeline_mode<synchronous>, transform_indices = @transform_5, window_bounds = array<i64: 64, 32>}, {pipeline_mode = #tpu.pipeline_mode<synchronous>, transform_indices = @transform_6, window_bounds = array<i64: 32, 64>}]} {
    %c0 = arith.constant 0 : index
    %c0_0 = arith.constant 0 : index
    %0 = vector.load %arg1[%c0, %c0_0] : memref<32x64xbf16, #tpu.memory_space<vmem>>, vector<32x64xbf16>
    %c0_1 = arith.constant 0 : index
    %c0_2 = arith.constant 0 : index
    %1 = vector.load %arg2[%c0_1, %c0_2] : memref<64x224xbf16, #tpu.memory_space<vmem>>, vector<64x224xbf16>
    %cst = arith.constant dense<0.000000e+00> : vector<32x224xf32>
    %2 = tpu.matmul %0, %1, %cst {dimension_numbers = #tpu.dot_dimension_numbers<[1], [0], [0], [1], [0, 0, 1, 1], [], []>} : vector<32x64xbf16>, vector<64x224xbf16>, vector<32x224xf32> -> vector<32x224xf32>
    %3 = vector.extract_strided_slice %2 {offsets = [0, 0], sizes = [32, 64], strides = [1, 1]} : vector<32x224xf32> to vector<32x64xf32>
    %4 = vector.extract_strided_slice %2 {offsets = [0, 64], sizes = [32, 64], strides = [1, 1]} : vector<32x224xf32> to vector<32x64xf32>
    %5 = vector.extract_strided_slice %2 {offsets = [0, 128], sizes = [32, 32], strides = [1, 1]} : vector<32x224xf32> to vector<32x32xf32>
    %6 = vector.extract_strided_slice %2 {offsets = [0, 160], sizes = [32, 32], strides = [1, 1]} : vector<32x224xf32> to vector<32x32xf32>
    %7 = vector.extract_strided_slice %2 {offsets = [0, 192], sizes = [32, 32], strides = [1, 1]} : vector<32x224xf32> to vector<32x32xf32>
    %c0_3 = arith.constant 0 : index
    %c0_4 = arith.constant 0 : index
    %8 = vector.load %arg4[%c0_3, %c0_4] : memref<32x64xf32, #tpu.memory_space<vmem>>, vector<32x64xf32>
    %c0_5 = arith.constant 0 : index
    %c0_6 = arith.constant 0 : index
    %9 = vector.load %arg5[%c0_5, %c0_6] : memref<32x64xf32, #tpu.memory_space<vmem>>, vector<32x64xf32>
    %10 = arith.mulf %3, %8 : vector<32x64xf32>
    %11 = arith.mulf %4, %9 : vector<32x64xf32>
    %12 = arith.addf %10, %11 : vector<32x64xf32>
    %13 = vector.extract_strided_slice %8 {offsets = [0, 0], sizes = [32, 32], strides = [1, 1]} : vector<32x64xf32> to vector<32x32xf32>
    %14 = arith.mulf %5, %13 : vector<32x32xf32>
    %15 = vector.extract_strided_slice %9 {offsets = [0, 0], sizes = [32, 32], strides = [1, 1]} : vector<32x64xf32> to vector<32x32xf32>
    %16 = arith.mulf %6, %15 : vector<32x32xf32>
    %17 = arith.addf %14, %16 : vector<32x32xf32>
    %18 = vector.shape_cast %12 : vector<32x64xf32> to vector<32x8x8xf32>
    %19 = tpu.transpose %18, [1, 0, 2] : vector<32x8x8xf32> -> vector<8x32x8xf32>
    %20 = vector.shape_cast %17 : vector<32x32xf32> to vector<32x4x8xf32>
    %21 = tpu.transpose %20, [1, 0, 2] : vector<32x4x8xf32> -> vector<4x32x8xf32>
    %22 = vector.shape_cast %7 : vector<32x32xf32> to vector<32x4x8xf32>
    %23 = tpu.transpose %22, [1, 0, 2] : vector<32x4x8xf32> -> vector<4x32x8xf32>
    %24 = vector.shape_cast %19 : vector<8x32x8xf32> to vector<4x64x8xf32>
    %25 = arith.truncf %24 : vector<4x64x8xf32> to vector<4x64x8xbf16>
    %26 = arith.truncf %21 : vector<4x32x8xf32> to vector<4x32x8xbf16>
    "tpu.trace_start"() <{level = 10 : i32, message = "nqd,nsd->nqs"}> : () -> ()
    %cst_7 = arith.constant dense<0.000000e+00> : vector<4x64x32xf32>
    %27 = tpu.matmul %25, %26, %cst_7 {dimension_numbers = #tpu.dot_dimension_numbers<[2], [2], [1], [1], [0, 0, 0, 1, 1, 1], [0], [0]>} : vector<4x64x8xbf16>, vector<4x32x8xbf16>, vector<4x64x32xf32> -> vector<4x64x32xf32>
    "tpu.trace_stop"() : () -> ()
    %c0_8 = arith.constant 0 : index
    %c0_9 = arith.constant 0 : index
    %28 = vector.load %arg6[%c0_8, %c0_9] : memref<64x32xf32, #tpu.memory_space<vmem>>, vector<64x32xf32>
    %29 = vector.shape_cast %28 : vector<64x32xf32> to vector<1x64x32xf32>
    %30 = vector.broadcast %29 : vector<1x64x32xf32> to vector<4x64x32xf32>
    %31 = arith.addf %27, %30 : vector<4x64x32xf32>
    %cst_10 = arith.constant dense<0xFF800000> : vector<4x64xf32>
    %32 = vector.multi_reduction <maximumf>, %31, %cst_10 [2] : vector<4x64x32xf32> to vector<4x64xf32>
    %33 = vector.shape_cast %32 : vector<4x64xf32> to vector<4x64x1xf32>
    %34 = vector.broadcast %33 : vector<4x64x1xf32> to vector<4x64x32xf32>
    %35 = arith.subf %31, %34 : vector<4x64x32xf32>
    %36 = math.exp %35 : vector<4x64x32xf32>
    %cst_11 = arith.constant dense<0.000000e+00> : vector<4x64xf32>
    %37 = vector.multi_reduction <add>, %36, %cst_11 [2] : vector<4x64x32xf32> to vector<4x64xf32>
    %38 = vector.shape_cast %37 : vector<4x64xf32> to vector<4x64x1xf32>
    %39 = tpu.reciprocal %38 {approx = true} : vector<4x64x1xf32> -> vector<4x64x1xf32>
    %40 = vector.broadcast %39 : vector<4x64x1xf32> to vector<4x64x32xf32>
    %41 = arith.mulf %36, %40 : vector<4x64x32xf32>
    %42 = arith.truncf %41 : vector<4x64x32xf32> to vector<4x64x32xbf16>
    %43 = arith.truncf %23 : vector<4x32x8xf32> to vector<4x32x8xbf16>
    "tpu.trace_start"() <{level = 10 : i32, message = "nqs,nsd->nqd"}> : () -> ()
    %cst_12 = arith.constant dense<0.000000e+00> : vector<4x64x8xf32>
    %44 = tpu.matmul %42, %43, %cst_12 {dimension_numbers = #tpu.dot_dimension_numbers<[2], [1], [1], [2], [0, 0, 0, 1, 1, 2], [0], [0]>} : vector<4x64x32xbf16>, vector<4x32x8xbf16>, vector<4x64x8xf32> -> vector<4x64x8xf32>
    "tpu.trace_stop"() : () -> ()
    %45 = vector.shape_cast %44 : vector<4x64x8xf32> to vector<8x32x8xf32>
    %46 = tpu.transpose %45, [1, 0, 2] : vector<8x32x8xf32> -> vector<32x8x8xf32>
    %47 = vector.shape_cast %46 : vector<32x8x8xf32> to vector<32x64xf32>
    %48 = arith.truncf %47 : vector<32x64xf32> to vector<32x64xbf16>
    %c0_13 = arith.constant 0 : index
    %c0_14 = arith.constant 0 : index
    %49 = vector.load %arg3[%c0_13, %c0_14] : memref<64x64xbf16, #tpu.memory_space<vmem>>, vector<64x64xbf16>
    %cst_15 = arith.constant dense<0.000000e+00> : vector<32x64xf32>
    %50 = tpu.matmul %48, %49, %cst_15 {dimension_numbers = #tpu.dot_dimension_numbers<[1], [0], [0], [1], [0, 0, 1, 1], [], []>} : vector<32x64xbf16>, vector<64x64xbf16>, vector<32x64xf32> -> vector<32x64xf32>
    %c0_16 = arith.constant 0 : index
    %c0_17 = arith.constant 0 : index
    %51 = vector.load %arg7[%c0_16, %c0_17] : memref<32x64xf32, #tpu.memory_space<vmem>>, vector<32x64xf32>
    tpu.vector_store %arg7[%c0_16, %c0_17], %50 {strides = array<i32>} : memref<32x64xf32, #tpu.memory_space<vmem>>, vector<32x64xf32>,
    return
  }
  func.func @transform_0(%arg0: i32) -> (i32, i32) {
    %c0_i32 = arith.constant 0 : i32
    %c0_i32_0 = arith.constant 0 : i32
    %c0_i32_1 = arith.constant 0 : i32
    return %c0_i32, %c0_i32_0 : i32, i32
  }
  func.func @transform_1(%arg0: i32) -> (i32, i32) {
    %c0_i32 = arith.constant 0 : i32
    %c0_i32_0 = arith.constant 0 : i32
    %c0_i32_1 = arith.constant 0 : i32
    return %c0_i32, %c0_i32_0 : i32, i32
  }
  func.func @transform_2(%arg0: i32) -> (i32, i32) {
    %c0_i32 = arith.constant 0 : i32
    %c0_i32_0 = arith.constant 0 : i32
    %c0_i32_1 = arith.constant 0 : i32
    return %c0_i32, %c0_i32_0 : i32, i32
  }
  func.func @transform_3(%arg0: i32) -> (i32, i32) {
    %c0_i32 = arith.constant 0 : i32
    %c0_i32_0 = arith.constant 0 : i32
    %c0_i32_1 = arith.constant 0 : i32
    return %c0_i32, %c0_i32_0 : i32, i32
  }
  func.func @transform_4(%arg0: i32) -> (i32, i32) {
    %c0_i32 = arith.constant 0 : i32
    %c0_i32_0 = arith.constant 0 : i32
    %c0_i32_1 = arith.constant 0 : i32
    return %c0_i32, %c0_i32_0 : i32, i32
  }
  func.func @transform_5(%arg0: i32) -> (i32, i32) {
    %c0_i32 = arith.constant 0 : i32
    %c0_i32_0 = arith.constant 0 : i32
    %c0_i32_1 = arith.constant 0 : i32
    return %c0_i32, %c0_i32_0 : i32, i32
  }
  func.func @transform_6(%arg0: i32) -> (i32, i32) {
    %c0_i32 = arith.constant 0 : i32
    %c0_i32_0 = arith.constant 0 : i32
    %c0_i32_1 = arith.constant 0 : i32
    return %c0_i32, %c0_i32_0 : i32, i32
  }
}

</mosaic_0001>

<bundles_post_ra>
// kernel: tpu_custom_call.1
= control target key start
LH: loop header
LB: loop body
LE: loop exit
PB: predicated region body
PF: predicated region fallthrough
CT: control target
= control target key end

     0   :  { %11 = vsyncpa [#allocation3], 0  ;;  %s7927_s0 = inlined_call_operand.hbm [shape: bf16[32,64], index: 0, kind: input, shape index: {}]   ;;  %s7928_s1 = inlined_call_operand.vmem [shape: bf16[64,224], index: 1, kind: input, shape index: {}]   ;;  %s7929_s2 = inlined_call_operand.vmem [shape: bf16[64,64], index: 2, kind: input, shape index: {}]   ;;  %s7930_s3 = inlined_call_operand.hbm [shape: f32[32,64], index: 3, kind: input, shape index: {}]   ;;  %s7931_s4 = inlined_call_operand.hbm [shape: f32[32,64], index: 4, kind: input, shape index: {}]   ;;  %s7932_s5 = inlined_call_operand.vmem [shape: f32[64,32], index: 5, kind: input, shape index: {}]   ;;  %s7933_s6 = inlined_call_operand.hbm [shape: f32[32,64], index: 6, kind: output, shape index: {}]  }
   0x1   :  { %12 = vsyncpa [#allocation6], 0  ;;  %s35_s23 = sshll.u32 %s7930_s3, 4  ;;  %s36_s23 = int_to_ptr.hbm [resolvable:$true] %s35_s23 }
   0x2   :  { %13 = vsyncpa [#allocation4], 0  ;;  %s5039_s24 = smov [#allocation5]   ;;  %s18_s28 = sshll.u32 %s7927_s0, 4  ;;  %s19_s28 = int_to_ptr.hbm [resolvable:$true] %s18_s28 }
   0x3   :  { %s37_s25 = sshll.u32 %s5039_s24, 4  ;;  %s5040_s29 = smov 128   ;;  %s38_s25 = int_to_ptr.vmem [resolvable:$true] %s37_s25 }
   0x4   :  { %s5041_s30 = smov 8   ;;  %s5042_s7 = smov [#allocation2]  }
   0x5   :  { %43 = dma.hbm_to_vmem [thread:$0]  %s36_s23, 512, %s38_s25, [#allocation6], %s5040_s29, %s5040_s29, %s5041_s30  }
   0x6   :  { %s20_s8 = sshll.u32 %s5042_s7, 4  ;;  %s5043_s3 = smov 64   ;;  %s21_s8 = int_to_ptr.vmem [resolvable:$true] %s20_s8 }
   0x7   :  { %s5044_s9 = smov 4   ;;  %s48_s12 = sshll.u32 %s7931_s4, 4  ;;  %s49_s12 = int_to_ptr.hbm [resolvable:$true] %s48_s12 }
   0x8   :  { %26 = dma.hbm_to_vmem [thread:$0]  %s19_s28, 256, %s21_s8, [#allocation3], %s5043_s3, %s5043_s3, %s5044_s9  }
   0x9   :  { %s5045_s0 = smov [#allocation7]  }
   0xa   :  { %s50_s13 = sshll.u32 %s5045_s0, 4  ;;  %s51_s13 = int_to_ptr.vmem [resolvable:$true] %s50_s13 }
   0xb   :  { %56 = dma.hbm_to_vmem [thread:$0]  %s49_s12, 512, %s51_s13, [#allocation6], %s5040_s29, %s5040_s29, %s5041_s30  }
   0xc   :  { %5033 = dma.done.wait [#allocation3], 256  }
   0xd   :  { %5034 = vsyncadd [#allocation3], 4294967040 }
   0xe   :  { %5035 = dma.done.wait [#allocation6], 1024  }
   0xf   :  { %5036 = vsyncadd [#allocation6], 4294966272  ;;  %v4468_v0 = vld [vmem:[%s7928_s1 + $0x30] sm:$0xf]  ;;  %v4537_v1 = vld [vmem:[%s7928_s1 + $0x34] sm:$0xf0] }
  0x10   :  { %v4536_v2 = vld [vmem:[%s7928_s1 + $0x34] sm:$0xf]  ;;  %v4469_v3 = vor.u32 %v4537_v1, %v4468_v0  ;;  %v4470_v4 = vld [vmem:[%s7928_s1 + $0x38] sm:$0xf0]  ;;  %v4460_v5 = vld [vmem:[%s7928_s1 + $0x20] sm:$0xf] }
  0x11   :  { %v4535_v6 = vld [vmem:[%s7928_s1 + $0x24] sm:$0xf0]  ;;  %v4473_v7 = vor.u32 %v4536_v2, %v4470_v4  ;;  %v4534_v8 = vld [vmem:[%s7928_s1 + $0x24] sm:$0xf]  ;;  %v4462_v9 = vld [vmem:[%s7928_s1 + $0x28] sm:$0xf0] }
  0x12   :  { %145 = vmatpush.bf16.msra.mxu0 %v4469_v3  ;;  %v4461_v10 = vor.u32 %v4535_v6, %v4460_v5  ;;  %4542 = vmatpush.bf16.msra.mxu3 %v4469_v3  ;;  %v4465_v11 = vor.u32 %v4534_v8, %v4462_v9  ;;  %v4452_v12 = vld [vmem:[%s7928_s1 + $0x10] sm:$0xf]  ;;  %v4533_v13 = vld [vmem:[%s7928_s1 + $0x14] sm:$0xf0]  ;;  %v4532_v14 = vld [vmem:[%s7928_s1 + $0x14] sm:$0xf] }
  0x13   :  { %164 = vmatpush.bf16.msra.mxu1 %v4473_v7  ;;  %v4454_v15 = vld [vmem:[%s7928_s1 + $0x18] sm:$0xf0]  ;;  %v183_v16 = vld [vmem:[#allocation7] sm:$0xff]  ;;  %s5046_s14 = smov 32   ;;  %v185_v17 = vld [vmem:[#allocation7 + $0x10] sm:$0xff]  ;;  %v4453_v18 = vor.u32 %v4533_v13, %v4452_v12  ;;  %vm134_vm0 = vcmask 523264  }
  0x14   :  { %235 = vrot.lane.b32.xlu1 %v183_v16, %s5046_s14  ;;  %195 = vrot.lane.b32.xlu2 %v183_v16, %s5043_s3  ;;  %v4457_v19 = vor.u32 %v4532_v14, %v4454_v15  ;;  %v4444_v20 = vld [vmem:[%s7928_s1] sm:$0xf]  ;;  %v4531_v21 = vld [vmem:[%s7928_s1 + $0x4] sm:$0xf0]  ;;  %v184_v25 = vld [vmem:[#allocation7 + $0x8] sm:$0xff]  ;;  %s5048_s22 = smov 104  }
  0x15   :  { %239 = vrot.lane.b32.xlu0 %v185_v17, %s5046_s14  ;;  %v4530_v22 = vld [vmem:[%s7928_s1 + $0x4] sm:$0xf]  ;;  %v4446_v23 = vld [vmem:[%s7928_s1 + $0x8] sm:$0xf0]  ;;  %v4445_v24 = vor.u32 %v4531_v21, %v4444_v20  ;;  %s5047_s1 = smov 96   ;;  %v179_v55 = vld [vmem:[#allocation5] sm:$0xff] }
  0x16   :  { %146 = vmatpush.bf16.msra.mxu0 %v4461_v10  ;;  %4543 = vmatpush.bf16.msra.mxu3 %v4461_v10  ;;  %v4449_v26 = vor.u32 %v4530_v22, %v4446_v23  ;;  %v186_v27 = vld [vmem:[#allocation7 + $0x18] sm:$0xff]  ;;  %v4528_v28 = vld [vmem:[#allocation2] sm:$0xff]  ;;  %v180_v56 = vld [vmem:[#allocation5 + $0x8] sm:$0xff]  ;;  %s5049_s23 = smov 120   ;;  %s5050_s24 = smov 112   ;;  %vm360_vm1 = vcmask 1047556  }
  0x17   :  { %165 = vmatpush.bf16.msra.mxu1 %v4465_v11  ;;  %v4529_v29 = vld [vmem:[#allocation2 + $0x8] sm:$0xff]  ;;  %v181_v0 = vld [vmem:[#allocation5 + $0x10] sm:$0xff]  ;;  %s5051_s25 = smov 80   ;;  %s5052_s26 = smov 88   ;;  %vm2338_vm2 = vcmask 64512   ;;  %vm2617_vm3 = vcmask 261120  }
  0x18   :  { %v182_v1 = vld [vmem:[#allocation5 + $0x18] sm:$0xff]  ;;  %s5053_s27 = smov 72   ;;  %s5057_s20 = smov 24   ;;  %vm4322_vm4 = vcmask 130048   ;;  %vm4327_vm5 = vcmask 195584   ;;  %vm4336_vm6 = vcmask 326656  }
  0x19   :  { %s5058_s21 = smov 48   ;;  %vm4341_vm7 = vcmask 392192   ;;  %vm4346_vm8 = vcmask 457728   ;;  %s4420_s10 = sshll.u32 %s7933_s6, 4  ;;  %s4421_s10 = int_to_ptr.hbm [resolvable:$true] %s4420_s10 }
  0x1a   :  { %147 = vmatpush.bf16.msra.mxu0 %v4453_v18  ;;  %4544 = vmatpush.bf16.msra.mxu3 %v4453_v18 }
  0x1b   :  { %166 = vmatpush.bf16.msra.mxu1 %v4457_v19 }
  0x1c   :  { %237 = vrot.lane.b32.xlu1 %v184_v25, %s5046_s14  ;;  %197 = vrot.lane.b32.xlu2 %v184_v25, %s5043_s3  ;;  %v5054_v25 = vmov 1983009808  }
  0x1d   :  { %241 = vrot.lane.b32.xlu0 %v186_v27, %s5046_s14 }
  0x1e   :  { %148 = vmatpush.bf16.msra.mxu0 %v4445_v24  ;;  %4545 = vmatpush.bf16.msra.mxu3 %v4445_v24 }
  0x1f   :  { %167 = vmatpush.bf16.msra.mxu1 %v4449_v26  ;;  %v365_v26 = vunpack.c.l.s4 %v5054_v25 }
  0x21   :  { %4474 = vmatmul.msk.bf16.vlgmr.msra.gmra.mxu0 %vm134_vm0, %v4528_v28  ;;  %4475 = vmatmul.msk.bf16.vlgmr.msra.gmra.mxu3 %vm134_vm0, %v4529_v29 }
  0x22   :  { %4476 = vmatmul.msk.bf16.vlgmr.msra.gmra.mxu1 %vm134_vm0, %v4528_v28 }
  0x24   :  { %201 = vrot.lane.b32.xlu1 %v186_v27, %s5043_s3 }
  0x25   :  { %199 = vrot.lane.b32.xlu0 %v185_v17, %s5043_s3 }
  0x32   :  { %4477 = vmatmul.msk.bf16.gmra.mxu1 %vm134_vm0, %v4529_v29 }
  0x6e   :  { %v196_v30 = vpop.permute.xlu2 %195 }
  0x76   :  { %v198_v35 = vpop.permute.xlu2 %197 }
  0x86   :  { %v236_v31 = vpop.permute.xlu1 %235 }
  0x87   :  { %v240_v39 = vpop.permute.xlu0 %239 }
  0x8e   :  { %v238_v43 = vpop.permute.xlu1 %237 }
  0x8f   :  { %v242_v42 = vpop.permute.xlu0 %241 }
  0x96   :  { %v202_v51 = vpop.permute.xlu1 %201 }
  0x97   :  { %v200_v48 = vpop.permute.xlu0 %199 }
  0x9e   :  { %v150_v32 = vpop.f32.mrf.mxu0 }
  0x9f   :  { %v5174_v33 = vpop.f32.mrf.mxu1  ;;  %v207_v50 = vmul.f32 %v196_v30, %v150_v32  ;;  %v187_v9 = vmul.f32 %v179_v55, %v150_v32  ;;  %v5256_v32 = vunpack.c.0.s8 %v365_v26 }
  0xa0   :  { %v247_v34 = vmul.f32 %v236_v31, %v5174_v33  ;;  %v231_v57 = vmul.f32 %v179_v55, %v5174_v33 }
  0xa2   :  { %255 = vrot.lane.b32.xlu1 %v247_v34, %s5047_s1 }
  0xa4   :  { %v155_v47 = vpop.f32.mrf.mxu3 }
  0xa5   :  { %v209_v49 = vmul.f32 %v200_v48, %v155_v47  ;;  %v189_v18 = vmul.f32 %v181_v0, %v155_v47 }
  0xa6   :  { %v152_v36 = vpop.f32.mrf.mxu0 }
  0xa7   :  { %v5178_v37 = vpop.f32.mrf.mxu1  ;;  %v208_v38 = vmul.f32 %v198_v35, %v152_v36  ;;  %v188_v10 = vmul.f32 %v180_v56, %v152_v36 }
  0xa8   :  { %v248_v45 = vmul.f32 %v238_v43, %v5178_v37  ;;  %v232_v58 = vmul.f32 %v180_v56, %v5178_v37  ;;  %v5241_v23 = vpack.i.bf16 %v5178_v37, %v5174_v33 }
  0xaa   :  { %217 = vrot.lane.b32.xlu1 %v208_v38, %s5043_s3  ;;  %7950 = vst [vmem:[#allocation12_spill] sm:$0xff] %v5241_v23 }
  0xac   :  { %v157_v52 = vpop.f32.mrf.mxu3 }
  0xad   :  { %v210_v53 = vmul.f32 %v202_v51, %v157_v52  ;;  %v190_v16 = vmul.f32 %v182_v1, %v157_v52 }
  0xaf   :  { %v5181_v40 = vpop.f32.mrf.mxu1 }
  0xb0   :  { %v249_v41 = vmul.f32 %v240_v39, %v5181_v40  ;;  %v233_v2 = vmul.f32 %v181_v0, %v5181_v40 }
  0xb2   :  { %259 = vrot.lane.b32.xlu2 %v249_v41, %s5047_s1 }
  0xb7   :  { %v5185_v44 = vpop.f32.mrf.mxu1 }
  0xb8   :  { %v250_v46 = vmul.f32 %v242_v42, %v5185_v44  ;;  %v234_v3 = vmul.f32 %v182_v1, %v5185_v44  ;;  %v4669_v22 = vpack.i.bf16 %v5185_v44, %v5181_v40 }
  0xba   :  { %257 = vrot.lane.b32.xlu2 %v248_v45, %s5047_s1  ;;  %261 = vrot.lane.b32.xlu0 %v250_v46, %s5047_s1  ;;  %v5055_v46 = vmov 1934713408  }
  0xbb   :  { %v413_v47 = vunpack.c.l.s4 %v5055_v46 }
  0xbd   :  { %v5273_v0 = vunpack.c.0.s8 %v413_v47 }
  0xc2   :  { %219 = vrot.lane.b32.xlu2 %v209_v49, %s5043_s3  ;;  %215 = vrot.lane.b32.xlu0 %v207_v50, %s5043_s3 }
  0xca   :  { %221 = vrot.lane.b32.xlu0 %v210_v53, %s5043_s3 }
 0x10c   :  { %v260_v54 = vpop.permute.xlu2 %259 }
 0x10d   :  { %v5207_v5 = vadd.f32 %v260_v54, %v233_v2 }
 0x10f   :  { %v1410_v30 = vrot.slane %v5207_v5, 4 }
 0x114   :  { %v256_v59 = vpop.permute.xlu1 %255  ;;  %v258_v60 = vpop.permute.xlu2 %257 }
 0x115   :  { %v5196_v61 = vadd.f32 %v256_v59, %v231_v57  ;;  %v5198_v62 = vadd.f32 %v258_v60, %v232_v58 }
 0x117   :  { %v4574_v63 = vpack.i.bf16 %v5198_v62, %v5196_v61  ;;  %v1298_v29 = vrot.slane %v5196_v61, 4  ;;  %v1354_v34 = vrot.slane %v5198_v62, 4 }
 0x119   :  { %4575 = vrot.lane.b32.xlu2 %v4574_v63, %s5048_s22  ;;  %4580 = vrot.lane.b32.xlu0 %v4574_v63, %s5049_s23 }
 0x11a   :  { %4570 = vrot.lane.b32.xlu1 %v4574_v63, %s5050_s24 }
 0x11c   :  { %v218_v8 = vpop.permute.xlu1 %217  ;;  %v220_v17 = vpop.permute.xlu2 %219 }
 0x11d   :  { %v5216_v12 = vadd.f32 %v218_v8, %v188_v10  ;;  %v5227_v20 = vadd.f32 %v220_v17, %v189_v18 }
 0x11f   :  { %v474_v39 = vrot.slane %v5216_v12, 4 }
 0x12c   :  { %v262_v4 = vpop.permute.xlu0 %261 }
 0x12d   :  { %v5209_v6 = vadd.f32 %v262_v4, %v234_v3 }
 0x12f   :  { %v4594_v7 = vpack.i.bf16 %v5209_v6, %v5207_v5  ;;  %v1466_v43 = vrot.slane %v5209_v6, 4 }
 0x131   :  { %4595 = vrot.lane.b32.xlu2 %v4594_v7, %s5048_s22  ;;  %4605 = vrot.lane.b32.xlu0 %v4594_v7, %s5049_s23 }
 0x132   :  { %4585 = vrot.lane.b32.xlu1 %v4594_v7, %s5050_s24 }
 0x134   :  { %v216_v11 = vpop.permute.xlu0 %215 }
 0x135   :  { %v5218_v13 = vadd.f32 %v216_v11, %v187_v9 }
 0x137   :  { %v4609_v14 = vpack.i.bf16 %v5216_v12, %v5218_v13  ;;  %v362_v48 = vrot.slane %v5218_v13, 4 }
 0x139   :  { %4610 = vrot.lane.b32.xlu0 %v4609_v14, %s5051_s25  ;;  %4600 = vrot.lane.b32.xlu2 %v4609_v14, %s5052_s26 }
 0x13a   :  { %4590 = vrot.lane.b32.xlu1 %v4609_v14, %s5047_s1 }
 0x13c   :  { %v222_v15 = vpop.permute.xlu0 %221 }
 0x13d   :  { %v5225_v19 = vadd.f32 %v222_v15, %v190_v16 }
 0x13f   :  { %v4639_v21 = vpack.i.bf16 %v5225_v19, %v5227_v20 }
 0x141   :  { %4625 = vrot.lane.b32.xlu0 %v4609_v14, %s5053_s27  ;;  %4620 = vrot.lane.b32.xlu2 %v4609_v14, %s5050_s24 }
 0x142   :  { %4615 = vrot.lane.b32.xlu1 %v4609_v14, %s5049_s23 }
 0x149   :  { %4640 = vrot.lane.b32.xlu0 %v4639_v21, %s5052_s26  ;;  %4635 = vrot.lane.b32.xlu2 %v4639_v21, %s5047_s1  ;;  %s5059_s1 = smov 40  }
 0x14a   :  { %4630 = vrot.lane.b32.xlu1 %v4609_v14, %s5048_s22 }
 0x151   :  { %4655 = vrot.lane.b32.xlu0 %v4639_v21, %s5050_s24  ;;  %4650 = vrot.lane.b32.xlu2 %v4639_v21, %s5049_s23 }
 0x152   :  { %4645 = vrot.lane.b32.xlu1 %v4639_v21, %s5051_s25 }
 0x159   :  { %4670 = vrot.lane.b32.xlu0 %v4669_v22, %s5050_s24  ;;  %4665 = vrot.lane.b32.xlu2 %v4639_v21, %s5048_s22 }
 0x15a   :  { %4660 = vrot.lane.b32.xlu1 %v4639_v21, %s5053_s27 }
 0x161   :  { %4685 = vrot.lane.b32.xlu0 %v5241_v23, %s5050_s24  ;;  %4680 = vrot.lane.b32.xlu2 %v4669_v22, %s5049_s23  ;;  %s5060_s24 = smov 56  }
 0x162   :  { %4675 = vrot.lane.b32.xlu1 %v4669_v22, %s5048_s22 }
 0x169   :  { %4695 = vrot.lane.b32.xlu2 %v5241_v23, %s5049_s23 }
 0x16a   :  { %4690 = vrot.lane.b32.xlu1 %v5241_v23, %s5048_s22 }
 0x172   :  { %4705 = vrot.lane.b32.xlu1 %v4669_v22, %s5043_s3 }
 0x173   :  { %v4576_v24 = vpop.permute.xlu2 %4575 }
 0x174   :  { %v4578_v27 = vunpack.i.h.bf16 %v4576_v24  ;;  %v4577_v28 = vunpack.i.l.bf16 %v4576_v24 }
 0x176   :  { %v1364_v35 = vrot.slane %v4578_v27, 4  ;;  %v1308_v40 = vrot.slane %v4577_v28, 4 }
 0x18b   :  { %v5254_v31 = vpop.permute.xlu2 %4595  ;;  %v4581_v33 = vpop.permute.xlu0 %4580 }
 0x18c   :  { %v4583_v36 = vunpack.i.h.bf16 %v4581_v33  ;;  %v4582_v37 = vunpack.i.l.bf16 %v4581_v33  ;;  %v4571_v38 = vpop.permute.xlu1 %4570  ;;  %v4598_v15 = vunpack.i.h.bf16 %v5254_v31  ;;  %v4597_v21 = vunpack.i.l.bf16 %v5254_v31 }
 0x18d   :  { %v4573_v41 = vunpack.i.h.bf16 %v4571_v38  ;;  %v4572_v42 = vunpack.i.l.bf16 %v4571_v38 }
 0x18e   :  { %v1365_v44 = vsel %vm360_vm1, %v1364_v35, %v4583_v36  ;;  %v1366_v45 = vrot.slane %v4583_v36, 4  ;;  %v1309_v50 = vsel %vm360_vm1, %v1308_v40, %v4582_v37  ;;  %v1310_v51 = vrot.slane %v4582_v37, 4 }
 0x18f   :  { %v1371_v49 = vperm.slane %v1365_v44, %v5256_v32  ;;  %v1352_v52 = vrot.slane %v4573_v41, 4  ;;  %v1315_v54 = vperm.slane %v1309_v50, %v5256_v32  ;;  %v1355_v55 = vsel %vm360_vm1, %v4573_v41, %v1354_v34 }
 0x190   :  { %v1367_v53 = vsel %vm360_vm1, %v4578_v27, %v1366_v45  ;;  %v1296_v56 = vrot.slane %v4572_v42, 4  ;;  %v1311_v59 = vsel %vm360_vm1, %v4577_v28, %v1310_v51  ;;  %v1363_v2 = vperm.slane %v1355_v55, %v5256_v32 }
 0x191   :  { %v1375_v57 = vperm.slane %v1367_v53, %v5256_v32  ;;  %v1376_v58 = vrot.slane %v1371_v49, 4  ;;  %v1353_v60 = vsel %vm360_vm1, %v1352_v52, %v5198_v62  ;;  %v1319_v63 = vperm.slane %v1311_v59, %v5256_v32 }
 0x192   :  { %v1359_v1 = vperm.slane %v1353_v60, %v5256_v32  ;;  %v1320_v4 = vrot.slane %v1315_v54, 4  ;;  %v1297_v7 = vsel %vm360_vm1, %v1296_v56, %v5196_v61  ;;  %v1299_v8 = vsel %vm360_vm1, %v4572_v42, %v1298_v29 }
 0x193   :  { %v1388_v3 = vrot.slane %v1375_v57, 4  ;;  %v5280_v9 = vpop.permute.xlu2 %4600  ;;  %v1332_v10 = vrot.slane %v1319_v63, 4  ;;  %v1390_v14 = vrot.slane %v1363_v2, 4  ;;  %v1303_v17 = vperm.slane %v1297_v7, %v5256_v32 }
 0x194   :  { %v1377_v62 = vsel %vm360_vm1, %v1376_v58, %v1359_v1  ;;  %v1378_v11 = vrot.slane %v1359_v1, 4  ;;  %v1307_v18 = vperm.slane %v1299_v8, %v5256_v32  ;;  %v4603_v35 = vunpack.i.h.bf16 %v5280_v9 }
 0x195   :  { %v1389_v16 = vsel %vm360_vm1, %v1388_v3, %v1363_v2  ;;  %v1391_v22 = vsel %vm360_vm1, %v1375_v57, %v1390_v14  ;;  %v5292_v25 = vperm.slane %v1377_v62, %v5273_v0  ;;  %v1321_v28 = vsel %vm360_vm1, %v1320_v4, %v1303_v17 }
 0x196   :  { %v1379_v61 = vsel %vm360_vm1, %v1371_v49, %v1378_v11  ;;  %v1395_v24 = vperm.slane %v1389_v16, %v5273_v0  ;;  %v1399_v27 = vperm.slane %v1391_v22, %v5273_v0  ;;  %v1322_v33 = vrot.slane %v1303_v17, 4 }
 0x197   :  { %v1387_v26 = vperm.slane %v1379_v61, %v5273_v0  ;;  %v1333_v34 = vsel %vm360_vm1, %v1332_v10, %v1307_v18  ;;  %v5302_v38 = vperm.slane %v1321_v28, %v5273_v0  ;;  %v1334_v40 = vrot.slane %v1307_v18, 4 }
 0x198   :  { %v1404_v29 = vrot.slane %v1395_v24, 4  ;;  %v1406_v37 = vrot.slane %v1399_v27, 4  ;;  %v1323_v41 = vsel %vm360_vm1, %v1315_v54, %v1322_v33  ;;  %v1339_v42 = vperm.slane %v1333_v34, %v5273_v0 }
 0x199   :  { %v5299_v36 = vrot.slane %v1387_v26, 4  ;;  %v1476_v46 = vrot.slane %v4598_v15, 4  ;;  %v1420_v47 = vrot.slane %v4597_v21, 4  ;;  %v1331_v50 = vperm.slane %v1323_v41, %v5273_v0 }
 0x19a   :  { %v5319_v53 = vsel %vm360_vm1, 0.0, %v1404_v29  ;;  %v1585_v54 = vsel %vm360_vm1, %v1406_v37, %v1395_v24  ;;  %v1335_v55 = vsel %vm360_vm1, %v1319_v63, %v1334_v40  ;;  %v5329_v59 = vrot.slane %v4603_v35, 4 }
 0x19b   :  { %v4621_v51 = vpop.permute.xlu2 %4620  ;;  %v5316_v52 = vsel %vm360_vm1, 0.0, %v5299_v36  ;;  %7951 = vst [vmem:[#allocation13_spill] sm:$0xff] %v5319_v53  ;;  %v1343_v56 = vperm.slane %v1335_v55, %v5273_v0  ;;  %v5325_v58 = vrot.slane %v1331_v50, 4  ;;  %v5332_v60 = vsel %vm360_vm1, 0.0, %v1406_v37 }
 0x19c   :  { %7952 = vst [vmem:[#allocation14_spill] sm:$0xff] %v5332_v60  ;;  %v1348_v1 = vrot.slane %v1339_v42, 4  ;;  %v4623_v2 = vunpack.i.h.bf16 %v4621_v51  ;;  %v4622_v3 = vunpack.i.l.bf16 %v4621_v51  ;;  %v5336_v63 = vperm.slane %v1585_v54, %v5256_v32 }
 0x19d   :  { %v1350_v7 = vrot.slane %v1343_v56, 4  ;;  %v7937_v8 = vunpack.i.l.bf16 %v5280_v9  ;;  %v5341_v10 = vsel %vm360_vm1, 0.0, %v5325_v58 }
 0x19e   :  { %7953 = vst [vmem:[#allocation15_spill] sm:$0xff] %v5336_v63  ;;  %v472_v62 = vrot.slane %v4623_v2, 4  ;;  %v359_v11 = vrot.slane %v4622_v3, 4  ;;  %v363_v14 = vsel %vm360_vm1, %v4622_v3, %v362_v48  ;;  %v5355_v22 = vsel %vm360_vm1, 0.0, %v1348_v1 }
 0x19f   :  { %v5348_v17 = vsel %vm360_vm1, 0.0, %v1350_v7  ;;  %v1531_v18 = vsel %vm360_vm1, %v1350_v7, %v1339_v42  ;;  %v5352_v61 = vperm.slane %v363_v14, %v5256_v32  ;;  %v475_v48 = vsel %vm360_vm1, %v4623_v2, %v474_v39 }
 0x1a0   :  { %v473_v24 = vsel %vm360_vm1, %v472_v62, %v5216_v12  ;;  %v361_v26 = vsel %vm360_vm1, %v359_v11, %v5218_v13  ;;  %v5366_v28 = vperm.slane %v1531_v18, %v5256_v32  ;;  %v5371_v33 = vrot.slane %v7937_v8, 4 }
 0x1a1   :  { %v5376_v13 = vperm.slane %v473_v24, %v5256_v32  ;;  %v5379_v12 = vperm.slane %v361_v26, %v5256_v32  ;;  %v5383_v50 = vperm.slane %v475_v48, %v5256_v32 }
 0x1a3   :  { %v4606_v34 = vpop.permute.xlu0 %4605  ;;  %v5373_v37 = vpop.permute.xlu2 %4635 }
 0x1a4   :  { %v4608_v39 = vunpack.i.h.bf16 %v4606_v34  ;;  %v4607_v40 = vunpack.i.l.bf16 %v4606_v34  ;;  %v4586_v41 = vpop.permute.xlu1 %4585  ;;  %v7935_v54 = vunpack.i.h.bf16 %v5373_v37  ;;  %v7934_v34 = vunpack.i.l.bf16 %v5373_v37 }
 0x1a5   :  { %v4588_v51 = vunpack.i.h.bf16 %v4586_v41  ;;  %v4587_v18 = vunpack.i.l.bf16 %v4586_v41 }
 0x1a6   :  { %v1477_v55 = vsel %vm360_vm1, %v1476_v46, %v4608_v39  ;;  %v1478_v56 = vrot.slane %v4608_v39, 4  ;;  %v1421_v1 = vsel %vm360_vm1, %v1420_v47, %v4607_v40  ;;  %v1422_v2 = vrot.slane %v4607_v40, 4 }
 0x1a7   :  { %v1483_v3 = vperm.slane %v1477_v55, %v5256_v32  ;;  %v1427_v7 = vperm.slane %v1421_v1, %v5256_v32  ;;  %v1464_v62 = vrot.slane %v4588_v51, 4  ;;  %v1467_v11 = vsel %vm360_vm1, %v4588_v51, %v1466_v43 }
 0x1a8   :  { %v1479_v14 = vsel %vm360_vm1, %v4598_v15, %v1478_v56  ;;  %v1423_v46 = vsel %vm360_vm1, %v4597_v21, %v1422_v2  ;;  %v1475_v47 = vperm.slane %v1467_v11, %v5256_v32  ;;  %v1408_v40 = vrot.slane %v4587_v18, 4 }
 0x1a9   :  { %v1487_v24 = vperm.slane %v1479_v14, %v5256_v32  ;;  %v1488_v26 = vrot.slane %v1483_v3, 4  ;;  %v1431_v48 = vperm.slane %v1423_v46, %v5256_v32  ;;  %v1465_v43 = vsel %vm360_vm1, %v1464_v62, %v5209_v6 }
 0x1aa   :  { %v1502_v39 = vrot.slane %v1475_v47, 4  ;;  %v1411_v31 = vsel %vm360_vm1, %v4587_v18, %v1410_v30  ;;  %v1471_v41 = vperm.slane %v1465_v43, %v5256_v32  ;;  %v1432_v56 = vrot.slane %v1427_v7, 4 }
 0x1ab   :  { %v1500_v15 = vrot.slane %v1487_v24, 4  ;;  %v1444_v21 = vrot.slane %v1431_v48, 4  ;;  %v1419_v51 = vperm.slane %v1411_v31, %v5256_v32  ;;  %v1409_v6 = vsel %vm360_vm1, %v1408_v40, %v5207_v5  ;;  %v5425_v31 = vpop.permute.xlu2 %4650 }
 0x1ac   :  { %v1503_v1 = vsel %vm360_vm1, %v1487_v24, %v1502_v39  ;;  %v1489_v2 = vsel %vm360_vm1, %v1488_v26, %v1471_v41  ;;  %v1490_v62 = vrot.slane %v1471_v41, 4  ;;  %v1415_v18 = vperm.slane %v1409_v6, %v5256_v32  ;;  %v4611_v24 = vpop.permute.xlu0 %4610  ;;  %v4591_v27 = vpop.permute.xlu1 %4590 }
 0x1ad   :  { %v1501_v11 = vsel %vm360_vm1, %v1500_v15, %v1475_v47  ;;  %v1511_v30 = vperm.slane %v1503_v1, %v5273_v0  ;;  %v5418_v14 = vperm.slane %v1489_v2, %v5273_v0  ;;  %v1445_v43 = vsel %vm360_vm1, %v1444_v21, %v1419_v51 }
 0x1ae   :  { %v1507_v46 = vperm.slane %v1501_v11, %v5273_v0  ;;  %v1491_v5 = vsel %vm360_vm1, %v1483_v3, %v1490_v62  ;;  %v1446_v40 = vrot.slane %v1419_v51, 4  ;;  %v1433_v41 = vsel %vm360_vm1, %v1432_v56, %v1415_v18 }
 0x1af   :  { %v1518_v26 = vrot.slane %v1511_v30, 4  ;;  %v1499_v47 = vperm.slane %v1491_v5, %v5273_v0  ;;  %v1451_v1 = vperm.slane %v1445_v43, %v5273_v0  ;;  %v1434_v2 = vrot.slane %v1415_v18, 4 }
 0x1b0   :  { %v1516_v15 = vrot.slane %v1507_v46, 4  ;;  %v5433_v21 = vrot.slane %v7935_v54, 4  ;;  %v5437_v3 = vrot.slane %v7934_v34, 4  ;;  %v5451_v43 = vperm.slane %v1433_v41, %v5273_v0 }
 0x1b1   :  { %v5440_v62 = vrot.slane %v1499_v47, 4  ;;  %v5443_v11 = vsel %vm360_vm1, 0.0, %v1518_v26  ;;  %v1693_v56 = vsel %vm360_vm1, %v1518_v26, %v1507_v46  ;;  %v1435_v18 = vsel %vm360_vm1, %v1427_v7, %v1434_v2 }
 0x1b2   :  { %v5447_v30 = vsel %vm360_vm1, 0.0, %v1516_v15  ;;  %v1447_v5 = vsel %vm360_vm1, %v1431_v48, %v1446_v40  ;;  %v1443_v16 = vperm.slane %v1435_v18, %v5273_v0  ;;  %v1460_v4 = vrot.slane %v1451_v1, 4 }
 0x1b3   :  { %v1455_v47 = vperm.slane %v1447_v5, %v5273_v0  ;;  %v4613_v29 = vunpack.i.h.bf16 %v4611_v24  ;;  %v5458_v46 = vsel %vm360_vm1, 0.0, %v5440_v62  ;;  %v5461_v26 = vperm.slane %v1693_v56, %v5256_v32  ;;  %v5486_v41 = vpop.permute.xlu2 %4665 }
 0x1b4   :  { %v4612_v7 = vunpack.i.l.bf16 %v4611_v24  ;;  %v7936_v15 = vunpack.i.h.bf16 %v5425_v31  ;;  %v5465_v48 = vrot.slane %v1443_v16, 4  ;;  %v7938_v5 = vunpack.i.l.bf16 %v5425_v31  ;;  %v4626_v16 = vpop.permute.xlu0 %4625 }
 0x1b5   :  { %v1462_v40 = vrot.slane %v1455_v47, 4  ;;  %v496_v2 = vrot.slane %v4613_v29, 4  ;;  %v4593_v49 = vunpack.i.h.bf16 %v4591_v27  ;;  %v4592_v57 = vunpack.i.l.bf16 %v4591_v27 }
 0x1b6   :  { %v384_v18 = vrot.slane %v4612_v7, 4  ;;  %v5471_v56 = vsel %vm360_vm1, 0.0, %v1460_v4  ;;  %v5475_v24 = vrot.slane %v7936_v15, 4  ;;  %v5479_v47 = vsel %vm360_vm1, 0.0, %v5465_v48 }
 0x1b7   :  { %v5482_v44 = vsel %vm360_vm1, 0.0, %v1462_v40  ;;  %v1639_v27 = vsel %vm360_vm1, %v1462_v40, %v1451_v1  ;;  %v497_v45 = vsel %vm360_vm1, %v496_v2, %v4593_v49  ;;  %v498_v4 = vrot.slane %v4593_v49, 4 }
 0x1b8   :  { %v503_v34 = vperm.slane %v497_v45, %v5256_v32  ;;  %v385_v39 = vsel %vm360_vm1, %v384_v18, %v4592_v57  ;;  %v386_v55 = vrot.slane %v4592_v57, 4  ;;  %v598_v6 = vrot.slane %v7938_v5, 4 }
 0x1b9   :  { %v391_v42 = vperm.slane %v385_v39, %v5256_v32  ;;  %v4628_v51 = vunpack.i.h.bf16 %v4626_v16  ;;  %v4627_v54 = vunpack.i.l.bf16 %v4626_v16  ;;  %v499_v1 = vsel %vm360_vm1, %v4613_v29, %v498_v4 }
 0x1ba   :  { %v387_v40 = vsel %vm360_vm1, %v4612_v7, %v386_v55  ;;  %v4668_v49 = vunpack.i.h.bf16 %v5486_v41  ;;  %v507_v45 = vperm.slane %v499_v1, %v5256_v32  ;;  %v546_v2 = vrot.slane %v503_v34, 4 }
 0x1bb   :  { %v395_v57 = vperm.slane %v387_v40, %v5256_v32  ;;  %v508_v18 = vrot.slane %v4628_v51, 4  ;;  %v396_v8 = vrot.slane %v4627_v54, 4  ;;  %v399_v39 = vsel %vm360_vm1, %v4627_v54, %v5371_v33 }
 0x1bc   :  { %v511_v16 = vsel %vm360_vm1, %v4628_v51, %v5329_v59  ;;  %v4667_v15 = vunpack.i.l.bf16 %v5486_v41  ;;  %v434_v29 = vrot.slane %v391_v42, 4  ;;  %v407_v55 = vperm.slane %v399_v39, %v5256_v32  ;;  %v5513_v59 = vpop.permute.xlu1 %4615 }
 0x1bd   :  { %v446_v4 = vrot.slane %v395_v57, 4  ;;  %v509_v7 = vsel %vm360_vm1, %v508_v18, %v4603_v35  ;;  %v7954_v1 = vunpack.i.l.bf16 %v5280_v9  ;;  %v519_v33 = vperm.slane %v511_v16, %v5256_v32 }
 0x1be   :  { %v515_v5 = vperm.slane %v509_v7, %v5256_v32  ;;  %v708_v54 = vrot.slane %v4668_v49, 4  ;;  %v558_v51 = vrot.slane %v507_v45, 4  ;;  %v444_v23 = vrot.slane %v407_v55, 4 }
 0x1bf   :  { %v397_v40 = vsel %vm360_vm1, %v396_v8, %v7954_v1  ;;  %v447_v39 = vsel %vm360_vm1, %v407_v55, %v446_v4  ;;  %v556_v9 = vrot.slane %v519_v33, 4  ;;  %v596_v18 = vrot.slane %v4667_v15, 4 }
 0x1c0   :  { %v403_v41 = vperm.slane %v397_v40, %v5256_v32  ;;  %v5518_v63 = vperm.slane %v447_v39, %v5273_v0  ;;  %v544_v35 = vrot.slane %v515_v5, 4  ;;  %v445_v16 = vsel %vm360_vm1, %v444_v23, %v395_v57 }
 0x1c1   :  { %v547_v1 = vsel %vm360_vm1, %v515_v5, %v546_v2  ;;  %v5527_v40 = vperm.slane %v445_v16, %v5273_v0  ;;  %v599_v55 = vsel %vm360_vm1, %v4667_v15, %v598_v6  ;;  %v559_v23 = vsel %vm360_vm1, %v519_v33, %v558_v51 }
 0x1c2   :  { %v432_v8 = vrot.slane %v403_v41, 4  ;;  %v435_v7 = vsel %vm360_vm1, %v403_v41, %v434_v29  ;;  %v545_v4 = vsel %vm360_vm1, %v544_v35, %v503_v34  ;;  %v557_v29 = vsel %vm360_vm1, %v556_v9, %v507_v45  ;;  %v5565_v9 = vpop.permute.xlu0 %4640 }
 0x1c3   :  { %v5524_v60 = vperm.slane %v435_v7, %v5273_v0  ;;  %v5533_v53 = vperm.slane %v545_v4, %v5273_v0  ;;  %v5538_v5 = vperm.slane %v1639_v27, %v5256_v32  ;;  %v5545_v34 = vperm.slane %v547_v1, %v5273_v0  ;;  %7956 = vst [vmem:[#allocation16_spill] sm:$0xff] %v5565_v9 }
 0x1c4   :  { %v433_v39 = vsel %vm360_vm1, %v432_v8, %v391_v42  ;;  %v5550_v15 = vperm.slane %v557_v29, %v5273_v0  ;;  %v7955_v45 = vunpack.i.l.bf16 %v5425_v31  ;;  %v5557_v51 = vperm.slane %v559_v23, %v5273_v0  ;;  %v5582_v23 = vpop.permute.xlu2 %4680 }
 0x1c5   :  { %v5542_v57 = vperm.slane %v433_v39, %v5273_v0  ;;  %v5563_v35 = vperm.slane %v599_v55, %v5256_v32  ;;  %v7957_v7 = vunpack.i.h.bf16 %v5425_v31  ;;  %v4618_v1 = vunpack.i.h.bf16 %v5513_v59  ;;  %7958 = vst [vmem:[#allocation17_spill] sm:$0xff] %v5582_v23  ;;  %v4631_v31 = vpop.permute.xlu1 %4630 }
 0x1c6   :  { %v597_v27 = vsel %vm360_vm1, %v596_v18, %v7955_v45  ;;  %v711_v18 = vsel %vm360_vm1, %v4668_v49, %v5475_v24  ;;  %v4617_v45 = vunpack.i.l.bf16 %v5513_v59  ;;  %v7942_v24 = vunpack.i.h.bf16 %v5565_v9 }
 0x1c7   :  { %v5560_v41 = vperm.slane %v597_v27, %v5256_v32  ;;  %v709_v16 = vsel %vm360_vm1, %v708_v54, %v7957_v7  ;;  %v5580_v29 = vperm.slane %v711_v18, %v5256_v32  ;;  %v7943_v49 = vunpack.i.l.bf16 %v5565_v9 }
 0x1c8   :  { %v5577_v55 = vperm.slane %v709_v16, %v5256_v32  ;;  %v486_v8 = vrot.slane %v4618_v1, 4  ;;  %v4633_v39 = vunpack.i.h.bf16 %v4631_v31  ;;  %v374_v42 = vrot.slane %v4617_v45, 4 }
 0x1c9   :  { %v4632_v54 = vunpack.i.l.bf16 %v4631_v31  ;;  %v1628_v59 = vsel %vm360_vm1, %v5465_v48, %v5451_v43  ;;  %v5598_v4 = vrot.slane %v7942_v24, 4  ;;  %v5602_v7 = vrot.slane %v7943_v49, 4 }
 0x1ca   :  { %v484_v16 = vrot.slane %v4633_v39, 4  ;;  %v487_v18 = vsel %vm360_vm1, %v4633_v39, %v486_v8  ;;  %v7959_v6 = vrot.slane %v5451_v43, 4  ;;  %v7960_v23 = vrot.slane %v5418_v14, 4 }
 0x1cb   :  { %v372_v27 = vrot.slane %v4632_v54, 4  ;;  %v375_v33 = vsel %vm360_vm1, %v4632_v54, %v374_v42  ;;  %v495_v31 = vperm.slane %v487_v18, %v5256_v32  ;;  %v5618_v8 = vperm.slane %v1628_v59, %v5256_v32 }
 0x1cc   :  { %v1457_v48 = vsel %vm360_vm1, 0.0, %v7959_v6  ;;  %v383_v2 = vperm.slane %v375_v33, %v5256_v32  ;;  %v485_v24 = vsel %vm360_vm1, %v484_v16, %v4618_v1  ;;  %v5615_v49 = vsel %vm360_vm1, 0.0, %v7960_v23 }
 0x1cd   :  { %v373_v42 = vsel %vm360_vm1, %v372_v27, %v4617_v45  ;;  %v491_v39 = vperm.slane %v485_v24, %v5256_v32  ;;  %v532_v54 = vrot.slane %v495_v31, 4  ;;  %v7961_v43 = vrot.slane %v5479_v47, 4 }
 0x1ce   :  { %v379_v33 = vperm.slane %v373_v42, %v5256_v32  ;;  %v420_v1 = vrot.slane %v383_v2, 4  ;;  %v7962_v16 = vrot.slane %v5352_v61, 4  ;;  %v7963_v18 = vrot.slane %v5383_v50, 4 }
 0x1cf   :  { %v1634_v6 = vsel %vm360_vm1, %v7961_v43, %v1457_v48  ;;  %v520_v27 = vrot.slane %v491_v39, 4  ;;  %v7964_v24 = vrot.slane %v5376_v13, 4  ;;  %v533_v48 = vsel %vm360_vm1, %v532_v54, %v5383_v50 }
 0x1d0   :  { %v423_v23 = vsel %vm360_vm1, %v383_v2, %v7962_v16  ;;  %v535_v59 = vsel %vm360_vm1, %v495_v31, %v7963_v18  ;;  %v408_v42 = vrot.slane %v379_v33, 4  ;;  %v7965_v43 = vrot.slane %v5379_v12, 4 }
 0x1d1   :  { %v431_v45 = vperm.slane %v423_v23, %v5273_v0  ;;  %v523_v47 = vsel %vm360_vm1, %v491_v39, %v7964_v24  ;;  %v421_v2 = vsel %vm360_vm1, %v420_v1, %v5352_v61  ;;  %v5647_v18 = vperm.slane %v1634_v6, %v5256_v32 }
 0x1d2   :  { %v411_v9 = vsel %vm360_vm1, %v379_v33, %v7965_v43  ;;  %v531_v31 = vperm.slane %v523_v47, %v5273_v0  ;;  %v427_v23 = vperm.slane %v421_v2, %v5273_v0  ;;  %v7966_v50 = vrot.slane %v5482_v44, 4 }
 0x1d3   :  { %v419_v16 = vperm.slane %v411_v9, %v5273_v0  ;;  %v409_v54 = vsel %vm360_vm1, %v408_v42, %v5379_v12  ;;  %v470_v33 = vrot.slane %v431_v45, 4  ;;  %v521_v61 = vsel %vm360_vm1, %v520_v27, %v5376_v13 }
 0x1d4   :  { %v1645_v39 = vsel %vm360_vm1, %v7966_v50, %v5471_v56  ;;  %v1652_v1 = vrot.slane %v5618_v8, 4  ;;  %v415_v9 = vperm.slane %v409_v54, %v5273_v0  ;;  %v539_v6 = vperm.slane %v533_v48, %v5273_v0 }
 0x1d5   :  { %v462_v24 = vrot.slane %v419_v16, 4  ;;  %v543_v47 = vperm.slane %v535_v59, %v5273_v0  ;;  %v466_v43 = vrot.slane %v427_v23, 4  ;;  %v7967_v44 = vrot.slane %v5518_v63, 4 }
 0x1d6   :  { %v527_v12 = vperm.slane %v521_v61, %v5273_v0  ;;  %v574_v42 = vrot.slane %v531_v31, 4  ;;  %v7968_v2 = vrot.slane %v5542_v57, 4  ;;  %v458_v27 = vrot.slane %v415_v9, 4 }
 0x1d7   :  { %v469_v56 = vsel %vm360_vm1, %v7967_v44, %v431_v45  ;;  %v7969_v50 = vrot.slane %v5524_v60, 4  ;;  %v7970_v59 = vrot.slane %v5545_v34, 4  ;;  %v5682_v45 = vsel %vm360_vm1, %v5524_v60, %v462_v24 }
 0x1d8   :  { %v5668_v13 = vsel %vm360_vm1, %v7968_v2, %v415_v9  ;;  %v7971_v61 = vrot.slane %v5527_v40, 4  ;;  %v5689_v9 = vsel %vm360_vm1, %v5518_v63, %v470_v33  ;;  %v570_v2 = vrot.slane %v527_v12, 4 }
 0x1d9   :  { %v5673_v48 = vsel %vm360_vm1, %v7969_v50, %v419_v16  ;;  %v5678_v54 = vsel %vm360_vm1, %v7970_v59, %v531_v31  ;;  %v5693_v16 = vsel %vm360_vm1, %v5527_v40, %v466_v43  ;;  %v7972_v31 = vrot.slane %v5550_v15, 4 }
 0x1da   :  { %v465_v44 = vsel %vm360_vm1, %v7971_v61, %v427_v23  ;;  %v578_v59 = vrot.slane %v539_v6, 4  ;;  %v582_v60 = vrot.slane %v543_v47, 4  ;;  %v5700_v24 = vsel %vm360_vm1, %v5542_v57, %v458_v27 }
 0x1db   :  { %v577_v50 = vsel %vm360_vm1, %v7972_v31, %v539_v6  ;;  %v7973_v23 = vrot.slane %v5533_v53, 4  ;;  %v5709_v33 = vsel %vm360_vm1, %v5545_v34, %v574_v42  ;;  %v810_v40 = vrot.slane %v5668_v13, 4 }
 0x1dc   :  { %v5714_v43 = vsel %vm360_vm1, %v5533_v53, %v570_v2  ;;  %v7974_v6 = vrot.slane %v5557_v51, 4  ;;  %v832_v61 = vrot.slane %v469_v56, 4  ;;  %v834_v42 = vrot.slane %v465_v44, 4 }
 0x1dd   :  { %v5705_v63 = vsel %vm360_vm1, %v7973_v23, %v527_v12  ;;  %v5722_v12 = vsel %vm360_vm1, %v5550_v15, %v578_v59  ;;  %v846_v31 = vrot.slane %v5693_v16, 4  ;;  %v5728_v53 = vsel %vm360_vm1, %v5557_v51, %v582_v60 }
 0x1de   :  { %v581_v57 = vsel %vm360_vm1, %v7974_v6, %v543_v47  ;;  %7975 = vst [vmem:[#allocation18_spill] sm:$0xff] %v5728_v53  ;;  %v833_v47 = vsel %vm360_vm1, %v832_v61, %v465_v44  ;;  %v922_v23 = vrot.slane %v5705_v63, 4  ;;  %v5735_v6 = vsel %vm360_vm1, %v5673_v48, %v810_v40 }
 0x1df   :  { %7976 = vst [vmem:[#allocation19_spill] sm:$0xff] %v5735_v6  ;;  %v835_v15 = vsel %vm360_vm1, %v469_v56, %v834_v42  ;;  %v5741_v27 = vperm.slane %v833_v47, %v5256_v32  ;;  %v944_v60 = vrot.slane %v581_v57, 4  ;;  %v946_v2 = vrot.slane %v577_v50, 4 }
 0x1e0   :  { %v5746_v44 = vsel %vm360_vm1, %v5689_v9, %v846_v31  ;;  %v5750_v61 = vperm.slane %v1645_v39, %v5256_v32  ;;  %v1653_v56 = vsel %vm360_vm1, %v5647_v18, %v1652_v1  ;;  %v5755_v42 = vperm.slane %v835_v15, %v5256_v32  ;;  %v4656_v15 = vpop.permute.xlu0 %4655 }
 0x1e1   :  { %7977 = vst [vmem:[#allocation20_spill] sm:$0xff] %v5746_v44  ;;  %v5759_v47 = vsel %vm360_vm1, %v5678_v54, %v922_v23  ;;  %v1664_v31 = vrot.slane %v5538_v5, 4  ;;  %v945_v34 = vsel %vm360_vm1, %v944_v60, %v577_v50  ;;  %v947_v40 = vsel %vm360_vm1, %v581_v57, %v946_v2 }
 0x1e2   :  { %7978 = vst [vmem:[#allocation21_spill] sm:$0xff] %v5755_v42  ;;  %v5766_v39 = vperm.slane %v1653_v56, %v5273_v0  ;;  %v1682_v1 = vsel %vm360_vm1, %v5440_v62, %v5418_v14  ;;  %v7980_v51 = vrot.slane %v5458_v46, 4  ;;  %v7981_v57 = vrot.slane %v5443_v11, 4 }
 0x1e3   :  { %7979 = vst [vmem:[#allocation22_spill] sm:$0xff] %v5759_v47  ;;  %v1665_v23 = vsel %vm360_vm1, %v5750_v61, %v1664_v31  ;;  %v5774_v59 = vperm.slane %v1682_v1, %v5256_v32  ;;  %v1718_v56 = vrot.slane %v5461_v26, 4  ;;  %v958_v46 = vrot.slane %v5722_v12, 4 }
 0x1e4   :  { %v1688_v50 = vsel %vm360_vm1, %v7980_v51, %v5615_v49  ;;  %v1699_v2 = vsel %vm360_vm1, %v7981_v57, %v5447_v30  ;;  %v5785_v60 = vperm.slane %v1665_v23, %v5273_v0  ;;  %v4658_v51 = vunpack.i.h.bf16 %v4656_v15 }
 0x1e5   :  { %v5788_v14 = vperm.slane %v1688_v50, %v5256_v32  ;;  %v5791_v62 = vperm.slane %v1699_v2, %v5256_v32  ;;  %v1706_v49 = vrot.slane %v5774_v59, 4  ;;  %v4657_v31 = vunpack.i.l.bf16 %v4656_v15 }
 0x1e6   :  { %v5797_v11 = vperm.slane %v945_v34, %v5256_v32  ;;  %v5800_v30 = vperm.slane %v947_v40, %v5256_v32  ;;  %v1678_v1 = vrot.slane %v5785_v60, 4  ;;  %v696_v2 = vrot.slane %v4658_v51, 4 }
 0x1e7   :  { %v1719_v23 = vsel %vm360_vm1, %v5791_v62, %v1718_v56  ;;  %v1707_v50 = vsel %vm360_vm1, %v5788_v14, %v1706_v49  ;;  %v7984_v15 = vrot.slane %v5225_v19, 4  ;;  %v584_v56 = vrot.slane %v4657_v31, 4 }
 0x1e8   :  { %7982 = vst [vmem:[#allocation23_spill] sm:$0xff] %v5797_v11  ;;  %v5808_v57 = vperm.slane %v1719_v23, %v5273_v0  ;;  %v1679_v40 = vsel %vm360_vm1, %v1678_v1, %v5766_v39  ;;  %v697_v23 = vsel %vm360_vm1, %v696_v2, %v5225_v19  ;;  %v7985_v44 = vrot.slane %v5227_v20, 4 }
 0x1e9   :  { %7983 = vst [vmem:[#allocation24_spill] sm:$0xff] %v5800_v30  ;;  %v699_v34 = vsel %vm360_vm1, %v4658_v51, %v7984_v15  ;;  %v5816_v30 = vperm.slane %v1707_v50, %v5273_v0  ;;  %v2294_v49 = vpack.c.bf16 %v1679_v40, %v1679_v40  ;;  %v5827_v51 = vsel %vm360_vm1, %v5728_v53, %v958_v46 }
 0x1ea   :  { %v707_v47 = vperm.slane %v699_v34, %v5256_v32  ;;  %v1732_v42 = vrot.slane %v5808_v57, 4  ;;  %v587_v6 = vsel %vm360_vm1, %v4657_v31, %v7985_v44  ;;  %7986 = vst [vmem:[#allocation25_spill] sm:$0xff] %v5827_v51  ;;  %v703_v1 = vperm.slane %v697_v23, %v5256_v32 }
 0x1eb   :  { %v585_v50 = vsel %vm360_vm1, %v584_v56, %v5227_v20  ;;  %v595_v15 = vperm.slane %v587_v6, %v5256_v32  ;;  %v2489_v40 = vunpack.c.l.b16 %v2294_v49  ;;  %v7987_v31 = vrot.slane %v5563_v35, 4 }
 0x1ec   :  { %v1733_v34 = vsel %vm360_vm1, %v1732_v42, %v5816_v30  ;;  %v758_v19 = vrot.slane %v707_v47, 4  ;;  %v591_v2 = vperm.slane %v585_v50, %v5256_v32  ;;  %v746_v44 = vrot.slane %v703_v1, 4  ;;  %v5848_v50 = vpop.permute.xlu2 %4695 }
 0x1ed   :  { %v2295_v11 = vpack.c.bf16 %v1733_v34, %v1733_v34  ;;  %v645_v46 = vsel %vm360_vm1, %v7987_v31, %v595_v15  ;;  %v646_v51 = vrot.slane %v595_v15, 4  ;;  %v7988_v23 = vrot.slane %v5560_v41, 4 }
 0x1ee   :  { %v634_v56 = vrot.slane %v591_v2, 4  ;;  %v5843_v6 = vperm.slane %v645_v46, %v5273_v0  ;;  %v7989_v42 = vrot.slane %v5577_v55, 4  ;;  %v7990_v31 = vrot.slane %v5580_v29, 4 }
 0x1ef   :  { %v633_v20 = vsel %vm360_vm1, %v7988_v23, %v591_v2  ;;  %v2490_v34 = vunpack.c.l.b16 %v2295_v11  ;;  %v647_v15 = vsel %vm360_vm1, %v5563_v35, %v646_v51 }
 0x1f0   :  { %v745_v49 = vsel %vm360_vm1, %v7989_v42, %v703_v1  ;;  %v5851_v53 = vperm.slane %v633_v20, %v5273_v0  ;;  %v757_v2 = vsel %vm360_vm1, %v7990_v31, %v707_v47  ;;  %v635_v46 = vsel %vm360_vm1, %v5560_v41, %v634_v56  ;;  %v4646_v42 = vpop.permute.xlu1 %4645 }
 0x1f1   :  { %v5861_v23 = vperm.slane %v647_v15, %v5273_v0  ;;  %v747_v1 = vsel %vm360_vm1, %v5577_v55, %v746_v44  ;;  %v5866_v11 = vperm.slane %v745_v49, %v5273_v0  ;;  %v2492_v20 = vpack.c.b16 %v2490_v34, %v2489_v40 }
 0x1f2   :  { %v5869_v35 = vperm.slane %v635_v46, %v5273_v0  ;;  %v759_v41 = vsel %vm360_vm1, %v5580_v29, %v758_v19  ;;  %v5878_v44 = vperm.slane %v747_v1, %v5273_v0  ;;  %v5881_v40 = vperm.slane %v757_v2, %v5273_v0 }
 0x1f3   :  { %v2509_v56 = vsel %vm2338_vm2, %v2492_v20, 0  ;;  %v4648_v34 = vunpack.i.h.bf16 %v4646_v42  ;;  %v4647_v15 = vunpack.i.l.bf16 %v4646_v42  ;;  %v1650_v31 = vrot.slane %v5647_v18, 4 }
 0x1f4   :  { %2517 = vmatpush.bf16.xpose.msrb.mxu0 %v2509_v56  ;;  %v5886_v46 = vperm.slane %v759_v41, %v5273_v0  ;;  %v1662_v29 = vrot.slane %v5750_v61, 4  ;;  %v1704_v19 = vrot.slane %v5788_v14, 4  ;;  %v1716_v1 = vrot.slane %v5791_v62, 4 }
 0x1f5   :  { %v720_v20 = vrot.slane %v4648_v34, 4  ;;  %v723_v2 = vsel %vm360_vm1, %v4648_v34, %v5433_v21  ;;  %v608_v56 = vrot.slane %v4647_v15, 4  ;;  %v611_v49 = vsel %vm360_vm1, %v4647_v15, %v5437_v3 }
 0x1f6   :  { %v686_v42 = vrot.slane %v5869_v35, 4  ;;  %v1651_v41 = vsel %vm360_vm1, %v1650_v31, %v5618_v8  ;;  %v1663_v61 = vsel %vm360_vm1, %v1662_v29, %v5538_v5  ;;  %v7991_v14 = vunpack.i.h.bf16 %v5373_v37 }
 0x1f7   :  { %v7992_v21 = vunpack.i.l.bf16 %v5373_v37  ;;  %v1657_v3 = vperm.slane %v1651_v41, %v5273_v0  ;;  %v1669_v15 = vperm.slane %v1663_v61, %v5273_v0  ;;  %v5912_v8 = vperm.slane %v723_v2, %v5256_v32 }
 0x1f8   :  { %v721_v62 = vsel %vm360_vm1, %v720_v20, %v7991_v14  ;;  %v5915_v5 = vperm.slane %v611_v49, %v5256_v32  ;;  %v1705_v37 = vsel %vm360_vm1, %v1704_v19, %v5774_v59  ;;  %v1717_v29 = vsel %vm360_vm1, %v1716_v1, %v5461_v26 }
 0x1f9   :  { %v609_v34 = vsel %vm360_vm1, %v608_v56, %v7992_v21  ;;  %v1674_v31 = vrot.slane %v1669_v15, 4  ;;  %v1680_v20 = vrot.slane %v5766_v39, 4  ;;  %v5923_v56 = vperm.slane %v721_v62, %v5256_v32 }
 0x1fa   :  { %v5926_v41 = vperm.slane %v609_v34, %v5256_v32  ;;  %v1711_v2 = vperm.slane %v1705_v37, %v5273_v0  ;;  %v1723_v49 = vperm.slane %v1717_v29, %v5273_v0  ;;  %v1734_v19 = vrot.slane %v5816_v30, 4 }
 0x1fb   :  { %v1675_v61 = vsel %vm360_vm1, %v1674_v31, %v1657_v3  ;;  %v1681_v59 = vsel %vm360_vm1, %v5785_v60, %v1680_v20  ;;  %v1676_v26 = vrot.slane %v1657_v3, 4  ;;  %v7993_v37 = vrot.slane %v5302_v38, 4 }
 0x1fc   :  { %v1728_v1 = vrot.slane %v1723_v49, 4  ;;  %v2286_v39 = vpack.c.bf16 %v1675_v61, %v1675_v61  ;;  %v2298_v14 = vpack.c.bf16 %v1681_v59, %v1681_v59  ;;  %v1730_v62 = vrot.slane %v1711_v2, 4 }
 0x1fd   :  { %v1735_v21 = vsel %vm360_vm1, %v5808_v57, %v1734_v19  ;;  %v1677_v34 = vsel %vm360_vm1, %v1669_v15, %v1676_v26  ;;  %v1345_v29 = vsel %vm360_vm1, 0.0, %v7993_v37  ;;  %v7994_v31 = vrot.slane %v5292_v25, 4 }
 0x1fe   :  { %v1729_v30 = vsel %vm360_vm1, %v1728_v1, %v1711_v2  ;;  %v2334_v3 = vunpack.c.l.b16 %v2286_v39  ;;  %v2299_v20 = vpack.c.bf16 %v1735_v21, %v1735_v21  ;;  %v2566_v61 = vunpack.c.l.b16 %v2298_v14 }
 0x1ff   :  { %v1401_v60 = vsel %vm360_vm1, 0.0, %v7994_v31  ;;  %v2287_v59 = vpack.c.bf16 %v1729_v30, %v1729_v30  ;;  %v1731_v47 = vsel %vm360_vm1, %v1723_v49, %v1730_v62  ;;  %v2290_v18 = vpack.c.bf16 %v1677_v34, %v1677_v34 }
 0x200   :  { %v1520_v57 = vsel %vm360_vm1, %v5325_v58, %v5302_v38  ;;  %v2567_v15 = vunpack.c.l.b16 %v2299_v20  ;;  %v2291_v19 = vpack.c.bf16 %v1731_v47, %v1731_v47  ;;  %v7995_v37 = vrot.slane %v5341_v10, 4 }
 0x201   :  { %v5949_v26 = vperm.slane %v1520_v57, %v5256_v32  ;;  %v2335_v1 = vunpack.c.l.b16 %v2287_v59  ;;  %v2412_v39 = vunpack.c.l.b16 %v2290_v18  ;;  %v7996_v49 = vrot.slane %v5348_v17, 4  ;;  %v7998_v57 = vld [vmem:[#allocation13_spill] sm:$0xff] }
 0x202   :  { %v1526_v2 = vsel %vm360_vm1, %v7995_v37, %v1345_v29  ;;  %v2569_v38 = vpack.c.b16 %v2567_v15, %v2566_v61  ;;  %v2413_v58 = vunpack.c.l.b16 %v2291_v19  ;;  %v1556_v34 = vrot.slane %v5366_v28, 4  ;;  %v7999_v15 = vld [vmem:[#allocation14_spill] sm:$0xff] }
 0x203   :  { %v5955_v14 = vperm.slane %v1526_v2, %v5256_v32  ;;  %v1537_v62 = vsel %vm360_vm1, %v7996_v49, %v5355_v22  ;;  %v1544_v21 = vrot.slane %v5949_v26, 4  ;;  %v2337_v10 = vpack.c.b16 %v2335_v1, %v2334_v3 }
 0x204   :  { %v5962_v47 = vperm.slane %v1537_v62, %v5256_v32  ;;  %v1574_v18 = vsel %vm360_vm1, %v5299_v36, %v5292_v25  ;;  %v7997_v29 = vrot.slane %v5316_v52, 4  ;;  %v2586_v22 = vsel %vm2338_vm2, %v2569_v38, 0  ;;  %v4661_v52 = vpop.permute.xlu1 %4660  ;;  %v8001_v62 = vld [vmem:[#allocation15_spill] sm:$0xff] }
 0x205   :  { %v2415_v31 = vpack.c.b16 %v2413_v58, %v2412_v39  ;;  %v1545_v30 = vsel %vm360_vm1, %v5955_v14, %v1544_v21  ;;  %v5976_v20 = vperm.slane %v1574_v18, %v5256_v32  ;;  %v2355_v3 = vsel %vm2338_vm2, %v2337_v10, 0  ;;  %2594 = vmatpush.bf16.xpose.msrb.mxu1 %v2586_v22 }
 0x206   :  { %v1580_v17 = vsel %vm360_vm1, %v7997_v29, %v1401_v60  ;;  %v5980_v61 = vperm.slane %v1545_v30, %v5273_v0  ;;  %v1557_v25 = vsel %vm360_vm1, %v5962_v47, %v1556_v34  ;;  %2363 = vmatpush.bf16.xpose.msra.mxu2 %v2355_v3  ;;  %v8000_v19 = vrot.slane %v7999_v15, 4 }
 0x207   :  { %v5985_v36 = vperm.slane %v1580_v17, %v5256_v32  ;;  %v2432_v60 = vsel %vm2338_vm2, %v2415_v31, 0  ;;  %v5989_v59 = vperm.slane %v1557_v25, %v5273_v0  ;;  %v1598_v2 = vrot.slane %v5976_v20, 4  ;;  %v6012_v31 = vpop.permute.xlu0 %4670 }
 0x208   :  { %v1591_v37 = vsel %vm360_vm1, %v8000_v19, %v7998_v57  ;;  %v670_v39 = vrot.slane %v5915_v5, 4  ;;  %2440 = vmatpush.bf16.xpose.msrb.mxu3 %v2432_v60  ;;  %v1610_v38 = vrot.slane %v8001_v62, 4  ;;  %v4663_v10 = vunpack.i.h.bf16 %v4661_v52  ;;  %4700 = vrot.lane.b32.xlu0 %v6012_v31, %s5043_s3 }
 0x209   :  { %v5999_v49 = vperm.slane %v1591_v37, %v5256_v32  ;;  %v1570_v58 = vrot.slane %v5989_v59, 4  ;;  %v1599_v21 = vsel %vm360_vm1, %v5985_v36, %v1598_v2  ;;  %v4662_v34 = vunpack.i.l.bf16 %v4661_v52  ;;  %v8002_v2 = vld [vmem:[#allocation16_spill] sm:$0xff] }
 0x20a   :  { %v770_v18 = vrot.slane %v5923_v56, 4  ;;  %v658_v29 = vrot.slane %v5926_v41, 4  ;;  %v6008_v17 = vperm.slane %v1599_v21, %v5273_v0  ;;  %v732_v25 = vrot.slane %v4663_v10, 4 }
 0x20b   :  { %v1611_v22 = vsel %vm360_vm1, %v5999_v49, %v1610_v38  ;;  %v1571_v30 = vsel %vm360_vm1, %v1570_v58, %v5980_v61  ;;  %v735_v52 = vsel %vm360_vm1, %v4663_v10, %v5598_v4  ;;  %v620_v15 = vrot.slane %v4662_v34, 4 }
 0x20c   :  { %v6017_v3 = vperm.slane %v1611_v22, %v5273_v0  ;;  %v2292_v60 = vpack.c.bf16 %v1571_v30, %v1571_v30  ;;  %v743_v57 = vperm.slane %v735_v52, %v5256_v32  ;;  %v623_v19 = vsel %vm360_vm1, %v4662_v34, %v5602_v7 }
 0x20d   :  { %v8003_v38 = vunpack.i.h.bf16 %v8002_v2  ;;  %v631_v21 = vperm.slane %v623_v19, %v5256_v32  ;;  %v8004_v4 = vunpack.i.l.bf16 %v8002_v2  ;;  %v1542_v2 = vrot.slane %v5955_v14, 4 }
 0x20e   :  { %v1624_v37 = vrot.slane %v6017_v3, 4  ;;  %v2487_v22 = vunpack.c.l.b16 %v2292_v60  ;;  %v780_v55 = vrot.slane %v743_v57, 4  ;;  %v8015_v31 = vrot.slane %v5689_v9, 4 }
 0x20f   :  { %v733_v58 = vsel %vm360_vm1, %v732_v25, %v8003_v38  ;;  %v621_v10 = vsel %vm360_vm1, %v620_v15, %v8004_v4  ;;  %v668_v34 = vrot.slane %v631_v21, 4  ;;  %v671_v52 = vsel %vm360_vm1, %v631_v21, %v670_v39 }
 0x210   :  { %v739_v1 = vperm.slane %v733_v58, %v5256_v32  ;;  %v1625_v30 = vsel %vm360_vm1, %v1624_v37, %v6008_v17  ;;  %v627_v7 = vperm.slane %v621_v10, %v5256_v32  ;;  %v679_v19 = vperm.slane %v671_v52, %v5273_v0 }
 0x211   :  { %v2293_v51 = vpack.c.bf16 %v1625_v30, %v1625_v30  ;;  %v669_v15 = vsel %vm360_vm1, %v668_v34, %v5915_v5  ;;  %v1554_v34 = vrot.slane %v5962_v47, 4  ;;  %v8005_v52 = vrot.slane %v5843_v6, 4 }
 0x212   :  { %v768_v25 = vrot.slane %v739_v1, 4  ;;  %v771_v60 = vsel %vm360_vm1, %v739_v1, %v770_v18  ;;  %v656_v38 = vrot.slane %v627_v7, 4  ;;  %v659_v58 = vsel %vm360_vm1, %v627_v7, %v658_v29 }
 0x213   :  { %v2488_v37 = vunpack.c.l.b16 %v2293_v51  ;;  %v667_v4 = vperm.slane %v659_v58, %v5273_v0  ;;  %v675_v10 = vperm.slane %v669_v15, %v5273_v0  ;;  %v692_v21 = vrot.slane %v679_v19, 4 }
 0x214   :  { %v657_v39 = vsel %vm360_vm1, %v656_v38, %v5926_v41  ;;  %v769_v1 = vsel %vm360_vm1, %v768_v25, %v5923_v56  ;;  %v779_v18 = vperm.slane %v771_v60, %v5273_v0  ;;  %v781_v51 = vsel %vm360_vm1, %v780_v55, %v5912_v8 }
 0x215   :  { %v2491_v29 = vpack.c.b16 %v2488_v37, %v2487_v22  ;;  %v6051_v30 = vperm.slane %v657_v39, %v5273_v0  ;;  %v684_v5 = vrot.slane %v667_v4, 4  ;;  %v688_v14 = vrot.slane %v675_v10, 4 }
 0x216   :  { %v6056_v7 = vperm.slane %v769_v1, %v5273_v0  ;;  %v1543_v41 = vsel %vm360_vm1, %v1542_v2, %v5949_v26  ;;  %v6065_v22 = vsel %vm360_vm1, %v667_v4, %v686_v42  ;;  %v691_v55 = vsel %vm360_vm1, %v675_v10, %v8005_v52 }
 0x217   :  { %v2506_v56 = vsel %vm2338_vm2, %v2491_v29, 0  ;;  %v8006_v25 = vrot.slane %v5861_v23, 4  ;;  %v680_v26 = vrot.slane %v6051_v30, 4  ;;  %v6076_v47 = vsel %vm360_vm1, %v692_v21, %v5861_v23 }
 0x218   :  { %2518 = vmatpush.bf16.xpose.msrb.mxu0 %v2506_v56  ;;  %v8007_v38 = vrot.slane %v5912_v8, 4  ;;  %v787_v58 = vperm.slane %v781_v51, %v5273_v0  ;;  %v8008_v15 = vrot.slane %v5851_v53, 4  ;;  %v796_v23 = vrot.slane %v779_v18, 4 }
 0x219   :  { %v695_v60 = vsel %vm360_vm1, %v679_v19, %v8006_v25  ;;  %v6090_v19 = vsel %vm360_vm1, %v684_v5, %v5869_v35  ;;  %v6095_v8 = vsel %vm360_vm1, %v688_v14, %v5843_v6  ;;  %v8009_v4 = vrot.slane %v5866_v11, 4 }
 0x21a   :  { %v783_v42 = vsel %vm360_vm1, %v743_v57, %v8007_v38  ;;  %v6086_v2 = vsel %vm360_vm1, %v6051_v30, %v8008_v15  ;;  %v792_v57 = vrot.slane %v6056_v7, 4  ;;  %v800_v39 = vrot.slane %v787_v58, 4  ;;  %v4676_v15 = vpop.permute.xlu1 %4675 }
 0x21b   :  { %v791_v37 = vperm.slane %v783_v42, %v5273_v0  ;;  %v6102_v10 = vsel %vm360_vm1, %v6056_v7, %v8009_v4  ;;  %v8010_v21 = vrot.slane %v5878_v44, 4  ;;  %v8011_v1 = vrot.slane %v5881_v40, 4  ;;  %4710 = vrot.lane.b32.xlu2 %v4676_v15, %s5043_s3 }
 0x21c   :  { %v6117_v51 = vsel %vm360_vm1, %v800_v39, %v5881_v40  ;;  %v1068_v56 = vrot.slane %v695_v60, 4  ;;  %v1070_v52 = vrot.slane %v691_v55, 4  ;;  %v8012_v38 = vrot.slane %v5886_v46, 4 }
 0x21d   :  { %v6107_v35 = vsel %vm360_vm1, %v779_v18, %v8010_v21  ;;  %v6112_v29 = vsel %vm360_vm1, %v787_v58, %v8011_v1  ;;  %v804_v6 = vrot.slane %v791_v37, 4  ;;  %v6122_v18 = vsel %vm360_vm1, %v796_v23, %v5878_v44 }
 0x21e   :  { %v6131_v42 = vsel %vm360_vm1, %v791_v37, %v8012_v38  ;;  %v6139_v23 = vsel %vm360_vm1, %v1068_v56, %v691_v55  ;;  %v6142_v39 = vsel %vm360_vm1, %v695_v60, %v1070_v52  ;;  %v1555_v37 = vsel %vm360_vm1, %v1554_v34, %v5366_v28 }
 0x21f   :  { %v6126_v25 = vsel %vm360_vm1, %v804_v6, %v5886_v46  ;;  %v1549_v46 = vperm.slane %v1543_v41, %v5273_v0  ;;  %v1561_v1 = vperm.slane %v1555_v37, %v5273_v0  ;;  %v1596_v6 = vrot.slane %v5985_v36, 4 }
 0x220   :  { %v1608_v38 = vrot.slane %v5999_v49, 4  ;;  %v1180_v44 = vrot.slane %v6131_v42, 4  ;;  %v1572_v55 = vrot.slane %v5980_v61, 4  ;;  %v1626_v60 = vrot.slane %v6008_v17, 4  ;;  %v6165_v17 = vpop.permute.xlu0 %4685 }
 0x221   :  { %v1568_v56 = vrot.slane %v1549_v46, 4  ;;  %v1182_v41 = vrot.slane %v6112_v29, 4  ;;  %v1566_v52 = vrot.slane %v1561_v1, 4  ;;  %v1597_v28 = vsel %vm360_vm1, %v1596_v6, %v5976_v20 }
 0x222   :  { %v1609_v34 = vsel %vm360_vm1, %v1608_v38, %v8001_v62  ;;  %v1603_v36 = vperm.slane %v1597_v28, %v5273_v0  ;;  %v1573_v37 = vsel %vm360_vm1, %v5989_v59, %v1572_v55  ;;  %v1627_v61 = vsel %vm360_vm1, %v6017_v3, %v1626_v60 }
 0x223   :  { %v1615_v49 = vperm.slane %v1609_v34, %v5273_v0  ;;  %v1567_v4 = vsel %vm360_vm1, %v1566_v52, %v1549_v46  ;;  %v2296_v58 = vpack.c.bf16 %v1573_v37, %v1573_v37  ;;  %v2297_v14 = vpack.c.bf16 %v1627_v61, %v1627_v61  ;;  %4720 = vrot.lane.b32.xlu2 %v6165_v17, %s5043_s3 }
 0x224   :  { %v1569_v20 = vsel %vm360_vm1, %v1561_v1, %v1568_v56  ;;  %v2284_v62 = vpack.c.bf16 %v1567_v4, %v1567_v4  ;;  %v1622_v38 = vrot.slane %v1603_v36, 4  ;;  %v8013_v4 = vrot.slane %v5673_v48, 4 }
 0x225   :  { %v1620_v6 = vrot.slane %v1615_v49, 4  ;;  %v2288_v28 = vpack.c.bf16 %v1569_v20, %v1569_v20  ;;  %v2564_v21 = vunpack.c.l.b16 %v2296_v58  ;;  %v2565_v34 = vunpack.c.l.b16 %v2297_v14 }
 0x226   :  { %v2332_v55 = vunpack.c.l.b16 %v2284_v62  ;;  %v1623_v3 = vsel %vm360_vm1, %v1615_v49, %v1622_v38  ;;  %v809_v1 = vsel %vm360_vm1, %v8013_v4, %v5668_v13  ;;  %v845_v49 = vsel %vm360_vm1, %v8015_v31, %v5693_v16  ;;  %v8018_v62 = vld [vmem:[#allocation18_spill] sm:$0xff]  ;;  %v8022_v31 = vld [vmem:[#allocation19_spill] sm:$0xff] }
 0x227   :  { %v1621_v59 = vsel %vm360_vm1, %v1620_v6, %v1603_v36  ;;  %v2410_v60 = vunpack.c.l.b16 %v2288_v28  ;;  %v2568_v5 = vpack.c.b16 %v2565_v34, %v2564_v21  ;;  %v2289_v46 = vpack.c.bf16 %v1623_v3, %v1623_v3 }
 0x228   :  { %v2285_v40 = vpack.c.bf16 %v1621_v59, %v1621_v59  ;;  %v815_v52 = vperm.slane %v809_v1, %v5256_v32  ;;  %v8014_v36 = vrot.slane %v5682_v45, 4  ;;  %v882_v48 = vrot.slane %v5741_v27, 4 }
 0x229   :  { %v2583_v14 = vsel %vm2338_vm2, %v2568_v5, 0  ;;  %v2411_v56 = vunpack.c.l.b16 %v2289_v46  ;;  %v851_v37 = vperm.slane %v845_v49, %v5256_v32  ;;  %v8016_v20 = vrot.slane %v5678_v54, 4 }
 0x22a   :  { %v2333_v58 = vunpack.c.l.b16 %v2285_v40  ;;  %2595 = vmatpush.bf16.xpose.msrb.mxu1 %v2583_v14  ;;  %v821_v21 = vsel %vm360_vm1, %v8014_v36, %v5700_v24  ;;  %v858_v61 = vrot.slane %v815_v52, 4  ;;  %v8017_v9 = vrot.slane %v5709_v33, 4 }
 0x22b   :  { %v2414_v40 = vpack.c.b16 %v2411_v56, %v2410_v60  ;;  %v827_v5 = vperm.slane %v821_v21, %v5256_v32  ;;  %v921_v6 = vsel %vm360_vm1, %v8016_v20, %v5705_v63  ;;  %v8019_v38 = vrot.slane %v8018_v62, 4  ;;  %v8020_v60 = vld [vmem:[#allocation23_spill] sm:$0xff]  ;;  %4735 = vrot.lane.b32.xlu2 %v5848_v50, %s5043_s3 }
 0x22c   :  { %v2336_v13 = vpack.c.b16 %v2333_v58, %v2332_v55  ;;  %v933_v16 = vsel %vm360_vm1, %v8017_v9, %v5714_v43  ;;  %v883_v59 = vsel %vm360_vm1, %v851_v37, %v882_v48  ;;  %v927_v54 = vperm.slane %v921_v6, %v5256_v32 }
 0x22d   :  { %v957_v28 = vsel %vm360_vm1, %v8019_v38, %v5722_v12  ;;  %v2429_v15 = vsel %vm2338_vm2, %v2414_v40, 0  ;;  %v859_v63 = vsel %vm360_vm1, %v827_v5, %v858_v61  ;;  %v6209_v55 = vperm.slane %v883_v59, %v5273_v0  ;;  %v8021_v12 = vld [vmem:[#allocation17_spill] sm:$0xff] }
 0x22e   :  { %v2352_v34 = vsel %vm2338_vm2, %v2336_v13, 0  ;;  %2441 = vmatpush.bf16.xpose.msrb.mxu3 %v2429_v15  ;;  %v939_v3 = vperm.slane %v933_v16, %v5256_v32  ;;  %v994_v46 = vrot.slane %v8020_v60, 4  ;;  %4715 = vrot.lane.b32.xlu0 %v8021_v12, %s5043_s3  ;;  %v6216_v4 = vperm.slane %v859_v63, %v5273_v0 }
 0x22f   :  { %2364 = vmatpush.bf16.xpose.msra.mxu2 %v2352_v34  ;;  %v963_v1 = vperm.slane %v957_v28, %v5256_v32  ;;  %v970_v58 = vrot.slane %v927_v54, 4  ;;  %v856_v14 = vrot.slane %v827_v5, 4  ;;  %v908_v56 = vrot.slane %v6209_v55, 4 }
 0x230   :  { %v880_v36 = vrot.slane %v851_v37, 4  ;;  %v968_v21 = vrot.slane %v939_v3, 4  ;;  %v6222_v49 = vperm.slane %v8022_v31, %v5256_v32  ;;  %v8023_v63 = vrot.slane %v5700_v24, 4 }
 0x231   :  { %v971_v48 = vsel %vm360_vm1, %v939_v3, %v970_v58  ;;  %v995_v13 = vsel %vm360_vm1, %v963_v1, %v994_v46  ;;  %v857_v40 = vsel %vm360_vm1, %v856_v14, %v815_v52  ;;  %v992_v61 = vrot.slane %v963_v1, 4 }
 0x232   :  { %v909_v20 = vsel %vm360_vm1, %v908_v56, %v6216_v4  ;;  %v6230_v5 = vperm.slane %v971_v48, %v5273_v0  ;;  %v6233_v37 = vperm.slane %v995_v13, %v5273_v0  ;;  %v6236_v6 = vperm.slane %v857_v40, %v5273_v0  ;;  %v8025_v56 = vld [vmem:[#allocation21_spill] sm:$0xff]  ;;  %v8028_v48 = vld [vmem:[#allocation12_spill] sm:$0xff] }
 0x233   :  { %v2260_v9 = vpack.c.bf16 %v909_v20, %v909_v20  ;;  %v881_v16 = vsel %vm360_vm1, %v880_v36, %v5741_v27  ;;  %v969_v62 = vsel %vm360_vm1, %v968_v21, %v927_v54  ;;  %v993_v52 = vsel %vm360_vm1, %v992_v61, %v8020_v60  ;;  %v8024_v54 = vld [vmem:[#allocation20_spill] sm:$0xff]  ;;  %v8026_v36 = vld [vmem:[#allocation22_spill] sm:$0xff] }
 0x234   :  { %v1020_v38 = vrot.slane %v6233_v37, 4  ;;  %v6245_v28 = vperm.slane %v881_v16, %v5273_v0  ;;  %v6248_v34 = vperm.slane %v969_v62, %v5273_v0  ;;  %v6251_v15 = vperm.slane %v993_v52, %v5273_v0 }
 0x235   :  { %v2394_v59 = vunpack.c.l.b16 %v2260_v9  ;;  %v823_v27 = vsel %vm360_vm1, %v5682_v45, %v8023_v63  ;;  %v855_v3 = vperm.slane %v8024_v54, %v5256_v32  ;;  %v870_v60 = vrot.slane %v6222_v49, 4  ;;  %v8030_v54 = vld [vmem:[#allocation24_spill] sm:$0xff] }
 0x236   :  { %v1021_v46 = vsel %vm360_vm1, %v1020_v38, %v6230_v5  ;;  %v904_v12 = vrot.slane %v6245_v28, 4  ;;  %v1016_v1 = vrot.slane %v6251_v15, 4  ;;  %v831_v58 = vperm.slane %v823_v27, %v5256_v32  ;;  %4725 = vrot.lane.b32.xlu0 %v8028_v48, %s5043_s3  ;;  %v8029_v38 = vld [vmem:[#allocation25_spill] sm:$0xff] }
 0x237   :  { %v2261_v14 = vpack.c.bf16 %v1021_v46, %v1021_v46  ;;  %v894_v24 = vrot.slane %v8025_v56, 4  ;;  %v931_v45 = vperm.slane %v8026_v36, %v5256_v32  ;;  %v8027_v21 = vrot.slane %v5714_v43, 4 }
 0x238   :  { %v905_v13 = vsel %vm360_vm1, %v904_v12, %v6236_v6  ;;  %v1017_v40 = vsel %vm360_vm1, %v1016_v1, %v6248_v34  ;;  %v871_v61 = vsel %vm360_vm1, %v831_v58, %v870_v60  ;;  %v967_v63 = vperm.slane %v8029_v38, %v5256_v32 }
 0x239   :  { %v935_v31 = vsel %vm360_vm1, %v5709_v33, %v8027_v21  ;;  %v2395_v9 = vunpack.c.l.b16 %v2261_v14  ;;  %v2252_v16 = vpack.c.bf16 %v905_v13, %v905_v13  ;;  %v2253_v62 = vpack.c.bf16 %v1017_v40, %v1017_v40  ;;  %v4691_v33 = vpop.permute.xlu1 %4690 }
 0x23a   :  { %v943_v20 = vperm.slane %v935_v31, %v5256_v32  ;;  %v6281_v43 = vperm.slane %v871_v61, %v5273_v0  ;;  %v895_v52 = vsel %vm360_vm1, %v855_v3, %v894_v24  ;;  %v982_v27 = vrot.slane %v931_v45, 4  ;;  %4730 = vrot.lane.b32.xlu1 %v4691_v33, %s5043_s3 }
 0x23b   :  { %v1006_v46 = vrot.slane %v8030_v54, 4  ;;  %v2402_v12 = vpack.c.b16 %v2395_v9, %v2394_v59  ;;  %v2316_v1 = vunpack.c.l.b16 %v2252_v16  ;;  %v2317_v60 = vunpack.c.l.b16 %v2253_v62 }
 0x23c   :  { %v6288_v36 = vperm.slane %v895_v52, %v5273_v0  ;;  %v983_v14 = vsel %vm360_vm1, %v943_v20, %v982_v27  ;;  %v868_v59 = vrot.slane %v831_v58, 4  ;;  %v892_v40 = vrot.slane %v855_v3, 4 }
 0x23d   :  { %v1007_v21 = vsel %vm360_vm1, %v967_v63, %v1006_v46  ;;  %4482 = vmatmul.msk.bf16.vlgmr.msrb.gmra.mxu3 %vm2338_vm2, %v2402_v12  ;;  %v2324_v31 = vpack.c.b16 %v2317_v60, %v2316_v1  ;;  %v6295_v48 = vperm.slane %v983_v14, %v5273_v0  ;;  %v980_v61 = vrot.slane %v943_v20, 4 }
 0x23e   :  { %v916_v24 = vrot.slane %v6288_v36, 4  ;;  %v6298_v13 = vperm.slane %v1007_v21, %v5273_v0  ;;  %v1004_v9 = vrot.slane %v967_v63, 4  ;;  %v869_v38 = vsel %vm360_vm1, %v868_v59, %v6222_v49 }
 0x23f   :  { %4478 = vmatmul.msk.bf16.vlgmr.msra.gmra.mxu2 %vm2338_vm2, %v2324_v31  ;;  %v893_v27 = vsel %vm360_vm1, %v892_v40, %v8025_v56  ;;  %v981_v46 = vsel %vm360_vm1, %v980_v61, %v931_v45  ;;  %v1183_v3 = vsel %vm360_vm1, %v6131_v42, %v1182_v41  ;;  %v6316_v20 = vperm.slane %v869_v38, %v5273_v0 }
 0x240   :  { %v917_v16 = vsel %vm360_vm1, %v916_v24, %v6281_v43  ;;  %v1028_v62 = vrot.slane %v6298_v13, 4  ;;  %v6319_v63 = vperm.slane %v893_v27, %v5273_v0  ;;  %v6324_v49 = vperm.slane %v6142_v39, %v5256_v32 }
 0x241   :  { %v2276_v52 = vpack.c.bf16 %v917_v16, %v917_v16  ;;  %v1005_v41 = vsel %vm360_vm1, %v1004_v9, %v8030_v54  ;;  %v1181_v12 = vsel %vm360_vm1, %v1180_v44, %v6112_v29  ;;  %v6336_v33 = vperm.slane %v981_v46, %v5273_v0 }
 0x242   :  { %v1029_v58 = vsel %vm360_vm1, %v1028_v62, %v6295_v48  ;;  %v912_v1 = vrot.slane %v6319_v63, 4  ;;  %v6339_v39 = vperm.slane %v1005_v41, %v5273_v0  ;;  %v6342_v60 = vperm.slane %v1183_v3, %v5256_v32 }
 0x243   :  { %v2277_v56 = vpack.c.bf16 %v1029_v58, %v1029_v58  ;;  %v2548_v45 = vunpack.c.l.b16 %v2276_v52  ;;  %v681_v17 = vsel %vm360_vm1, %v680_v26, %v5851_v53  ;;  %v6355_v44 = vsel %vm360_vm1, %v792_v57, %v5866_v11 }
 0x244   :  { %v913_v29 = vsel %vm360_vm1, %v912_v1, %v6316_v20  ;;  %v1024_v42 = vrot.slane %v6339_v39, 4  ;;  %v1032_v14 = vrot.slane %v6090_v19, 4  ;;  %v1034_v24 = vrot.slane %v681_v17, 4 }
 0x245   :  { %v2549_v54 = vunpack.c.l.b16 %v2277_v56  ;;  %v2268_v31 = vpack.c.bf16 %v913_v29, %v913_v29  ;;  %v8031_v30 = vrot.slane %v6065_v22, 4  ;;  %v8032_v11 = vrot.slane %v6076_v47, 4 }
 0x246   :  { %v1025_v26 = vsel %vm360_vm1, %v1024_v42, %v6336_v33  ;;  %v1033_v59 = vsel %vm360_vm1, %v1032_v14, %v681_v17  ;;  %v1075_v62 = vperm.slane %v6139_v23, %v5256_v32  ;;  %v1144_v38 = vrot.slane %v6122_v18, 4 }
 0x247   :  { %v2556_v21 = vpack.c.b16 %v2549_v54, %v2548_v45  ;;  %v1045_v53 = vsel %vm360_vm1, %v8031_v30, %v6086_v2  ;;  %v1057_v57 = vsel %vm360_vm1, %v8032_v11, %v6095_v8  ;;  %v2269_v40 = vpack.c.bf16 %v1025_v26, %v1025_v26 }
 0x248   :  { %v1051_v7 = vperm.slane %v1045_v53, %v5256_v32  ;;  %v2471_v61 = vunpack.c.l.b16 %v2268_v31  ;;  %v1039_v9 = vperm.slane %v1033_v59, %v5256_v32  ;;  %v1063_v16 = vperm.slane %v1057_v57, %v5256_v32 }
 0x249   :  { %4490 = vmatmul.msk.bf16.vlgmr.msrb.gmra.mxu1 %vm2338_vm2, %v2556_v21  ;;  %v1146_v27 = vrot.slane %v6355_v44, 4  ;;  %v2472_v46 = vunpack.c.l.b16 %v2269_v40  ;;  %v8033_v3 = vrot.slane %v6107_v35, 4  ;;  %v8034_v56 = vrot.slane %v6126_v25, 4 }
 0x24a   :  { %v1080_v52 = vrot.slane %v1051_v7, 4  ;;  %v1187_v23 = vperm.slane %v1181_v12, %v5256_v32  ;;  %v1104_v1 = vrot.slane %v1075_v62, 4  ;;  %v1145_v54 = vsel %vm360_vm1, %v1144_v38, %v6355_v44 }
 0x24b   :  { %v1157_v58 = vsel %vm360_vm1, %v8033_v3, %v6102_v10  ;;  %v1169_v45 = vsel %vm360_vm1, %v8034_v56, %v6117_v51  ;;  %v2479_v17 = vpack.c.b16 %v2472_v46, %v2471_v61  ;;  %v1151_v42 = vperm.slane %v1145_v54, %v5256_v32 }
 0x24c   :  { %v1081_v41 = vsel %vm360_vm1, %v1080_v52, %v1039_v9  ;;  %v1163_v50 = vperm.slane %v1157_v58, %v5256_v32  ;;  %v1175_v14 = vperm.slane %v1169_v45, %v5256_v32  ;;  %v1105_v21 = vsel %vm360_vm1, %v1104_v1, %v1063_v16 }
 0x24d   :  { %v6393_v29 = vperm.slane %v1081_v41, %v5273_v0  ;;  %v1216_v12 = vrot.slane %v1187_v23, 4  ;;  %v1082_v30 = vrot.slane %v1039_v9, 4  ;;  %4486 = vmatmul.msk.bf16.vlgmr.msrb.gmra.mxu0 %vm2338_vm2, %v2479_v17  ;;  %v6400_v53 = vperm.slane %v1105_v21, %v5273_v0 }
 0x24e   :  { %v1192_v31 = vrot.slane %v1163_v50, 4  ;;  %v1106_v44 = vrot.slane %v1063_v16, 4  ;;  %v1194_v26 = vrot.slane %v1151_v42, 4  ;;  %v1218_v59 = vrot.slane %v1175_v14, 4 }
 0x24f   :  { %v1217_v57 = vsel %vm360_vm1, %v1216_v12, %v1175_v14  ;;  %v1083_v40 = vsel %vm360_vm1, %v1051_v7, %v1082_v30  ;;  %v1035_v61 = vsel %vm360_vm1, %v6090_v19, %v1034_v24  ;;  %v1128_v52 = vrot.slane %v6400_v53, 4 }
 0x250   :  { %v1193_v11 = vsel %vm360_vm1, %v1192_v31, %v1151_v42  ;;  %v6412_v38 = vperm.slane %v1217_v57, %v5273_v0  ;;  %v6415_v16 = vperm.slane %v1083_v40, %v5273_v0  ;;  %v1107_v46 = vsel %vm360_vm1, %v1075_v62, %v1106_v44 }
 0x251   :  { %v6409_v9 = vperm.slane %v1193_v11, %v5273_v0  ;;  %v1195_v3 = vsel %vm360_vm1, %v1163_v50, %v1194_v26  ;;  %v1219_v7 = vsel %vm360_vm1, %v1187_v23, %v1218_v59  ;;  %v1043_v58 = vperm.slane %v1035_v61, %v5256_v32 }
 0x252   :  { %v1129_v19 = vsel %vm360_vm1, %v1128_v52, %v6393_v29  ;;  %v1240_v24 = vrot.slane %v6412_v38, 4  ;;  %v6425_v56 = vperm.slane %v1107_v46, %v5273_v0  ;;  %v6428_v45 = vperm.slane %v1195_v3, %v5273_v0 }
 0x253   :  { %v2254_v41 = vpack.c.bf16 %v1129_v19, %v1129_v19  ;;  %v6431_v62 = vperm.slane %v1219_v7, %v5273_v0  ;;  %v8035_v1 = vrot.slane %v6086_v2, 4  ;;  %v8036_v54 = vrot.slane %v6095_v8, 4 }
 0x254   :  { %v1241_v17 = vsel %vm360_vm1, %v1240_v24, %v6409_v9  ;;  %v1132_v42 = vrot.slane %v6425_v56, 4  ;;  %v8037_v44 = vrot.slane %v6102_v10, 4  ;;  %v8038_v24 = vrot.slane %v6117_v51, 4 }
 0x255   :  { %v1047_v23 = vsel %vm360_vm1, %v6065_v22, %v8035_v1  ;;  %v1059_v50 = vsel %vm360_vm1, %v6076_v47, %v8036_v54  ;;  %v2255_v31 = vpack.c.bf16 %v1241_v17, %v1241_v17  ;;  %v2318_v12 = vunpack.c.l.b16 %v2254_v41 }
 0x256   :  { %v1055_v14 = vperm.slane %v1047_v23, %v5256_v32  ;;  %v1067_v21 = vperm.slane %v1059_v50, %v5256_v32  ;;  %v1244_v2 = vrot.slane %v6431_v62, 4  ;;  %v1116_v22 = vrot.slane %v6324_v49, 4 }
 0x257   :  { %v1133_v8 = vsel %vm360_vm1, %v1132_v42, %v6415_v16  ;;  %v1147_v47 = vsel %vm360_vm1, %v6122_v18, %v1146_v27  ;;  %v1159_v26 = vsel %vm360_vm1, %v6107_v35, %v8037_v44  ;;  %v2319_v59 = vunpack.c.l.b16 %v2255_v31 }
 0x258   :  { %v1092_v30 = vrot.slane %v1055_v14, 4  ;;  %v1245_v11 = vsel %vm360_vm1, %v1244_v2, %v6428_v45  ;;  %v2262_v57 = vpack.c.bf16 %v1133_v8, %v1133_v8  ;;  %v1117_v40 = vsel %vm360_vm1, %v1116_v22, %v1067_v21 }
 0x259   :  { %v2263_v61 = vpack.c.bf16 %v1245_v11, %v1245_v11  ;;  %v6461_v46 = vperm.slane %v1117_v40, %v5273_v0  ;;  %v1155_v18 = vperm.slane %v1147_v47, %v5256_v32  ;;  %v2325_v27 = vpack.c.b16 %v2319_v59, %v2318_v12 }
 0x25a   :  { %v1093_v52 = vsel %vm360_vm1, %v1092_v30, %v1043_v58  ;;  %v2396_v10 = vunpack.c.l.b16 %v2262_v57  ;;  %v1167_v35 = vperm.slane %v1159_v26, %v5256_v32  ;;  %v1171_v41 = vsel %vm360_vm1, %v6126_v25, %v8038_v24 }
 0x25b   :  { %v6465_v3 = vperm.slane %v1093_v52, %v5273_v0  ;;  %v2397_v7 = vunpack.c.l.b16 %v2263_v61  ;;  %v1136_v19 = vrot.slane %v6461_v46, 4  ;;  %v1228_v1 = vrot.slane %v6342_v60, 4  ;;  %4479 = vmatmul.msk.bf16.gmra.mxu2 %vm2338_vm2, %v2325_v27 }
 0x25c   :  { %v1179_v23 = vperm.slane %v1171_v41, %v5256_v32  ;;  %v1204_v54 = vrot.slane %v1167_v35, 4  ;;  %v1094_v50 = vrot.slane %v1043_v58, 4  ;;  %v1118_v17 = vrot.slane %v1067_v21, 4 }
 0x25d   :  { %v2403_v42 = vpack.c.b16 %v2397_v7, %v2396_v10  ;;  %v1137_v31 = vsel %vm360_vm1, %v1136_v19, %v6465_v3  ;;  %v1206_v12 = vrot.slane %v1155_v18, 4  ;;  %v906_v2 = vrot.slane %v6236_v6, 4 }
 0x25e   :  { %v1205_v51 = vsel %vm360_vm1, %v1204_v54, %v1155_v18  ;;  %v1229_v25 = vsel %vm360_vm1, %v1228_v1, %v1179_v23  ;;  %v2270_v22 = vpack.c.bf16 %v1137_v31, %v1137_v31  ;;  %v1095_v8 = vsel %vm360_vm1, %v1055_v14, %v1094_v50 }
 0x25f   :  { %4483 = vmatmul.msk.bf16.gmra.mxu3 %vm2338_vm2, %v2403_v42  ;;  %v6484_v30 = vperm.slane %v1205_v51, %v5273_v0  ;;  %v6487_v58 = vperm.slane %v1229_v25, %v5273_v0  ;;  %v6490_v21 = vperm.slane %v1095_v8, %v5273_v0  ;;  %v1119_v6 = vsel %vm360_vm1, %v6324_v49, %v1118_v17 }
 0x260   :  { %v2473_v47 = vunpack.c.l.b16 %v2270_v22  ;;  %v6495_v44 = vperm.slane %v1119_v6, %v5273_v0  ;;  %v1207_v14 = vsel %vm360_vm1, %v1167_v35, %v1206_v12  ;;  %v1230_v26 = vrot.slane %v1179_v23, 4 }
 0x261   :  { %v1248_v59 = vrot.slane %v6487_v58, 4  ;;  %v6500_v11 = vperm.slane %v1207_v14, %v5273_v0  ;;  %v907_v57 = vsel %vm360_vm1, %v6245_v28, %v906_v2  ;;  %v1018_v40 = vrot.slane %v6248_v34, 4 }
 0x262   :  { %v1140_v61 = vrot.slane %v6495_v44, 4  ;;  %v1231_v49 = vsel %vm360_vm1, %v6342_v60, %v1230_v26  ;;  %v2256_v52 = vpack.c.bf16 %v907_v57, %v907_v57  ;;  %v910_v18 = vrot.slane %v6216_v4, 4 }
 0x263   :  { %v1249_v27 = vsel %vm360_vm1, %v1248_v59, %v6484_v30  ;;  %v6512_v10 = vperm.slane %v1231_v49, %v5273_v0  ;;  %v1019_v35 = vsel %vm360_vm1, %v6251_v15, %v1018_v40  ;;  %v1022_v28 = vrot.slane %v6230_v5, 4 }
 0x264   :  { %v2271_v34 = vpack.c.bf16 %v1249_v27, %v1249_v27  ;;  %v1141_v7 = vsel %vm360_vm1, %v1140_v61, %v6490_v21  ;;  %v2257_v19 = vpack.c.bf16 %v1019_v35, %v1019_v35  ;;  %v2320_v60 = vunpack.c.l.b16 %v2256_v52 }
 0x265   :  { %v1252_v24 = vrot.slane %v6512_v10, 4  ;;  %v2278_v4 = vpack.c.bf16 %v1141_v7, %v1141_v7  ;;  %v911_v41 = vsel %vm360_vm1, %v6209_v55, %v910_v18  ;;  %v1023_v1 = vsel %vm360_vm1, %v6233_v37, %v1022_v28 }
 0x266   :  { %v2474_v23 = vunpack.c.l.b16 %v2271_v34  ;;  %v2321_v54 = vunpack.c.l.b16 %v2257_v19  ;;  %v2264_v15 = vpack.c.bf16 %v911_v41, %v911_v41  ;;  %v2265_v50 = vpack.c.bf16 %v1023_v1, %v1023_v1 }
 0x267   :  { %v1253_v5 = vsel %vm360_vm1, %v1252_v24, %v6500_v11  ;;  %v2550_v31 = vunpack.c.l.b16 %v2278_v4  ;;  %v914_v12 = vrot.slane %v6316_v20, 4  ;;  %v1026_v25 = vrot.slane %v6336_v33, 4 }
 0x268   :  { %v2480_v17 = vpack.c.b16 %v2474_v23, %v2473_v47  ;;  %v2279_v42 = vpack.c.bf16 %v1253_v5, %v1253_v5  ;;  %v2398_v2 = vunpack.c.l.b16 %v2264_v15  ;;  %v2399_v51 = vunpack.c.l.b16 %v2265_v50 }
 0x269   :  { %v2326_v37 = vpack.c.b16 %v2321_v54, %v2320_v60  ;;  %v1130_v22 = vrot.slane %v6393_v29, 4  ;;  %v1242_v8 = vrot.slane %v6409_v9, 4  ;;  %v915_v47 = vsel %vm360_vm1, %v6319_v63, %v914_v12 }
 0x26a   :  { %4487 = vmatmul.msk.bf16.gmra.mxu0 %vm2338_vm2, %v2480_v17  ;;  %v2551_v55 = vunpack.c.l.b16 %v2279_v42  ;;  %v2404_v14 = vpack.c.b16 %v2399_v51, %v2398_v2  ;;  %v1027_v20 = vsel %vm360_vm1, %v6339_v39, %v1026_v25  ;;  %v918_v33 = vrot.slane %v6281_v43, 4  ;;  %v4706_v2 = vpop.permute.xlu1 %4705 }
 0x26b   :  { %4480 = vmatmul.msk.bf16.gmra.mxu2 %vm2338_vm2, %v2326_v37  ;;  %v1030_v26 = vrot.slane %v6295_v48, 4  ;;  %v1134_v29 = vrot.slane %v6415_v16, 4  ;;  %v1131_v9 = vsel %vm360_vm1, %v6400_v53, %v1130_v22  ;;  %v1243_v63 = vsel %vm360_vm1, %v6412_v38, %v1242_v8 }
 0x26c   :  { %v2557_v6 = vpack.c.b16 %v2551_v55, %v2550_v31  ;;  %v1246_v59 = vrot.slane %v6428_v45, 4  ;;  %v2272_v57 = vpack.c.bf16 %v915_v47, %v915_v47  ;;  %v2273_v39 = vpack.c.bf16 %v1027_v20, %v1027_v20 }
 0x26d   :  { %v919_v43 = vsel %vm360_vm1, %v6288_v36, %v918_v33  ;;  %v1031_v48 = vsel %vm360_vm1, %v6298_v13, %v1030_v26  ;;  %v2258_v40 = vpack.c.bf16 %v1131_v9, %v1131_v9  ;;  %v2259_v16 = vpack.c.bf16 %v1243_v63, %v1243_v63 }
 0x26e   :  { %4491 = vmatmul.msk.bf16.gmra.mxu1 %vm2338_vm2, %v2557_v6  ;;  %v1135_v61 = vsel %vm360_vm1, %v6425_v56, %v1134_v29  ;;  %v1247_v53 = vsel %vm360_vm1, %v6431_v62, %v1246_v59  ;;  %v2475_v49 = vunpack.c.l.b16 %v2272_v57  ;;  %v2476_v38 = vunpack.c.l.b16 %v2273_v39 }
 0x26f   :  { %4484 = vmatmul.msk.bf16.gmra.mxu3 %vm2338_vm2, %v2404_v14  ;;  %v2280_v52 = vpack.c.bf16 %v919_v43, %v919_v43  ;;  %v2281_v45 = vpack.c.bf16 %v1031_v48, %v1031_v48  ;;  %v2266_v18 = vpack.c.bf16 %v1135_v61, %v1135_v61  ;;  %v2267_v27 = vpack.c.bf16 %v1247_v53, %v1247_v53 }
 0x270   :  { %v2322_v35 = vunpack.c.l.b16 %v2258_v40  ;;  %v2323_v28 = vunpack.c.l.b16 %v2259_v16  ;;  %v2481_v36 = vpack.c.b16 %v2476_v38, %v2475_v49  ;;  %v1138_v13 = vrot.slane %v6465_v3, 4 }
 0x271   :  { %v2552_v34 = vunpack.c.l.b16 %v2280_v52  ;;  %v2553_v7 = vunpack.c.l.b16 %v2281_v45  ;;  %v2400_v19 = vunpack.c.l.b16 %v2266_v18  ;;  %v2401_v60 = vunpack.c.l.b16 %v2267_v27 }
 0x272   :  { %v1250_v56 = vrot.slane %v6484_v30, 4  ;;  %v2327_v62 = vpack.c.b16 %v2323_v28, %v2322_v35  ;;  %v1139_v4 = vsel %vm360_vm1, %v6461_v46, %v1138_v13  ;;  %v1142_v23 = vrot.slane %v6490_v21, 4 }
 0x273   :  { %v2558_v24 = vpack.c.b16 %v2553_v7, %v2552_v34  ;;  %v2405_v41 = vpack.c.b16 %v2401_v60, %v2400_v19  ;;  %v1254_v3 = vrot.slane %v6500_v11, 4  ;;  %v2274_v30 = vpack.c.bf16 %v1139_v4, %v1139_v4 }
 0x274   :  { %v1251_v1 = vsel %vm360_vm1, %v6487_v58, %v1250_v56  ;;  %v1143_v15 = vsel %vm360_vm1, %v6495_v44, %v1142_v23  ;;  %v4707_v51 = vunpack.i.l.bf16 %v4706_v2  ;;  %v4708_v25 = vunpack.i.h.bf16 %v4706_v2 }
 0x275   :  { %v2275_v54 = vpack.c.bf16 %v1251_v1, %v1251_v1  ;;  %v1255_v46 = vsel %vm360_vm1, %v6512_v10, %v1254_v3  ;;  %v2477_v50 = vunpack.c.l.b16 %v2274_v30  ;;  %v2282_v17 = vpack.c.bf16 %v1143_v15, %v1143_v15  ;;  %v4711_v12 = vpop.permute.xlu2 %4710 }
 0x276   :  { %v2283_v58 = vpack.c.bf16 %v1255_v46, %v1255_v46  ;;  %v1926_v55 = vrot.slane %v4707_v51, 4  ;;  %v1982_v22 = vrot.slane %v4708_v25, 4  ;;  %v4713_v20 = vunpack.i.h.bf16 %v4711_v12 }
 0x277   :  { %v2478_v5 = vunpack.c.l.b16 %v2275_v54  ;;  %v2554_v21 = vunpack.c.l.b16 %v2282_v17  ;;  %v4712_v33 = vunpack.i.l.bf16 %v4711_v12 }
 0x278   :  { %v2555_v31 = vunpack.c.l.b16 %v2283_v58  ;;  %v1992_v39 = vrot.slane %v4713_v20, 4 }
 0x279   :  { %v2482_v42 = vpack.c.b16 %v2478_v5, %v2477_v50  ;;  %v1936_v43 = vrot.slane %v4712_v33, 4 }
 0x27a   :  { %4488 = vmatmul.msk.bf16.gmra.mxu0 %vm2338_vm2, %v2481_v36  ;;  %v2559_v11 = vpack.c.b16 %v2555_v31, %v2554_v21  ;;  %v4701_v44 = vpop.permute.xlu0 %4700 }
 0x27b   :  { %4481 = vmatmul.msk.bf16.gmra.mxu2 %vm2338_vm2, %v2327_v62  ;;  %v4703_v37 = vunpack.i.h.bf16 %v4701_v44  ;;  %v4702_v10 = vunpack.i.l.bf16 %v4701_v44 }
 0x27d   :  { %v6572_v8 = vpop.permute.xlu2 %4720  ;;  %v1980_v6 = vrot.slane %v4703_v37, 4  ;;  %v1924_v47 = vrot.slane %v4702_v10, 4  ;;  %v1927_v14 = vsel %vm360_vm1, %v4702_v10, %v1926_v55  ;;  %v1983_v29 = vsel %vm360_vm1, %v4703_v37, %v1982_v22 }
 0x27e   :  { %4492 = vmatmul.msk.bf16.gmra.mxu1 %vm2338_vm2, %v2558_v24  ;;  %v4723_v26 = vunpack.i.h.bf16 %v6572_v8  ;;  %v4722_v9 = vunpack.i.l.bf16 %v6572_v8  ;;  %v1935_v59 = vperm.slane %v1927_v14, %v5256_v32  ;;  %v1991_v48 = vperm.slane %v1983_v29, %v5256_v32 }
 0x27f   :  { %4485 = vmatmul.msk.bf16.gmra.mxu3 %vm2338_vm2, %v2405_v41  ;;  %v1925_v63 = vsel %vm360_vm1, %v1924_v47, %v4707_v51  ;;  %v1981_v57 = vsel %vm360_vm1, %v1980_v6, %v4708_v25 }
 0x280   :  { %v1931_v16 = vperm.slane %v1925_v63, %v5256_v32  ;;  %v1987_v61 = vperm.slane %v1981_v57, %v5256_v32  ;;  %v6586_v38 = vrot.slane %v4723_v26, 4  ;;  %v6590_v52 = vrot.slane %v4722_v9, 4 }
 0x281   :  { %v1962_v45 = vrot.slane %v1935_v59, 4  ;;  %v2018_v34 = vrot.slane %v1991_v48, 4 }
 0x282   :  { %v1950_v60 = vrot.slane %v1931_v16, 4  ;;  %v2006_v56 = vrot.slane %v1987_v61, 4 }
 0x285   :  { %v6592_v18 = vpop.permute.xlu2 %4735 }
 0x286   :  { %v4738_v7 = vunpack.i.h.bf16 %v6592_v18  ;;  %v4737_v41 = vunpack.i.l.bf16 %v6592_v18 }
 0x288   :  { %v6603_v4 = vrot.slane %v4738_v7, 4  ;;  %v1826_v14 = vrot.slane %v4737_v41, 4 }
 0x28a   :  { %4489 = vmatmul.msk.bf16.gmra.mxu0 %vm2338_vm2, %v2482_v42 }
 0x28e   :  { %4493 = vmatmul.msk.bf16.gmra.mxu1 %vm2338_vm2, %v2559_v11 }
 0x2a0   :  { %v4716_v40 = vpop.permute.xlu0 %4715 }
 0x2a1   :  { %v4718_v53 = vunpack.i.h.bf16 %v4716_v40  ;;  %v4717_v49 = vunpack.i.l.bf16 %v4716_v40 }
 0x2a3   :  { %v1994_v27 = vrot.slane %v4718_v53, 4  ;;  %v1937_v35 = vsel %vm360_vm1, %v1936_v43, %v4717_v49  ;;  %v1938_v28 = vrot.slane %v4717_v49, 4  ;;  %v1993_v36 = vsel %vm360_vm1, %v1992_v39, %v4718_v53 }
 0x2a4   :  { %v1943_v13 = vperm.slane %v1937_v35, %v5256_v32  ;;  %v1999_v19 = vperm.slane %v1993_v36, %v5256_v32 }
 0x2a5   :  { %v1939_v62 = vsel %vm360_vm1, %v4712_v33, %v1938_v28  ;;  %v1995_v24 = vsel %vm360_vm1, %v4713_v20, %v1994_v27 }
 0x2a6   :  { %v1947_v1 = vperm.slane %v1939_v62, %v5256_v32  ;;  %v1948_v23 = vrot.slane %v1943_v13, 4  ;;  %v1951_v3 = vsel %vm360_vm1, %v1943_v13, %v1950_v60  ;;  %v2003_v30 = vperm.slane %v1995_v24, %v5256_v32 }
 0x2a7   :  { %v2004_v54 = vrot.slane %v1999_v19, 4  ;;  %v2007_v15 = vsel %vm360_vm1, %v1999_v19, %v2006_v56  ;;  %v1959_v50 = vperm.slane %v1951_v3, %v5273_v0 }
 0x2a8   :  { %v1949_v46 = vsel %vm360_vm1, %v1948_v23, %v1931_v16  ;;  %v1960_v5 = vrot.slane %v1947_v1, 4  ;;  %v1963_v17 = vsel %vm360_vm1, %v1947_v1, %v1962_v45  ;;  %v2015_v31 = vperm.slane %v2007_v15, %v5273_v0  ;;  %v4726_v27 = vpop.permute.xlu0 %4725 }
 0x2a9   :  { %v1955_v58 = vperm.slane %v1949_v46, %v5273_v0  ;;  %v1971_v42 = vperm.slane %v1963_v17, %v5273_v0  ;;  %v2005_v21 = vsel %vm360_vm1, %v2004_v54, %v1987_v61  ;;  %v1974_v12 = vrot.slane %v1959_v50, 4 }
 0x2aa   :  { %v1961_v11 = vsel %vm360_vm1, %v1960_v5, %v1935_v59  ;;  %v2011_v2 = vperm.slane %v2005_v21, %v5273_v0  ;;  %v2016_v51 = vrot.slane %v2003_v30, 4  ;;  %v2019_v37 = vsel %vm360_vm1, %v2003_v30, %v2018_v34 }
 0x2ab   :  { %v1967_v25 = vperm.slane %v1961_v11, %v5273_v0  ;;  %v1972_v44 = vrot.slane %v1955_v58, 4  ;;  %v1978_v55 = vrot.slane %v1971_v42, 4  ;;  %v1975_v10 = vsel %vm360_vm1, 0.0, %v1974_v12 }
 0x2ac   :  { %v2017_v22 = vsel %vm360_vm1, %v2016_v51, %v1991_v48  ;;  %v2027_v6 = vperm.slane %v2019_v37, %v5273_v0  ;;  %v2028_v47 = vrot.slane %v2011_v2, 4  ;;  %v2030_v59 = vrot.slane %v2015_v31, 4  ;;  %v4731_v62 = vpop.permute.xlu1 %4730 }
 0x2ad   :  { %v1973_v20 = vsel %vm360_vm1, 0.0, %v1972_v44  ;;  %v1976_v33 = vrot.slane %v1967_v25, 4  ;;  %v2023_v29 = vperm.slane %v2017_v22, %v5273_v0  ;;  %v6629_v63 = vsel %vm360_vm1, 0.0, %v1978_v55 }
 0x2ae   :  { %v2034_v57 = vrot.slane %v2027_v6, 4  ;;  %v2144_v39 = vsel %vm360_vm1, %v1974_v12, %v1955_v58  ;;  %v2029_v43 = vsel %vm360_vm1, 0.0, %v2028_v47  ;;  %v2149_v16 = vrot.slane %v1975_v10, 4 }
 0x2af   :  { %v2032_v48 = vrot.slane %v2023_v29, 4  ;;  %v6634_v40 = vperm.slane %v2144_v39, %v5256_v32  ;;  %v6637_v61 = vsel %vm360_vm1, 0.0, %v1976_v33  ;;  %v2031_v53 = vsel %vm360_vm1, 0.0, %v2030_v59 }
 0x2b0   :  { %v6641_v49 = vsel %vm360_vm1, 0.0, %v2034_v57  ;;  %v2155_v45 = vsel %vm360_vm1, %v1978_v55, %v1967_v25  ;;  %v2150_v28 = vsel %vm360_vm1, %v2149_v16, %v1973_v20  ;;  %v2160_v34 = vrot.slane %v6629_v63, 4 }
 0x2b1   :  { %v6645_v35 = vsel %vm360_vm1, 0.0, %v2032_v48  ;;  %v6649_v36 = vperm.slane %v2155_v45, %v5256_v32  ;;  %v2168_v13 = vrot.slane %v6634_v40, 4  ;;  %v2198_v19 = vsel %vm360_vm1, %v2030_v59, %v2011_v2 }
 0x2b2   :  { %v2203_v60 = vrot.slane %v2031_v53, 4  ;;  %v2209_v56 = vsel %vm360_vm1, %v2034_v57, %v2023_v29  ;;  %v6656_v24 = vperm.slane %v2150_v28, %v5256_v32  ;;  %v6659_v1 = vperm.slane %v2198_v19, %v5256_v32 }
 0x2b3   :  { %v6662_v23 = vperm.slane %v2209_v56, %v5256_v32  ;;  %v4728_v3 = vunpack.i.h.bf16 %v4726_v27  ;;  %v4727_v54 = vunpack.i.l.bf16 %v4726_v27  ;;  %v4733_v15 = vunpack.i.h.bf16 %v4731_v62 }
 0x2b4   :  { %v2204_v30 = vsel %vm360_vm1, %v2203_v60, %v2029_v43  ;;  %v4732_v46 = vunpack.i.l.bf16 %v4731_v62  ;;  %v2214_v5 = vrot.slane %v6641_v49, 4  ;;  %v2222_v44 = vrot.slane %v6659_v1, 4 }
 0x2b5   :  { %v6666_v50 = vperm.slane %v2204_v30, %v5256_v32  ;;  %v1870_v17 = vrot.slane %v4728_v3, 4  ;;  %v1869_v58 = vsel %vm360_vm1, %v6586_v38, %v4728_v3  ;;  %v1813_v42 = vsel %vm360_vm1, %v6590_v52, %v4727_v54 }
 0x2b6   :  { %v1814_v21 = vrot.slane %v4727_v54, 4  ;;  %v1875_v31 = vperm.slane %v1869_v58, %v5256_v32  ;;  %v1880_v11 = vrot.slane %v4733_v15, 4  ;;  %v1819_v12 = vperm.slane %v1813_v42, %v5256_v32 }
 0x2b7   :  { %v1871_v2 = vsel %vm360_vm1, %v4723_v26, %v1870_v17  ;;  %v1824_v51 = vrot.slane %v4732_v46, 4  ;;  %v1827_v25 = vsel %vm360_vm1, %v4732_v46, %v1826_v14  ;;  %v2161_v58 = vsel %vm360_vm1, %v2160_v34, %v6637_v61 }
 0x2b8   :  { %v1815_v38 = vsel %vm360_vm1, %v4722_v9, %v1814_v21  ;;  %v1879_v52 = vperm.slane %v1871_v2, %v5256_v32  ;;  %v1835_v55 = vperm.slane %v1827_v25, %v5256_v32  ;;  %v1838_v10 = vrot.slane %v1819_v12, 4 }
 0x2b9   :  { %v1823_v37 = vperm.slane %v1815_v38, %v5256_v32  ;;  %v1825_v26 = vsel %vm360_vm1, %v1824_v51, %v4737_v41  ;;  %v1881_v22 = vsel %vm360_vm1, %v1880_v11, %v4738_v7  ;;  %v1894_v6 = vrot.slane %v1875_v31, 4 }
 0x2ba   :  { %v1831_v8 = vperm.slane %v1825_v26, %v5256_v32  ;;  %v1848_v47 = vrot.slane %v1835_v55, 4  ;;  %v1883_v9 = vsel %vm360_vm1, %v4733_v15, %v6603_v4  ;;  %v1906_v20 = vrot.slane %v1879_v52, 4 }
 0x2bb   :  { %v1850_v14 = vrot.slane %v1823_v37, 4  ;;  %v1887_v33 = vperm.slane %v1881_v22, %v5256_v32  ;;  %v1891_v29 = vperm.slane %v1883_v9, %v5256_v32 }
 0x2bc   :  { %v1836_v59 = vrot.slane %v1831_v8, 4  ;;  %v1839_v41 = vsel %vm360_vm1, %v1831_v8, %v1838_v10  ;;  %v1849_v18 = vsel %vm360_vm1, %v1848_v47, %v1823_v37 }
 0x2bd   :  { %v1847_v7 = vperm.slane %v1839_v41, %v5273_v0  ;;  %v1851_v57 = vsel %vm360_vm1, %v1835_v55, %v1850_v14  ;;  %v1855_v39 = vperm.slane %v1849_v18, %v5273_v0  ;;  %v1892_v43 = vrot.slane %v1887_v33, 4  ;;  %v6771_v18 = vld [vmem:[%s7932_s5 + $0x8] sm:$0xff] }
 0x2be   :  { %v1837_v4 = vsel %vm360_vm1, %v1836_v59, %v1819_v12  ;;  %v1859_v48 = vperm.slane %v1851_v57, %v5273_v0  ;;  %v1895_v16 = vsel %vm360_vm1, %v1887_v33, %v1894_v6  ;;  %v1904_v53 = vrot.slane %v1891_v29, 4  ;;  %v2300_v12 = vld [vmem:[%s7932_s5] sm:$0xff] }
 0x2bf   :  { %v1843_v45 = vperm.slane %v1837_v4, %v5273_v0  ;;  %v1862_v27 = vrot.slane %v1847_v7, 4  ;;  %v1864_v28 = vrot.slane %v1855_v39, 4  ;;  %v1893_v19 = vsel %vm360_vm1, %v1892_v43, %v1875_v31 }
 0x2c0   :  { %v2443_v60 = vpop.f32.mrf.mxu3  ;;  %v1866_v56 = vrot.slane %v1859_v48, 4  ;;  %v1899_v62 = vperm.slane %v1893_v19, %v5273_v0  ;;  %v1903_v3 = vperm.slane %v1895_v16, %v5273_v0  ;;  %v1905_v30 = vsel %vm360_vm1, %v1904_v53, %v1879_v52 }
 0x2c1   :  { %v1860_v54 = vrot.slane %v1843_v45, 4  ;;  %v6711_v15 = vsel %vm360_vm1, 0.0, %v1862_v27  ;;  %v1907_v46 = vsel %vm360_vm1, %v1891_v29, %v1906_v20  ;;  %v1911_v21 = vperm.slane %v1905_v30, %v5273_v0 }
 0x2c2   :  { %v2366_v17 = vpop.f32.mrf.mxu2  ;;  %v6719_v42 = vsel %vm360_vm1, 0.0, %v1866_v56  ;;  %v1915_v31 = vperm.slane %v1907_v46, %v5273_v0  ;;  %v1916_v11 = vrot.slane %v1899_v62, 4  ;;  %v6730_v51 = vsel %vm360_vm1, 0.0, %v1864_v28 }
 0x2c3   :  { %v6727_v2 = vsel %vm360_vm1, 0.0, %v1860_v54  ;;  %v1918_v63 = vrot.slane %v1903_v3, 4  ;;  %v6733_v61 = vsel %vm360_vm1, %v1862_v27, %v1843_v45  ;;  %v1920_v25 = vrot.slane %v1911_v21, 4 }
 0x2c4   :  { %v6736_v34 = vsel %vm360_vm1, 0.0, %v1916_v11  ;;  %v1922_v38 = vrot.slane %v1915_v31, 4  ;;  %v2041_v52 = vrot.slane %v6711_v15, 4  ;;  %v6743_v10 = vsel %vm360_vm1, %v1866_v56, %v1855_v39 }
 0x2c5   :  { %v6740_v37 = vsel %vm360_vm1, 0.0, %v1918_v63  ;;  %v2052_v26 = vrot.slane %v6719_v42, 4  ;;  %v6749_v6 = vsel %vm360_vm1, 0.0, %v1920_v25  ;;  %v6755_v47 = vsel %vm360_vm1, %v1918_v63, %v1899_v62 }
 0x2c6   :  { %v2597_v55 = vpop.f32.mrf.mxu1  ;;  %v6752_v8 = vsel %vm360_vm1, 0.0, %v1922_v38  ;;  %v2095_v9 = vrot.slane %v6740_v37, 4  ;;  %v6759_v14 = vsel %vm360_vm1, %v1922_v38, %v1911_v21  ;;  %v6763_v33 = vadd.f32 %v2443_v60, %v2300_v12 }
 0x2c7   :  { %v6746_v22 = vadd.f32 %v2597_v55, %v2300_v12  ;;  %v6765_v29 = vadd.f32 %v2366_v17, %v2300_v12  ;;  %v2106_v41 = vrot.slane %v6752_v8, 4  ;;  %v2165_v7 = vperm.slane %v2161_v58, %v5256_v32 }
 0x2c8   :  { %v2445_v59 = vpop.f32.mrf.mxu3  ;;  %v2169_v57 = vsel %vm360_vm1, %v6656_v24, %v2168_v13  ;;  %v2180_v39 = vrot.slane %v6649_v36, 4  ;;  %v2215_v16 = vsel %vm360_vm1, %v2214_v5, %v6645_v35  ;;  %v2642_v45 = vsel %vm2617_vm3, %v6763_v33, -inf }
 0x2c9   :  { %v2690_v20 = vsel %vm2617_vm3, %v6746_v22, -inf  ;;  %v6780_v43 = vadd.f32 %v2445_v59, %v6771_v18  ;;  %v2618_v4 = vsel %vm2617_vm3, %v6765_v29, -inf  ;;  %v2177_v48 = vperm.slane %v2169_v57, %v5273_v0 }
 0x2ca   :  { %2691 = vmax.xlane.f32.xlu2 %v2690_v20  ;;  %v2520_v53 = vpop.f32.mrf.mxu0  ;;  %v2368_v13 = vpop.f32.mrf.mxu2  ;;  %v2181_v27 = vsel %vm360_vm1, %v2165_v7, %v2180_v39  ;;  %v2219_v28 = vperm.slane %v2215_v16, %v5256_v32  ;;  %v2223_v19 = vsel %vm360_vm1, %v6666_v50, %v2222_v44  ;;  %v2234_v5 = vrot.slane %v6662_v23, 4 }
 0x2cb   :  { %v6797_v60 = vadd.f32 %v2520_v53, %v2300_v12  ;;  %v2189_v49 = vperm.slane %v2181_v27, %v5273_v0  ;;  %v2196_v56 = vrot.slane %v2177_v48, 4  ;;  %v2231_v35 = vperm.slane %v2223_v19, %v5273_v0 }
 0x2cc   :  { %v2166_v62 = vrot.slane %v6656_v24, 4  ;;  %v2178_v3 = vrot.slane %v2165_v7, 4  ;;  %v2220_v30 = vrot.slane %v6666_v50, 4  ;;  %v6807_v46 = vadd.f32 %v2368_v13, %v6771_v18 }
 0x2cd   :  { %v2666_v54 = vsel %vm2617_vm3, %v6797_v60, -inf  ;;  %v2197_v44 = vsel %vm360_vm1, %v2189_v49, %v2196_v56  ;;  %v2250_v17 = vrot.slane %v2231_v35, 4  ;;  %v2235_v58 = vsel %vm360_vm1, %v2219_v28, %v2234_v5 }
 0x2ce   :  { %2667 = vmax.xlane.f32.xlu0 %v2666_v54  ;;  %v3016_v21 = vpack.c.bf16 %v2197_v44, %v2197_v44  ;;  %v2167_v31 = vsel %vm360_vm1, %v2166_v62, %v6634_v40  ;;  %v2179_v24 = vsel %vm360_vm1, %v2178_v3, %v6649_v36  ;;  %v2243_v50 = vperm.slane %v2235_v58, %v5273_v0  ;;  %v2599_v62 = vpop.f32.mrf.mxu1 }
 0x2cf   :  { %v2173_v11 = vperm.slane %v2167_v31, %v5273_v0  ;;  %v2185_v12 = vperm.slane %v2179_v24, %v5273_v0  ;;  %v2221_v63 = vsel %vm360_vm1, %v2220_v30, %v6659_v1  ;;  %v2232_v55 = vrot.slane %v2219_v28, 4 }
 0x2d0   :  { %v3263_v25 = vunpack.c.l.b16 %v3016_v21  ;;  %v2227_v38 = vperm.slane %v2221_v63, %v5273_v0  ;;  %v2194_v20 = vrot.slane %v2189_v49, 4  ;;  %v2251_v40 = vsel %vm360_vm1, %v2243_v50, %v2250_v17 }
 0x2d1   :  { %v2192_v59 = vrot.slane %v2173_v11, 4  ;;  %v2248_v7 = vrot.slane %v2243_v50, 4  ;;  %v2190_v36 = vrot.slane %v2185_v12, 4  ;;  %v3017_v39 = vpack.c.bf16 %v2251_v40, %v2251_v40 }
 0x2d2   :  { %2619 = vmax.xlane.f32.xlu2 %v2618_v4  ;;  %v2522_v57 = vpop.f32.mrf.mxu0  ;;  %v2233_v16 = vsel %vm360_vm1, %v2232_v55, %v6662_v23  ;;  %v2246_v53 = vrot.slane %v2227_v38, 4  ;;  %v2195_v13 = vsel %vm360_vm1, %v2194_v20, %v2177_v48  ;;  %v2621_v24 = vsel %vm2617_vm3, %v6807_v46, -inf }
 0x2d3   :  { %v6826_v1 = vadd.f32 %v2522_v57, %v6771_v18  ;;  %v2193_v4 = vsel %vm360_vm1, %v2185_v12, %v2192_v59  ;;  %v2239_v27 = vperm.slane %v2233_v16, %v5273_v0  ;;  %v2249_v28 = vsel %vm360_vm1, %v2248_v7, %v2231_v35 }
 0x2d4   :  { %v3264_v19 = vunpack.c.l.b16 %v3017_v39  ;;  %v3008_v49 = vpack.c.bf16 %v2193_v4, %v2193_v4  ;;  %v3012_v56 = vpack.c.bf16 %v2195_v13, %v2195_v13  ;;  %v3013_v5 = vpack.c.bf16 %v2249_v28, %v2249_v28 }
 0x2d5   :  { %v2669_v23 = vsel %vm2617_vm3, %v6826_v1, -inf  ;;  %v2247_v3 = vsel %vm360_vm1, %v2239_v27, %v2246_v53  ;;  %v2191_v48 = vsel %vm360_vm1, %v2190_v36, %v2173_v11  ;;  %v2244_v30 = vrot.slane %v2239_v27, 4 }
 0x2d6   :  { %2670 = vmax.xlane.f32.xlu1 %v2669_v23  ;;  %2643 = vmax.xlane.f32.xlu0 %v2642_v45  ;;  %v3266_v54 = vpack.c.b16 %v3264_v19, %v3263_v25  ;;  %v3009_v44 = vpack.c.bf16 %v2247_v3, %v2247_v3  ;;  %v3117_v17 = vunpack.c.l.b16 %v3008_v49  ;;  %v3190_v58 = vunpack.c.l.b16 %v3012_v56 }
 0x2d7   :  { %v3191_v35 = vunpack.c.l.b16 %v3013_v5  ;;  %v2245_v21 = vsel %vm360_vm1, %v2244_v30, %v2227_v38  ;;  %v3004_v31 = vpack.c.bf16 %v2191_v48, %v2191_v48  ;;  %v6839_v50 = vadd.f32 %v2599_v62, %v6771_v18 }
 0x2d8   :  { %3287 = vmatpush.bf16.msra.mxu1 %v3266_v54  ;;  %v3118_v12 = vunpack.c.l.b16 %v3009_v44  ;;  %v3005_v11 = vpack.c.bf16 %v2245_v21, %v2245_v21  ;;  %v2645_v45 = vsel %vm2617_vm3, %v6780_v43, -inf  ;;  %v2040_v55 = vperm.slane %v6733_v61, %v5256_v32 }
 0x2d9   :  { %v3193_v63 = vpack.c.b16 %v3191_v35, %v3190_v58  ;;  %v3044_v25 = vunpack.c.l.b16 %v3004_v31  ;;  %v2042_v38 = vsel %vm360_vm1, %v2041_v52, %v6727_v2  ;;  %v2051_v59 = vperm.slane %v6743_v10, %v5256_v32 }
 0x2da   :  { %2622 = vmax.xlane.f32.xlu2 %v2621_v24  ;;  %v3120_v20 = vpack.c.b16 %v3118_v12, %v3117_v17  ;;  %v3045_v18 = vunpack.c.l.b16 %v3005_v11  ;;  %v2046_v40 = vperm.slane %v2042_v38, %v5256_v32  ;;  %v2053_v7 = vsel %vm360_vm1, %v2052_v26, %v6730_v51 }
 0x2db   :  { %3214 = vmatpush.bf16.msra.mxu0 %v3193_v63  ;;  %v2060_v36 = vrot.slane %v2040_v55, 4  ;;  %v2094_v61 = vperm.slane %v6755_v47, %v5256_v32  ;;  %v2096_v15 = vsel %vm360_vm1, %v2095_v9, %v6736_v34  ;;  %v2057_v52 = vperm.slane %v2053_v7, %v5256_v32 }
 0x2dc   :  { %3141 = vmatpush.bf16.msra.mxu3 %v3120_v20  ;;  %v3047_v2 = vpack.c.b16 %v3045_v18, %v3044_v25  ;;  %v2072_v10 = vrot.slane %v2051_v59, 4  ;;  %v2100_v57 = vperm.slane %v2096_v15, %v5256_v32  ;;  %v2105_v51 = vperm.slane %v6759_v14, %v5256_v32 }
 0x2dd   :  { %v2061_v42 = vsel %vm360_vm1, %v2046_v40, %v2060_v36  ;;  %v2107_v26 = vsel %vm360_vm1, %v2106_v41, %v6749_v6  ;;  %v2114_v37 = vrot.slane %v2094_v61, 4  ;;  %v2693_v34 = vsel %vm2617_vm3, %v6839_v50, -inf  ;;  %v6881_v41 = vld [vmem:[%s7932_s5 + $0x10] sm:$0xff] }
 0x2de   :  { %3068 = vmatpush.bf16.msrb.mxu2 %v3047_v2  ;;  %2646 = vmax.xlane.f32.xlu1 %v2645_v45  ;;  %v2371_v47 = vpop.f32.mrf.mxu2  ;;  %v2069_v9 = vperm.slane %v2061_v42, %v5273_v0  ;;  %v2073_v39 = vsel %vm360_vm1, %v2057_v52, %v2072_v10  ;;  %v2058_v16 = vrot.slane %v2046_v40, 4  ;;  %v2111_v53 = vperm.slane %v2107_v26, %v5256_v32 }
 0x2df   :  { %2694 = vmax.xlane.f32.xlu0 %v2693_v34  ;;  %v2081_v14 = vperm.slane %v2073_v39, %v5273_v0  ;;  %v2115_v8 = vsel %vm360_vm1, %v2100_v57, %v2114_v37  ;;  %v2126_v6 = vrot.slane %v2105_v51, 4  ;;  %v2070_v28 = vrot.slane %v2057_v52, 4 }
 0x2e0   :  { %v2088_v13 = vrot.slane %v2069_v9, 4  ;;  %v2123_v4 = vperm.slane %v2115_v8, %v5273_v0  ;;  %v2059_v27 = vsel %vm360_vm1, %v2058_v16, %v2040_v55  ;;  %v6886_v19 = vadd.f32 %v2371_v47, %v6881_v41 }
 0x2e1   :  { %v2127_v49 = vsel %vm360_vm1, %v2111_v53, %v2126_v6  ;;  %v2065_v56 = vperm.slane %v2059_v27, %v5273_v0  ;;  %v2112_v5 = vrot.slane %v2100_v57, 4  ;;  %v2071_v48 = vsel %vm360_vm1, %v2070_v28, %v2051_v59 }
 0x2e2   :  { %v2089_v62 = vsel %vm360_vm1, %v2081_v14, %v2088_v13  ;;  %v2135_v23 = vperm.slane %v2127_v49, %v5273_v0  ;;  %v2142_v3 = vrot.slane %v2123_v4, 4  ;;  %v2077_v54 = vperm.slane %v2071_v48, %v5273_v0  ;;  %v2448_v36 = vpop.f32.mrf.mxu3 }
 0x2e3   :  { %v3014_v30 = vpack.c.bf16 %v2089_v62, %v2089_v62  ;;  %v2084_v44 = vrot.slane %v2065_v56, 4  ;;  %v2113_v17 = vsel %vm360_vm1, %v2112_v5, %v2094_v61  ;;  %v2124_v21 = vrot.slane %v2111_v53, 4 }
 0x2e4   :  { %v2143_v58 = vsel %vm360_vm1, %v2135_v23, %v2142_v3  ;;  %v2119_v35 = vperm.slane %v2113_v17, %v5273_v0  ;;  %v2086_v31 = vrot.slane %v2081_v14, 4  ;;  %v2140_v63 = vrot.slane %v2135_v23, 4  ;;  %v2303_v14 = vld [vmem:[%s7932_s5 + $0x18] sm:$0xff]  ;;  %v2304_v17 = vld [vmem:[%s7932_s5 + $0x20] sm:$0xff] }
 0x2e5   :  { %v3015_v12 = vpack.c.bf16 %v2143_v58, %v2143_v58  ;;  %v3261_v11 = vunpack.c.l.b16 %v3014_v30  ;;  %v2085_v45 = vsel %vm360_vm1, %v2077_v54, %v2084_v44  ;;  %v2125_v55 = vsel %vm360_vm1, %v2124_v21, %v2105_v51 }
 0x2e6   :  { %v2138_v38 = vrot.slane %v2119_v35, 4  ;;  %v3006_v20 = vpack.c.bf16 %v2085_v45, %v2085_v45  ;;  %v2131_v40 = vperm.slane %v2125_v55, %v5273_v0  ;;  %v2087_v59 = vsel %vm360_vm1, %v2086_v31, %v2069_v9 }
 0x2e7   :  { %v2525_v24 = vpop.f32.mrf.mxu0  ;;  %v3262_v18 = vunpack.c.l.b16 %v3015_v12  ;;  %v2141_v7 = vsel %vm360_vm1, %v2140_v63, %v2123_v4  ;;  %v3010_v61 = vpack.c.bf16 %v2087_v59, %v2087_v59  ;;  %v2082_v51 = vrot.slane %v2077_v54, 4 }
 0x2e8   :  { %v6899_v25 = vadd.f32 %v2525_v24, %v6881_v41  ;;  %v3011_v15 = vpack.c.bf16 %v2141_v7, %v2141_v7  ;;  %v2139_v57 = vsel %vm360_vm1, %v2131_v40, %v2138_v38  ;;  %v3115_v42 = vunpack.c.l.b16 %v3006_v20  ;;  %v2305_v20 = vld [vmem:[%s7932_s5 + $0x28] sm:$0xff] }
 0x2e9   :  { %v3265_v10 = vpack.c.b16 %v3262_v18, %v3261_v11  ;;  %v3007_v37 = vpack.c.bf16 %v2139_v57, %v2139_v57  ;;  %v3188_v34 = vunpack.c.l.b16 %v3010_v61  ;;  %v2083_v9 = vsel %vm360_vm1, %v2082_v51, %v2065_v56 }
 0x2ea   :  { %v2672_v2 = vsel %vm2617_vm3, %v6899_v25, -inf  ;;  %v3189_v47 = vunpack.c.l.b16 %v3011_v15  ;;  %v2136_v39 = vrot.slane %v2131_v40, 4  ;;  %v2624_v16 = vsel %vm2617_vm3, %v6886_v19, -inf  ;;  %v2450_v30 = vpop.f32.mrf.mxu3 }
 0x2eb   :  { %v2602_v52 = vpop.f32.mrf.mxu1  ;;  %2673 = vmax.xlane.f32.xlu2 %v2672_v2  ;;  %3288 = vmatpush.bf16.msra.mxu1 %v3265_v10  ;;  %v3116_v53 = vunpack.c.l.b16 %v3007_v37  ;;  %v3002_v6 = vpack.c.bf16 %v2083_v9, %v2083_v9  ;;  %v6923_v62 = vadd.f32 %v2448_v36, %v6881_v41  ;;  %v6938_v24 = vadd.f32 %v2450_v30, %v2303_v14 }
 0x2ec   :  { %v6909_v26 = vadd.f32 %v2602_v52, %v6881_v41  ;;  %v3192_v8 = vpack.c.b16 %v3189_v47, %v3188_v34  ;;  %2625 = vmax.xlane.f32.xlu0 %v2624_v16  ;;  %v2137_v27 = vsel %vm360_vm1, %v2136_v39, %v2119_v35  ;;  %v2373_v35 = vpop.f32.mrf.mxu2  ;;  %v2306_v39 = vld [vmem:[%s7932_s5 + $0x30] sm:$0xff] }
 0x2ed   :  { %v3119_v28 = vpack.c.b16 %v3116_v53, %v3115_v42  ;;  %v3003_v49 = vpack.c.bf16 %v2137_v27, %v2137_v27  ;;  %v3042_v56 = vunpack.c.l.b16 %v3002_v6  ;;  %v2648_v41 = vsel %vm2617_vm3, %v6923_v62, -inf }
 0x2ee   :  { %v2696_v13 = vsel %vm2617_vm3, %v6909_v26, -inf  ;;  %3215 = vmatpush.bf16.msra.mxu0 %v3192_v8  ;;  %v6940_v12 = vadd.f32 %v2373_v35, %v2303_v14  ;;  %v2651_v55 = vsel %vm2617_vm3, %v6938_v24, -inf }
 0x2ef   :  { %v2527_v4 = vpop.f32.mrf.mxu0  ;;  %2697 = vmax.xlane.f32.xlu1 %v2696_v13  ;;  %3142 = vmatpush.bf16.msra.mxu3 %v3119_v28  ;;  %v3043_v23 = vunpack.c.l.b16 %v3003_v49 }
 0x2f0   :  { %v6920_v5 = vadd.f32 %v2527_v4, %v2303_v14  ;;  %v2627_v38 = vsel %vm2617_vm3, %v6940_v12, -inf }
 0x2f1   :  { %v3046_v54 = vpack.c.b16 %v3043_v23, %v3042_v56 }
 0x2f2   :  { %v2675_v44 = vsel %vm2617_vm3, %v6920_v5, -inf  ;;  %v2453_v63 = vpop.f32.mrf.mxu3 }
 0x2f3   :  { %v2604_v3 = vpop.f32.mrf.mxu1  ;;  %3069 = vmatpush.bf16.msrb.mxu2 %v3046_v54  ;;  %v6963_v42 = vadd.f32 %v2453_v63, %v2304_v17 }
 0x2f4   :  { %v6925_v48 = vadd.f32 %v2604_v3, %v2303_v14  ;;  %2676 = vmax.xlane.f32.xlu0 %v2675_v44  ;;  %v2376_v59 = vpop.f32.mrf.mxu2  ;;  %v2307_v14 = vld [vmem:[%s7932_s5 + $0x38] sm:$0xff]  ;;  %s5056_s5 = smov 16  }
 0x2f5   :  { %v6965_v51 = vadd.f32 %v2376_v59, %v2304_v17  ;;  %v2654_v9 = vsel %vm2617_vm3, %v6963_v42, -inf }
 0x2f6   :  { %v2699_v58 = vsel %vm2617_vm3, %v6925_v48, -inf }
 0x2f7   :  { %v2530_v21 = vpop.f32.mrf.mxu0  ;;  %2700 = vmax.xlane.f32.xlu2 %v2699_v58  ;;  %2649 = vmax.xlane.f32.xlu1 %v2648_v41  ;;  %v2630_v47 = vsel %vm2617_vm3, %v6965_v51, -inf }
 0x2f8   :  { %v6936_v31 = vadd.f32 %v2530_v21, %v2304_v17 }
 0x2fa   :  { %v2678_v45 = vsel %vm2617_vm3, %v6936_v31, -inf  ;;  %v2455_v57 = vpop.f32.mrf.mxu3 }
 0x2fb   :  { %v2607_v11 = vpop.f32.mrf.mxu1  ;;  %v6967_v37 = vadd.f32 %v2455_v57, %v2305_v20 }
 0x2fc   :  { %2679 = vmax.xlane.f32.xlu0 %v2678_v45  ;;  %v6951_v40 = vadd.f32 %v2607_v11, %v2304_v17  ;;  %v2378_v34 = vpop.f32.mrf.mxu2 }
 0x2fd   :  { %v2657_v16 = vsel %vm2617_vm3, %v6967_v37, -inf  ;;  %v6981_v8 = vadd.f32 %v2378_v34, %v2305_v20 }
 0x2fe   :  { %v2702_v15 = vsel %vm2617_vm3, %v6951_v40, -inf }
 0x2ff   :  { %v2532_v18 = vpop.f32.mrf.mxu0  ;;  %2652 = vmax.xlane.f32.xlu2 %v2651_v55  ;;  %2628 = vmax.xlane.f32.xlu1 %v2627_v38  ;;  %v2633_v56 = vsel %vm2617_vm3, %v6981_v8, -inf }
 0x300   :  { %v6953_v7 = vadd.f32 %v2532_v18, %v2305_v20 }
 0x302   :  { %v2681_v2 = vsel %vm2617_vm3, %v6953_v7, -inf  ;;  %v2458_v27 = vpop.f32.mrf.mxu3 }
 0x303   :  { %v2609_v36 = vpop.f32.mrf.mxu1  ;;  %v6997_v54 = vadd.f32 %v2458_v27, %v2306_v39 }
 0x304   :  { %v6955_v61 = vadd.f32 %v2609_v36, %v2305_v20  ;;  %v2381_v28 = vpop.f32.mrf.mxu2 }
 0x305   :  { %v6995_v30 = vadd.f32 %v2381_v28, %v2306_v39  ;;  %v2660_v35 = vsel %vm2617_vm3, %v6997_v54, -inf }
 0x306   :  { %v2705_v10 = vsel %vm2617_vm3, %v6955_v61, -inf }
 0x307   :  { %v2535_v52 = vpop.f32.mrf.mxu0  ;;  %2703 = vmax.xlane.f32.xlu2 %v2702_v15  ;;  %2682 = vmax.xlane.f32.xlu1 %v2681_v2  ;;  %v2636_v44 = vsel %vm2617_vm3, %v6995_v30, -inf }
 0x308   :  { %2706 = vmax.xlane.f32.xlu0 %v2705_v10  ;;  %v6983_v6 = vadd.f32 %v2535_v52, %v2306_v39 }
 0x30a   :  { %v2684_v49 = vsel %vm2617_vm3, %v6983_v6, -inf  ;;  %v2460_v41 = vpop.f32.mrf.mxu3 }
 0x30b   :  { %v2612_v4 = vpop.f32.mrf.mxu1  ;;  %v7007_v45 = vadd.f32 %v2460_v41, %v2307_v14 }
 0x30c   :  { %v6993_v3 = vadd.f32 %v2612_v4, %v2306_v39  ;;  %v2383_v21 = vpop.f32.mrf.mxu2 }
 0x30d   :  { %v7009_v63 = vadd.f32 %v2383_v21, %v2307_v14  ;;  %v2663_v38 = vsel %vm2617_vm3, %v7007_v45, -inf }
 0x30e   :  { %v2708_v17 = vsel %vm2617_vm3, %v6993_v3, -inf }
 0x30f   :  { %2631 = vmax.xlane.f32.xlu2 %v2630_v47  ;;  %2655 = vmax.xlane.f32.xlu1 %v2654_v9  ;;  %v2537_v53 = vpop.f32.mrf.mxu0  ;;  %v2639_v20 = vsel %vm2617_vm3, %v7009_v63, -inf }
 0x310   :  { %2658 = vmax.xlane.f32.xlu0 %v2657_v16  ;;  %v6985_v13 = vadd.f32 %v2537_v53, %v2307_v14 }
 0x312   :  { %v2687_v23 = vsel %vm2617_vm3, %v6985_v13, -inf }
 0x313   :  { %v2614_v58 = vpop.f32.mrf.mxu1 }
 0x314   :  { %v7005_v11 = vadd.f32 %v2614_v58, %v2307_v14 }
 0x316   :  { %v2711_v55 = vsel %vm2617_vm3, %v7005_v11, -inf }
 0x317   :  { %2685 = vmax.xlane.f32.xlu2 %v2684_v49  ;;  %2634 = vmax.xlane.f32.xlu1 %v2633_v56 }
 0x318   :  { %2688 = vmax.xlane.f32.xlu0 %v2687_v23 }
 0x31f   :  { %2637 = vmax.xlane.f32.xlu2 %v2636_v44  ;;  %2709 = vmax.xlane.f32.xlu1 %v2708_v17 }
 0x320   :  { %2661 = vmax.xlane.f32.xlu0 %v2660_v35 }
 0x327   :  { %2712 = vmax.xlane.f32.xlu2 %v2711_v55  ;;  %2664 = vmax.xlane.f32.xlu1 %v2663_v38 }
 0x328   :  { %2640 = vmax.xlane.f32.xlu0 %v2639_v20 }
 0x33d   :  { %v2692_v18 = vpop.xlane.xlu2 %2691 }
 0x33e   :  { %v2738_v59 = vsub.f32 %v6746_v22, %v2692_v18 }
 0x340   :  { %v2794_v36 = vmul.f32 1.442695, %v2738_v59 }
 0x341   :  { %v2668_v15 = vpop.xlane.xlu0 %2667 }
 0x342   :  { %4809 = vpow2.f32 %v2794_v36  ;;  %v2730_v2 = vsub.f32 %v6797_v60, %v2668_v15 }
 0x344   :  { %v2778_v10 = vmul.f32 1.442695, %v2730_v2 }
 0x345   :  { %v2620_v52 = vpop.xlane.xlu2 %2619 }
 0x346   :  { %v2714_v57 = vsub.f32 %v6765_v29, %v2620_v52  ;;  %4811 = vpow2.f32 %v2778_v10 }
 0x348   :  { %v7020_v34 = vpop.eup %4809  ;;  %v2746_v9 = vmul.f32 1.442695, %v2714_v57 }
 0x349   :  { %v2882_v47 = vsel %vm2617_vm3, %v7020_v34, 0.0  ;;  %v2671_v39 = vpop.xlane.xlu1 %2670  ;;  %v2644_v16 = vpop.xlane.xlu0 %2643 }
 0x34a   :  { %2883 = vadd.xlane.f32.xlu2 %v2882_v47  ;;  %v2731_v22 = vsub.f32 %v6826_v1, %v2671_v39  ;;  %4813 = vpow2.f32 %v2746_v9  ;;  %v2722_v53 = vsub.f32 %v6763_v33, %v2644_v16 }
 0x34c   :  { %v7025_v14 = vpop.eup %4811  ;;  %v2780_v60 = vmul.f32 1.442695, %v2731_v22  ;;  %v2762_v4 = vmul.f32 1.442695, %v2722_v53 }
 0x34d   :  { %v2858_v29 = vsel %vm2617_vm3, %v7025_v14, 0.0  ;;  %v2623_v27 = vpop.xlane.xlu2 %2622 }
 0x34e   :  { %4815 = vpow2.f32 %v2780_v60  ;;  %2859 = vadd.xlane.f32.xlu0 %v2858_v29  ;;  %v2715_v1 = vsub.f32 %v6807_v46, %v2623_v27 }
 0x34f   :  { %4817 = vpow2.f32 %v2762_v4 }
 0x350   :  { %v7030_v28 = vpop.eup %4813  ;;  %v2748_v41 = vmul.f32 1.442695, %v2715_v1 }
 0x351   :  { %v2810_v17 = vsel %vm2617_vm3, %v7030_v28, 0.0  ;;  %v2647_v58 = vpop.xlane.xlu1 %2646 }
 0x352   :  { %v2695_v49 = vpop.xlane.xlu0 %2694  ;;  %v2723_v20 = vsub.f32 %v6780_v43, %v2647_v58 }
 0x353   :  { %v2739_v56 = vsub.f32 %v6839_v50, %v2695_v49 }
 0x354   :  { %v7033_v23 = vpop.eup %4815  ;;  %v2764_v10 = vmul.f32 1.442695, %v2723_v20 }
 0x355   :  { %v2796_v44 = vmul.f32 1.442695, %v2739_v56  ;;  %v2861_v33 = vsel %vm2617_vm3, %v7033_v23, 0.0  ;;  %v7040_v35 = vpop.eup %4817 }
 0x356   :  { %2862 = vadd.xlane.f32.xlu1 %v2861_v33  ;;  %2811 = vadd.xlane.f32.xlu0 %v2810_v17  ;;  %v2834_v55 = vsel %vm2617_vm3, %v7040_v35, 0.0 }
 0x357   :  { %4819 = vpow2.f32 %v2796_v44 }
 0x358   :  { %4821 = vpow2.f32 %v2748_v41 }
 0x35d   :  { %v7042_v21 = vpop.eup %4819 }
 0x35e   :  { %v2674_v50 = vpop.xlane.xlu2 %2673  ;;  %2835 = vadd.xlane.f32.xlu1 %v2834_v55  ;;  %v2885_v38 = vsel %vm2617_vm3, %v7042_v21, 0.0  ;;  %v7052_v52 = vpop.eup %4821 }
 0x35f   :  { %v2732_v46 = vsub.f32 %v6899_v25, %v2674_v50  ;;  %v2626_v59 = vpop.xlane.xlu0 %2625  ;;  %2886 = vadd.xlane.f32.xlu0 %v2885_v38  ;;  %v2813_v47 = vsel %vm2617_vm3, %v7052_v52, 0.0 }
 0x360   :  { %v2716_v15 = vsub.f32 %v6886_v19, %v2626_v59 }
 0x361   :  { %v2782_v18 = vmul.f32 1.442695, %v2732_v46 }
 0x362   :  { %v2698_v36 = vpop.xlane.xlu1 %2697  ;;  %v2750_v25 = vmul.f32 1.442695, %v2716_v15 }
 0x363   :  { %4823 = vpow2.f32 %v2782_v18  ;;  %v2740_v2 = vsub.f32 %v6909_v26, %v2698_v36 }
 0x364   :  { %4825 = vpow2.f32 %v2750_v25 }
 0x365   :  { %v2798_v57 = vmul.f32 1.442695, %v2740_v2 }
 0x366   :  { %2814 = vadd.xlane.f32.xlu1 %v2813_v47 }
 0x367   :  { %4827 = vpow2.f32 %v2798_v57  ;;  %v2677_v9 = vpop.xlane.xlu0 %2676 }
 0x368   :  { %4829 = vpow2.f32 %v2764_v10  ;;  %v2733_v16 = vsub.f32 %v6920_v5, %v2677_v9 }
 0x369   :  { %v7056_v43 = vpop.eup %4823 }
 0x36a   :  { %v2701_v39 = vpop.xlane.xlu2 %2700  ;;  %v2650_v19 = vpop.xlane.xlu1 %2649  ;;  %v2864_v26 = vsel %vm2617_vm3, %v7056_v43, 0.0  ;;  %v2784_v29 = vmul.f32 1.442695, %v2733_v16 }
 0x36b   :  { %v2741_v22 = vsub.f32 %v6925_v48, %v2701_v39  ;;  %v2724_v60 = vsub.f32 %v6923_v62, %v2650_v19  ;;  %2865 = vadd.xlane.f32.xlu2 %v2864_v26  ;;  %v7063_v53 = vpop.eup %4825 }
 0x36c   :  { %v2816_v56 = vsel %vm2617_vm3, %v7063_v53, 0.0  ;;  %4831 = vpow2.f32 %v2784_v29 }
 0x36d   :  { %v7065_v4 = vpop.eup %4827  ;;  %v2800_v27 = vmul.f32 1.442695, %v2741_v22  ;;  %v2766_v49 = vmul.f32 1.442695, %v2724_v60  ;;  %2817 = vadd.xlane.f32.xlu0 %v2816_v56 }
 0x36e   :  { %v7069_v5 = vpop.eup %4829  ;;  %v2888_v48 = vsel %vm2617_vm3, %v7065_v4, 0.0 }
 0x36f   :  { %4833 = vpow2.f32 %v2766_v49  ;;  %2889 = vadd.xlane.f32.xlu1 %v2888_v48  ;;  %v2680_v62 = vpop.xlane.xlu0 %2679  ;;  %v2837_v33 = vsel %vm2617_vm3, %v7069_v5, 0.0 }
 0x370   :  { %4835 = vpow2.f32 %v2800_v27  ;;  %v2734_v20 = vsub.f32 %v6936_v31, %v2680_v62 }
 0x372   :  { %v2653_v1 = vpop.xlane.xlu2 %2652  ;;  %v2629_v44 = vpop.xlane.xlu1 %2628 }
 0x373   :  { %v2725_v17 = vsub.f32 %v6938_v24, %v2653_v1  ;;  %v2717_v58 = vsub.f32 %v6940_v12, %v2629_v44  ;;  %2838 = vadd.xlane.f32.xlu2 %v2837_v33  ;;  %v7077_v41 = vpop.eup %4831  ;;  %v2786_v12 = vmul.f32 1.442695, %v2734_v20 }
 0x374   :  { %v2867_v55 = vsel %vm2617_vm3, %v7077_v41, 0.0 }
 0x375   :  { %v2768_v50 = vmul.f32 1.442695, %v2725_v17  ;;  %v2752_v46 = vmul.f32 1.442695, %v2717_v58  ;;  %v7081_v38 = vpop.eup %4833  ;;  %2868 = vadd.xlane.f32.xlu0 %v2867_v55 }
 0x376   :  { %v7084_v18 = vpop.eup %4835  ;;  %v2840_v24 = vsel %vm2617_vm3, %v7081_v38, 0.0 }
 0x377   :  { %4837 = vpow2.f32 %v2752_v46  ;;  %2841 = vadd.xlane.f32.xlu1 %v2840_v24  ;;  %v2891_v15 = vsel %vm2617_vm3, %v7084_v18, 0.0 }
 0x378   :  { %4839 = vpow2.f32 %v2768_v50 }
 0x379   :  { %4841 = vpow2.f32 %v2786_v12 }
 0x37a   :  { %v2704_v59 = vpop.xlane.xlu2 %2703  ;;  %v2683_v36 = vpop.xlane.xlu1 %2682 }
 0x37b   :  { %v2742_v2 = vsub.f32 %v6951_v40, %v2704_v59  ;;  %v2707_v25 = vpop.xlane.xlu0 %2706  ;;  %2892 = vadd.xlane.f32.xlu2 %v2891_v15  ;;  %v2735_v27 = vsub.f32 %v6953_v7, %v2683_v36 }
 0x37d   :  { %v2802_v31 = vmul.f32 1.442695, %v2742_v2  ;;  %v7091_v10 = vpop.eup %4837 }
 0x37e   :  { %v7093_v57 = vpop.eup %4839  ;;  %v2819_v47 = vsel %vm2617_vm3, %v7091_v10, 0.0 }
 0x37f   :  { %4843 = vpow2.f32 %v2802_v31  ;;  %2820 = vadd.xlane.f32.xlu1 %v2819_v47  ;;  %v2843_v19 = vsel %vm2617_vm3, %v7093_v57, 0.0  ;;  %v7101_v22 = vpop.eup %4841 }
 0x382   :  { %v2632_v9 = vpop.xlane.xlu2 %2631  ;;  %v2656_v39 = vpop.xlane.xlu1 %2655 }
 0x383   :  { %v2718_v40 = vsub.f32 %v6965_v51, %v2632_v9  ;;  %v2726_v16 = vsub.f32 %v6963_v42, %v2656_v39  ;;  %v2659_v26 = vpop.xlane.xlu0 %2658  ;;  %2844 = vadd.xlane.f32.xlu2 %v2843_v19  ;;  %v2743_v51 = vsub.f32 %v6955_v61, %v2707_v25  ;;  %v2870_v42 = vsel %vm2617_vm3, %v7101_v22, 0.0 }
 0x384   :  { %v2727_v60 = vsub.f32 %v6967_v37, %v2659_v26  ;;  %v2788_v37 = vmul.f32 1.442695, %v2735_v27 }
 0x385   :  { %v7104_v29 = vpop.eup %4843  ;;  %v2754_v49 = vmul.f32 1.442695, %v2718_v40  ;;  %v2770_v56 = vmul.f32 1.442695, %v2726_v16  ;;  %v2804_v7 = vmul.f32 1.442695, %v2743_v51 }
 0x386   :  { %v2772_v48 = vmul.f32 1.442695, %v2727_v60  ;;  %v2894_v62 = vsel %vm2617_vm3, %v7104_v29, 0.0 }
 0x387   :  { %4845 = vpow2.f32 %v2754_v49  ;;  %2895 = vadd.xlane.f32.xlu0 %v2894_v62  ;;  %2871 = vadd.xlane.f32.xlu1 %v2870_v42 }
 0x388   :  { %4847 = vpow2.f32 %v2770_v56 }
 0x389   :  { %4849 = vpow2.f32 %v2772_v48 }
 0x38a   :  { %v2686_v1 = vpop.xlane.xlu2 %2685  ;;  %v2635_v44 = vpop.xlane.xlu1 %2634  ;;  %4851 = vpow2.f32 %v2788_v37 }
 0x38b   :  { %v2719_v33 = vsub.f32 %v6981_v8, %v2635_v44  ;;  %v2689_v17 = vpop.xlane.xlu0 %2688  ;;  %v2736_v46 = vsub.f32 %v6983_v6, %v2686_v1  ;;  %4853 = vpow2.f32 %v2804_v7 }
 0x38c   :  { %v2737_v40 = vsub.f32 %v6985_v13, %v2689_v17 }
 0x38d   :  { %v7113_v58 = vpop.eup %4845  ;;  %v2756_v50 = vmul.f32 1.442695, %v2719_v33  ;;  %v2790_v12 = vmul.f32 1.442695, %v2736_v46 }
 0x38e   :  { %v7115_v61 = vpop.eup %4847  ;;  %v2822_v55 = vsel %vm2617_vm3, %v7113_v58, 0.0  ;;  %v2792_v26 = vmul.f32 1.442695, %v2737_v40 }
 0x38f   :  { %v7120_v20 = vpop.eup %4849  ;;  %2823 = vadd.xlane.f32.xlu2 %v2822_v55  ;;  %v2846_v24 = vsel %vm2617_vm3, %v7115_v61, 0.0  ;;  %4855 = vpow2.f32 %v2756_v50 }
 0x390   :  { %2847 = vadd.xlane.f32.xlu0 %v2846_v24  ;;  %v2849_v8 = vsel %vm2617_vm3, %v7120_v20, 0.0  ;;  %v7126_v6 = vpop.eup %4851  ;;  %4857 = vpow2.f32 %v2790_v12 }
 0x391   :  { %2850 = vadd.xlane.f32.xlu1 %v2849_v8  ;;  %v7130_v31 = vpop.eup %4853  ;;  %v2873_v19 = vsel %vm2617_vm3, %v7126_v6, 0.0 }
 0x392   :  { %v2638_v59 = vpop.xlane.xlu2 %2637  ;;  %v2710_v36 = vpop.xlane.xlu1 %2709 }
 0x393   :  { %v2720_v15 = vsub.f32 %v6995_v30, %v2638_v59  ;;  %v2662_v2 = vpop.xlane.xlu0 %2661  ;;  %v2744_v1 = vsub.f32 %v6993_v3, %v2710_v36 }
 0x394   :  { %v2728_v25 = vsub.f32 %v6997_v54, %v2662_v2  ;;  %v2897_v54 = vsel %vm2617_vm3, %v7130_v31, 0.0 }
 0x395   :  { %v2758_v47 = vmul.f32 1.442695, %v2720_v15  ;;  %v7132_v9 = vpop.eup %4855  ;;  %v2806_v7 = vmul.f32 1.442695, %v2744_v1 }
 0x396   :  { %v2774_v39 = vmul.f32 1.442695, %v2728_v25  ;;  %v2825_v30 = vsel %vm2617_vm3, %v7132_v9, 0.0  ;;  %v7142_v56 = vpop.eup %4857 }
 0x397   :  { %4859 = vpow2.f32 %v2758_v47  ;;  %2874 = vadd.xlane.f32.xlu2 %v2873_v19  ;;  %v2876_v44 = vsel %vm2617_vm3, %v7142_v56, 0.0 }
 0x398   :  { %2826 = vadd.xlane.f32.xlu0 %v2825_v30  ;;  %4861 = vpow2.f32 %v2774_v39 }
 0x399   :  { %2898 = vadd.xlane.f32.xlu1 %v2897_v54  ;;  %4863 = vpow2.f32 %v2792_v26 }
 0x39a   :  { %v2665_v16 = vpop.xlane.xlu1 %2664  ;;  %v2713_v60 = vpop.xlane.xlu2 %2712 }
 0x39b   :  { %v2729_v27 = vsub.f32 %v7007_v45, %v2665_v16  ;;  %v2641_v49 = vpop.xlane.xlu0 %2640  ;;  %v2745_v51 = vsub.f32 %v7005_v11, %v2713_v60 }
 0x39c   :  { %v2721_v13 = vsub.f32 %v7009_v63, %v2641_v49 }
 0x39d   :  { %v7145_v48 = vpop.eup %4859  ;;  %v2776_v62 = vmul.f32 1.442695, %v2729_v27  ;;  %v2808_v11 = vmul.f32 1.442695, %v2745_v51 }
 0x39e   :  { %v2760_v42 = vmul.f32 1.442695, %v2721_v13  ;;  %v7148_v37 = vpop.eup %4861  ;;  %v2828_v63 = vsel %vm2617_vm3, %v7145_v48, 0.0 }
 0x39f   :  { %4865 = vpow2.f32 %v2776_v62  ;;  %v2852_v45 = vsel %vm2617_vm3, %v7148_v37, 0.0  ;;  %v7157_v33 = vpop.eup %4863 }
 0x3a0   :  { %2877 = vadd.xlane.f32.xlu0 %v2876_v44  ;;  %4867 = vpow2.f32 %v2760_v42  ;;  %2853 = vadd.xlane.f32.xlu2 %v2852_v45  ;;  %v2879_v55 = vsel %vm2617_vm3, %v7157_v33, 0.0 }
 0x3a1   :  { %2829 = vadd.xlane.f32.xlu1 %v2828_v63  ;;  %4869 = vpow2.f32 %v2808_v11 }
 0x3a2   :  { %4871 = vpow2.f32 %v2806_v7 }
 0x3a5   :  { %v7159_v17 = vpop.eup %4865 }
 0x3a6   :  { %v7161_v3 = vpop.eup %4867  ;;  %v2855_v50 = vsel %vm2617_vm3, %v7159_v17, 0.0 }
 0x3a7   :  { %v2831_v46 = vsel %vm2617_vm3, %v7161_v3, 0.0  ;;  %v7169_v24 = vpop.eup %4869 }
 0x3a8   :  { %2856 = vadd.xlane.f32.xlu0 %v2855_v50  ;;  %2832 = vadd.xlane.f32.xlu2 %v2831_v46  ;;  %v7171_v8 = vpop.eup %4871  ;;  %v2903_v12 = vsel %vm2617_vm3, %v7169_v24, 0.0 }
 0x3a9   :  { %2880 = vadd.xlane.f32.xlu1 %v2879_v55  ;;  %v2900_v59 = vsel %vm2617_vm3, %v7171_v8, 0.0 }
 0x3b0   :  { %2904 = vadd.xlane.f32.xlu0 %v2903_v12  ;;  %2901 = vadd.xlane.f32.xlu2 %v2900_v59 }
 0x3bd   :  { %v2884_v47 = vpop.xlane.xlu2 %2883 }
 0x3c1   :  { %v2860_v36 = vpop.xlane.xlu0 %2859 }
 0x3c2   :  { %4873 = vrcp.f32 %v2860_v36 }
 0x3c8   :  { %v4874_v25 = vpop.eup %4873 }
 0x3c9   :  { %v2863_v15 = vpop.xlane.xlu1 %2862  ;;  %v2812_v2 = vpop.xlane.xlu0 %2811  ;;  %v2954_v39 = vmul.f32 %v4874_v25, %v7025_v14 }
 0x3ca   :  { %4875 = vrcp.f32 %v2863_v15 }
 0x3cb   :  { %4877 = vrcp.f32 %v2884_v47  ;;  %v2986_v40 = vpack.c.bf16 %v2954_v39, %v2954_v39 }
 0x3cd   :  { %v3172_v27 = vunpack.c.l.b16 %v2986_v40 }
 0x3d0   :  { %v4876_v19 = vpop.eup %4875 }
 0x3d1   :  { %v2955_v30 = vmul.f32 %v4876_v19, %v7033_v23  ;;  %v2836_v54 = vpop.xlane.xlu1 %2835  ;;  %v4878_v26 = vpop.eup %4877 }
 0x3d2   :  { %v2887_v16 = vpop.xlane.xlu0 %2886  ;;  %v2962_v13 = vmul.f32 %v4878_v26, %v7020_v34 }
 0x3d3   :  { %v2987_v60 = vpack.c.bf16 %v2955_v30, %v2955_v30  ;;  %4879 = vrcp.f32 %v2887_v16 }
 0x3d4   :  { %4881 = vrcp.f32 %v2812_v2  ;;  %v2994_v1 = vpack.c.bf16 %v2962_v13, %v2962_v13 }
 0x3d5   :  { %v3173_v49 = vunpack.c.l.b16 %v2987_v60 }
 0x3d6   :  { %v3245_v11 = vunpack.c.l.b16 %v2994_v1 }
 0x3d7   :  { %v3180_v62 = vpack.c.b16 %v3173_v49, %v3172_v27 }
 0x3d9   :  { %v4880_v51 = vpop.eup %4879  ;;  %4502 = vmatmul.msk.bf16.vlgmr.msra.gmra.mxu0 %vm2617_vm3, %v3180_v62  ;;  %v2815_v42 = vpop.xlane.xlu1 %2814 }
 0x3da   :  { %v4882_v14 = vpop.eup %4881  ;;  %v2963_v44 = vmul.f32 %v4880_v51, %v7042_v21  ;;  %4883 = vrcp.f32 %v2815_v42 }
 0x3db   :  { %v2938_v63 = vmul.f32 %v4882_v14, %v7030_v28  ;;  %4885 = vrcp.f32 %v2836_v54 }
 0x3dc   :  { %v2995_v23 = vpack.c.bf16 %v2963_v44, %v2963_v44 }
 0x3dd   :  { %v2970_v55 = vpack.c.bf16 %v2938_v63, %v2938_v63 }
 0x3de   :  { %v2866_v45 = vpop.xlane.xlu2 %2865  ;;  %v3246_v7 = vunpack.c.l.b16 %v2995_v23 }
 0x3df   :  { %4887 = vrcp.f32 %v2866_v45  ;;  %v3026_v2 = vunpack.c.l.b16 %v2970_v55 }
 0x3e0   :  { %v2818_v50 = vpop.xlane.xlu0 %2817  ;;  %v4884_v46 = vpop.eup %4883  ;;  %v3253_v34 = vpack.c.b16 %v3246_v7, %v3245_v11 }
 0x3e1   :  { %v2939_v12 = vmul.f32 %v4884_v46, %v7052_v52  ;;  %v4886_v15 = vpop.eup %4885 }
 0x3e2   :  { %v2890_v59 = vpop.xlane.xlu1 %2889  ;;  %4506 = vmatmul.msk.bf16.vlgmr.msra.gmra.mxu1 %vm2617_vm3, %v3253_v34  ;;  %v2946_v19 = vmul.f32 %v4886_v15, %v7040_v35 }
 0x3e3   :  { %v2971_v36 = vpack.c.bf16 %v2939_v12, %v2939_v12 }
 0x3e4   :  { %v2978_v54 = vpack.c.bf16 %v2946_v19, %v2946_v19 }
 0x3e5   :  { %v3027_v25 = vunpack.c.l.b16 %v2971_v36  ;;  %v4888_v39 = vpop.eup %4887 }
 0x3e6   :  { %v2839_v21 = vpop.xlane.xlu2 %2838  ;;  %v2956_v30 = vmul.f32 %v4888_v39, %v7056_v43  ;;  %v3099_v62 = vunpack.c.l.b16 %v2978_v54 }
 0x3e7   :  { %4889 = vrcp.f32 %v2839_v21  ;;  %v3034_v47 = vpack.c.b16 %v3027_v25, %v3026_v2 }
 0x3e8   :  { %v2869_v28 = vpop.xlane.xlu0 %2868  ;;  %4891 = vrcp.f32 %v2890_v59  ;;  %v2988_v35 = vpack.c.bf16 %v2956_v30, %v2956_v30 }
 0x3e9   :  { %4893 = vrcp.f32 %v2869_v28  ;;  %4494 = vmatmul.msk.bf16.vlgmr.msrb.gmra.mxu2 %vm2617_vm3, %v3034_v47 }
 0x3ea   :  { %v2842_v52 = vpop.xlane.xlu1 %2841  ;;  %4895 = vrcp.f32 %v2818_v50 }
 0x3ed   :  { %v4890_v40 = vpop.eup %4889 }
 0x3ee   :  { %v2947_v16 = vmul.f32 %v4890_v40, %v7069_v5  ;;  %v2893_v26 = vpop.xlane.xlu2 %2892  ;;  %v4892_v60 = vpop.eup %4891  ;;  %v3174_v5 = vunpack.c.l.b16 %v2988_v35 }
 0x3ef   :  { %4897 = vrcp.f32 %v2893_v26  ;;  %v4894_v27 = vpop.eup %4893  ;;  %v2964_v42 = vmul.f32 %v4892_v60, %v7065_v4 }
 0x3f0   :  { %v2979_v49 = vpack.c.bf16 %v2947_v16, %v2947_v16  ;;  %4899 = vrcp.f32 %v2842_v52  ;;  %v2957_v13 = vmul.f32 %v4894_v27, %v7077_v41  ;;  %v4896_v43 = vpop.eup %4895 }
 0x3f1   :  { %v2996_v7 = vpack.c.bf16 %v2964_v42, %v2964_v42  ;;  %v2940_v46 = vmul.f32 %v4896_v43, %v7063_v53 }
 0x3f2   :  { %v3100_v51 = vunpack.c.l.b16 %v2979_v49  ;;  %v2821_v14 = vpop.xlane.xlu1 %2820  ;;  %v2989_v1 = vpack.c.bf16 %v2957_v13, %v2957_v13 }
 0x3f3   :  { %4901 = vrcp.f32 %v2821_v14  ;;  %v3247_v55 = vunpack.c.l.b16 %v2996_v7  ;;  %v2972_v2 = vpack.c.bf16 %v2940_v46, %v2940_v46 }
 0x3f4   :  { %v3107_v44 = vpack.c.b16 %v3100_v51, %v3099_v62  ;;  %v3175_v45 = vunpack.c.l.b16 %v2989_v1 }
 0x3f5   :  { %v4898_v23 = vpop.eup %4897  ;;  %v3028_v39 = vunpack.c.l.b16 %v2972_v2 }
 0x3f6   :  { %4498 = vmatmul.msk.bf16.vlgmr.msra.gmra.mxu3 %vm2617_vm3, %v3107_v44  ;;  %v2845_v63 = vpop.xlane.xlu2 %2844  ;;  %v2965_v11 = vmul.f32 %v4898_v23, %v7084_v18  ;;  %v4900_v41 = vpop.eup %4899  ;;  %v3181_v50 = vpack.c.b16 %v3175_v45, %v3174_v5 }
 0x3f7   :  { %4903 = vrcp.f32 %v2845_v63  ;;  %v2948_v59 = vmul.f32 %v4900_v41, %v7081_v38 }
 0x3f8   :  { %v2997_v4 = vpack.c.bf16 %v2965_v11, %v2965_v11  ;;  %4503 = vmatmul.msk.bf16.gmra.mxu0 %vm2617_vm3, %v3181_v50 }
 0x3f9   :  { %v4902_v34 = vpop.eup %4901  ;;  %v2980_v47 = vpack.c.bf16 %v2948_v59, %v2948_v59 }
 0x3fa   :  { %v3248_v12 = vunpack.c.l.b16 %v2997_v4  ;;  %v2896_v36 = vpop.xlane.xlu0 %2895  ;;  %v2872_v21 = vpop.xlane.xlu1 %2871  ;;  %v2941_v15 = vmul.f32 %v4902_v34, %v7091_v10 }
 0x3fb   :  { %v3101_v54 = vunpack.c.l.b16 %v2980_v47  ;;  %4905 = vrcp.f32 %v2872_v21 }
 0x3fc   :  { %v3254_v18 = vpack.c.b16 %v3248_v12, %v3247_v55  ;;  %v2973_v28 = vpack.c.bf16 %v2941_v15, %v2941_v15 }
 0x3fd   :  { %v4904_v25 = vpop.eup %4903 }
 0x3fe   :  { %4507 = vmatmul.msk.bf16.gmra.mxu1 %vm2617_vm3, %v3254_v18  ;;  %v2949_v53 = vmul.f32 %v4904_v25, %v7093_v57  ;;  %v3029_v19 = vunpack.c.l.b16 %v2973_v28 }
 0x400   :  { %v2981_v52 = vpack.c.bf16 %v2949_v53, %v2949_v53  ;;  %v3035_v40 = vpack.c.b16 %v3029_v19, %v3028_v39 }
 0x401   :  { %v4906_v57 = vpop.eup %4905 }
 0x402   :  { %v2824_v30 = vpop.xlane.xlu2 %2823  ;;  %v3102_v38 = vunpack.c.l.b16 %v2981_v52  ;;  %4495 = vmatmul.msk.bf16.gmra.mxu2 %vm2617_vm3, %v3035_v40  ;;  %v2958_v43 = vmul.f32 %v4906_v57, %v7101_v22 }
 0x403   :  { %v2848_v16 = vpop.xlane.xlu0 %2847 }
 0x404   :  { %4907 = vrcp.f32 %v2848_v16  ;;  %v3108_v10 = vpack.c.b16 %v3102_v38, %v3101_v54  ;;  %v2851_v26 = vpop.xlane.xlu1 %2850  ;;  %v2990_v41 = vpack.c.bf16 %v2958_v43, %v2958_v43 }
 0x405   :  { %4909 = vrcp.f32 %v2851_v26 }
 0x406   :  { %4911 = vrcp.f32 %v2824_v30  ;;  %4499 = vmatmul.msk.bf16.gmra.mxu3 %vm2617_vm3, %v3108_v10 }
 0x407   :  { %4913 = vrcp.f32 %v2896_v36 }
 0x40a   :  { %v4908_v60 = vpop.eup %4907  ;;  %v2875_v27 = vpop.xlane.xlu2 %2874 }
 0x40b   :  { %v4910_v49 = vpop.eup %4909  ;;  %4915 = vrcp.f32 %v2875_v27  ;;  %v2827_v13 = vpop.xlane.xlu0 %2826  ;;  %v2950_v35 = vmul.f32 %v4908_v60, %v7115_v61 }
 0x40c   :  { %v4912_v62 = vpop.eup %4911  ;;  %4917 = vrcp.f32 %v2827_v13  ;;  %v2899_v51 = vpop.xlane.xlu1 %2898  ;;  %v2951_v42 = vmul.f32 %v4910_v49, %v7120_v20 }
 0x40d   :  { %v4914_v14 = vpop.eup %4913  ;;  %4919 = vrcp.f32 %v2899_v51  ;;  %v2982_v1 = vpack.c.bf16 %v2950_v35, %v2950_v35  ;;  %v2942_v23 = vmul.f32 %v4912_v62, %v7113_v58 }
 0x40e   :  { %v2983_v44 = vpack.c.bf16 %v2951_v42, %v2951_v42  ;;  %v2966_v63 = vmul.f32 %v4914_v14, %v7104_v29  ;;  %v3176_v29 = vunpack.c.l.b16 %v2990_v41 }
 0x40f   :  { %v3103_v5 = vunpack.c.l.b16 %v2982_v1  ;;  %v2974_v34 = vpack.c.bf16 %v2942_v23, %v2942_v23 }
 0x410   :  { %v3104_v45 = vunpack.c.l.b16 %v2983_v44  ;;  %v2998_v59 = vpack.c.bf16 %v2966_v63, %v2966_v63 }
 0x411   :  { %v4916_v11 = vpop.eup %4915  ;;  %v3030_v15 = vunpack.c.l.b16 %v2974_v34 }
 0x412   :  { %v4918_v7 = vpop.eup %4917  ;;  %v2959_v61 = vmul.f32 %v4916_v11, %v7126_v6  ;;  %v3109_v50 = vpack.c.b16 %v3104_v45, %v3103_v5 }
 0x413   :  { %v4920_v46 = vpop.eup %4919  ;;  %v2878_v20 = vpop.xlane.xlu0 %2877  ;;  %v2943_v4 = vmul.f32 %v4918_v7, %v7132_v9  ;;  %v3249_v9 = vunpack.c.l.b16 %v2998_v59 }
 0x414   :  { %v2854_v55 = vpop.xlane.xlu2 %2853  ;;  %v2991_v22 = vpack.c.bf16 %v2959_v61, %v2959_v61  ;;  %v2830_v12 = vpop.xlane.xlu1 %2829  ;;  %v2967_v58 = vmul.f32 %v4920_v46, %v7130_v31 }
 0x415   :  { %4921 = vrcp.f32 %v2854_v55  ;;  %v2975_v36 = vpack.c.bf16 %v2943_v4, %v2943_v4 }
 0x416   :  { %v3177_v21 = vunpack.c.l.b16 %v2991_v22  ;;  %4923 = vrcp.f32 %v2830_v12  ;;  %4500 = vmatmul.msk.bf16.gmra.mxu3 %vm2617_vm3, %v3109_v50  ;;  %v2999_v6 = vpack.c.bf16 %v2967_v58, %v2967_v58 }
 0x417   :  { %v3031_v2 = vunpack.c.l.b16 %v2975_v36  ;;  %4925 = vrcp.f32 %v2878_v20 }
 0x418   :  { %v3182_v18 = vpack.c.b16 %v3177_v21, %v3176_v29  ;;  %v3250_v25 = vunpack.c.l.b16 %v2999_v6 }
 0x419   :  { %v3036_v28 = vpack.c.b16 %v3031_v2, %v3030_v15 }
 0x41a   :  { %4504 = vmatmul.msk.bf16.gmra.mxu0 %vm2617_vm3, %v3182_v18  ;;  %v3255_v53 = vpack.c.b16 %v3250_v25, %v3249_v9 }
 0x41b   :  { %v4922_v31 = vpop.eup %4921  ;;  %v2857_v47 = vpop.xlane.xlu0 %2856  ;;  %4496 = vmatmul.msk.bf16.gmra.mxu2 %vm2617_vm3, %v3036_v28 }
 0x41c   :  { %v4924_v39 = vpop.eup %4923  ;;  %4927 = vrcp.f32 %v2857_v47  ;;  %v2833_v19 = vpop.xlane.xlu2 %2832  ;;  %4508 = vmatmul.msk.bf16.gmra.mxu1 %vm2617_vm3, %v3255_v53  ;;  %v2952_v54 = vmul.f32 %v4922_v31, %v7148_v37 }
 0x41d   :  { %v2881_v52 = vpop.xlane.xlu1 %2880  ;;  %4929 = vrcp.f32 %v2833_v19  ;;  %v4926_v40 = vpop.eup %4925  ;;  %v2944_v30 = vmul.f32 %v4924_v39, %v7145_v48 }
 0x41e   :  { %4931 = vrcp.f32 %v2881_v52  ;;  %v2960_v38 = vmul.f32 %v4926_v40, %v7142_v56  ;;  %v2984_v27 = vpack.c.bf16 %v2952_v54, %v2952_v54 }
 0x41f   :  { %v2976_v10 = vpack.c.bf16 %v2944_v30, %v2944_v30 }
 0x420   :  { %v2992_v51 = vpack.c.bf16 %v2960_v38, %v2960_v38  ;;  %v3105_v56 = vunpack.c.l.b16 %v2984_v27 }
 0x421   :  { %v3032_v42 = vunpack.c.l.b16 %v2976_v10 }
 0x422   :  { %v4928_v16 = vpop.eup %4927  ;;  %v3178_v23 = vunpack.c.l.b16 %v2992_v51 }
 0x423   :  { %v4930_v26 = vpop.eup %4929  ;;  %v2905_v57 = vpop.xlane.xlu0 %2904  ;;  %v2953_v60 = vmul.f32 %v4928_v16, %v7159_v17 }
 0x424   :  { %v4932_v49 = vpop.eup %4931  ;;  %4933 = vrcp.f32 %v2905_v57  ;;  %v2902_v13 = vpop.xlane.xlu2 %2901  ;;  %v2945_v35 = vmul.f32 %v4930_v26, %v7161_v3 }
 0x425   :  { %4935 = vrcp.f32 %v2902_v13  ;;  %v2985_v62 = vpack.c.bf16 %v2953_v60, %v2953_v60  ;;  %v2961_v48 = vmul.f32 %v4932_v49, %v7157_v33 }
 0x426   :  { %v2977_v37 = vpack.c.bf16 %v2945_v35, %v2945_v35 }
 0x427   :  { %v3106_v14 = vunpack.c.l.b16 %v2985_v62  ;;  %v2993_v1 = vpack.c.bf16 %v2961_v48, %v2961_v48 }
 0x428   :  { %v3033_v43 = vunpack.c.l.b16 %v2977_v37 }
 0x429   :  { %v3110_v44 = vpack.c.b16 %v3106_v14, %v3105_v56  ;;  %v3179_v17 = vunpack.c.l.b16 %v2993_v1 }
 0x42a   :  { %v4934_v5 = vpop.eup %4933  ;;  %v3037_v45 = vpack.c.b16 %v3033_v43, %v3032_v42 }
 0x42b   :  { %v4936_v63 = vpop.eup %4935  ;;  %4501 = vmatmul.msk.bf16.gmra.mxu3 %vm2617_vm3, %v3110_v44  ;;  %v3183_v3 = vpack.c.b16 %v3179_v17, %v3178_v23  ;;  %v2969_v11 = vmul.f32 %v4934_v5, %v7169_v24 }
 0x42c   :  { %4497 = vmatmul.msk.bf16.gmra.mxu2 %vm2617_vm3, %v3037_v45  ;;  %v2968_v33 = vmul.f32 %v4936_v63, %v7171_v8 }
 0x42d   :  { %4505 = vmatmul.msk.bf16.gmra.mxu0 %vm2617_vm3, %v3183_v3  ;;  %v3001_v7 = vpack.c.bf16 %v2969_v11, %v2969_v11 }
 0x42e   :  { %v3000_v61 = vpack.c.bf16 %v2968_v33, %v2968_v33 }
 0x42f   :  { %v3252_v41 = vunpack.c.l.b16 %v3001_v7 }
 0x430   :  { %v3251_v50 = vunpack.c.l.b16 %v3000_v61 }
 0x432   :  { %v3256_v46 = vpack.c.b16 %v3252_v41, %v3251_v50 }
 0x434   :  { %4509 = vmatmul.msk.bf16.gmra.mxu1 %vm2617_vm3, %v3256_v46 }
 0x456   :  { %v3217_v20 = vpop.f32.mrf.mxu0 }
 0x457   :  { %v3336_v8 = vrot.slane %v3217_v20, 4 }
 0x45e   :  { %v3219_v22 = vpop.f32.mrf.mxu0 }
 0x45f   :  { %v3290_v4 = vpop.f32.mrf.mxu1  ;;  %v3448_v18 = vrot.slane %v3219_v22, 4 }
 0x460   :  { %v3334_v29 = vrot.slane %v3290_v4, 4  ;;  %v3337_v15 = vsel %vm360_vm1, %v3290_v4, %v3336_v8 }
 0x461   :  { %v7228_v25 = vperm.slane %v3337_v15, %v5256_v32 }
 0x462   :  { %v3335_v9 = vsel %vm360_vm1, %v3334_v29, %v3217_v20 }
 0x463   :  { %v7233_v39 = vperm.slane %v3335_v9, %v5256_v32  ;;  %v3396_v16 = vrot.slane %v7228_v25, 4 }
 0x465   :  { %v3384_v48 = vrot.slane %v7233_v39, 4 }
 0x467   :  { %v3292_v12 = vpop.f32.mrf.mxu1 }
 0x468   :  { %v3446_v2 = vrot.slane %v3292_v12, 4  ;;  %v3449_v28 = vsel %vm360_vm1, %v3292_v12, %v3448_v18 }
 0x469   :  { %v7236_v40 = vperm.slane %v3449_v28, %v5256_v32 }
 0x46a   :  { %v3447_v31 = vsel %vm360_vm1, %v3446_v2, %v3219_v22 }
 0x46b   :  { %v7241_v10 = vperm.slane %v3447_v31, %v5256_v32  ;;  %v3508_v56 = vrot.slane %v7236_v40, 4 }
 0x46c   :  { %v3071_v34 = vpop.f32.mrf.mxu2 }
 0x46d   :  { %v3312_v47 = vrot.slane %v3071_v34, 4  ;;  %v3496_v45 = vrot.slane %v7241_v10, 4 }
 0x474   :  { %v3073_v24 = vpop.f32.mrf.mxu2 }
 0x475   :  { %v3222_v59 = vpop.f32.mrf.mxu0  ;;  %v3424_v27 = vrot.slane %v3073_v24, 4 }
 0x476   :  { %v3560_v30 = vrot.slane %v3222_v59, 4 }
 0x479   :  { %v3144_v55 = vpop.f32.mrf.mxu3 }
 0x47a   :  { %v3310_v53 = vrot.slane %v3144_v55, 4  ;;  %v3313_v54 = vsel %vm360_vm1, %v3144_v55, %v3312_v47 }
 0x47b   :  { %v3295_v36 = vpop.f32.mrf.mxu1  ;;  %v7247_v51 = vperm.slane %v3313_v54, %v5256_v32 }
 0x47c   :  { %v3558_v38 = vrot.slane %v3295_v36, 4  ;;  %v3311_v26 = vsel %vm360_vm1, %v3310_v53, %v3071_v34  ;;  %v3561_v49 = vsel %vm360_vm1, %v3295_v36, %v3560_v30 }
 0x47d   :  { %v3224_v19 = vpop.f32.mrf.mxu0  ;;  %v7251_v14 = vperm.slane %v3311_v26, %v5256_v32  ;;  %v7256_v44 = vperm.slane %v3561_v49, %v5256_v32  ;;  %v3372_v33 = vrot.slane %v7247_v51, 4 }
 0x47e   :  { %v3672_v37 = vrot.slane %v3224_v19, 4  ;;  %v3559_v1 = vsel %vm360_vm1, %v3558_v38, %v3222_v59 }
 0x47f   :  { %v7265_v7 = vperm.slane %v3559_v1, %v5256_v32  ;;  %v3360_v46 = vrot.slane %v7251_v14, 4  ;;  %v3620_v55 = vrot.slane %v7256_v44, 4 }
 0x481   :  { %v3146_v58 = vpop.f32.mrf.mxu3 }
 0x482   :  { %v3422_v57 = vrot.slane %v3146_v58, 4  ;;  %v3425_v43 = vsel %vm360_vm1, %v3146_v58, %v3424_v27 }
 0x483   :  { %v3297_v52 = vpop.f32.mrf.mxu1  ;;  %v7268_v61 = vperm.slane %v3425_v43, %v5256_v32 }
 0x484   :  { %v3670_v13 = vrot.slane %v3297_v52, 4  ;;  %v3423_v23 = vsel %vm360_vm1, %v3422_v57, %v3073_v24  ;;  %v3673_v17 = vsel %vm360_vm1, %v3297_v52, %v3672_v37 }
 0x485   :  { %v3076_v21 = vpop.f32.mrf.mxu2  ;;  %v7273_v20 = vperm.slane %v3423_v23, %v5256_v32  ;;  %v7276_v4 = vperm.slane %v3673_v17, %v5256_v32  ;;  %v3484_v15 = vrot.slane %v7268_v61, 4 }
 0x486   :  { %v3536_v35 = vrot.slane %v3076_v21, 4  ;;  %v3671_v63 = vsel %vm360_vm1, %v3670_v13, %v3224_v19 }
 0x487   :  { %v7280_v22 = vperm.slane %v3671_v63, %v5256_v32  ;;  %v3472_v9 = vrot.slane %v7273_v20, 4  ;;  %v3732_v28 = vrot.slane %v7276_v4, 4 }
 0x489   :  { %v3149_v6 = vpop.f32.mrf.mxu3  ;;  %v3720_v54 = vrot.slane %v7280_v22, 4 }
 0x48a   :  { %v3534_v42 = vrot.slane %v3149_v6, 4  ;;  %v3537_v3 = vsel %vm360_vm1, %v3149_v6, %v3536_v35  ;;  %v3608_v6 = vrot.slane %v7265_v7, 4 }
 0x48b   :  { %v7283_v12 = vperm.slane %v3537_v3, %v5256_v32 }
 0x48c   :  { %v3535_v41 = vsel %vm360_vm1, %v3534_v42, %v3076_v21 }
 0x48d   :  { %v3078_v62 = vpop.f32.mrf.mxu2  ;;  %v7287_v36 = vperm.slane %v3535_v41, %v5256_v32  ;;  %v3596_v26 = vrot.slane %v7283_v12, 4 }
 0x48e   :  { %v3648_v5 = vrot.slane %v3078_v62, 4 }
 0x48f   :  { %v3584_v38 = vrot.slane %v7287_v36, 4 }
 0x491   :  { %v3151_v60 = vpop.f32.mrf.mxu3 }
 0x492   :  { %v3646_v11 = vrot.slane %v3151_v60, 4  ;;  %v3649_v24 = vsel %vm360_vm1, %v3151_v60, %v3648_v5 }
 0x493   :  { %v7297_v53 = vperm.slane %v3649_v24, %v5256_v32 }
 0x494   :  { %v3647_v8 = vsel %vm360_vm1, %v3646_v11, %v3078_v62 }
 0x495   :  { %v7301_v47 = vperm.slane %v3647_v8, %v5256_v32  ;;  %v3708_v62 = vrot.slane %v7297_v53, 4 }
 0x497   :  { %v3227_v50 = vpop.f32.mrf.mxu0  ;;  %v3696_v43 = vrot.slane %v7301_v47, 4 }
 0x498   :  { %v3348_v34 = vrot.slane %v3227_v50, 4 }
 0x499   :  { %v3154_v58 = vpop.f32.mrf.mxu3  ;;  %v3300_v59 = vpop.f32.mrf.mxu1 }
 0x49a   :  { %v3346_v29 = vrot.slane %v3300_v59, 4  ;;  %v3349_v21 = vsel %vm360_vm1, %v3300_v59, %v3348_v34  ;;  %v3322_v2 = vrot.slane %v3154_v58, 4 }
 0x49b   :  { %v3357_v18 = vperm.slane %v3349_v21, %v5256_v32 }
 0x49c   :  { %v3347_v31 = vsel %vm360_vm1, %v3346_v29, %v3227_v50 }
 0x49d   :  { %v3353_v19 = vperm.slane %v3347_v31, %v5256_v32  ;;  %v3394_v52 = vrot.slane %v3357_v18, 4  ;;  %v3397_v30 = vsel %vm360_vm1, %v3357_v18, %v3396_v16 }
 0x49e   :  { %v3081_v57 = vpop.f32.mrf.mxu2  ;;  %v3405_v60 = vperm.slane %v3397_v30, %v5273_v0 }
 0x49f   :  { %v3324_v27 = vrot.slane %v3081_v57, 4  ;;  %v3323_v49 = vsel %vm360_vm1, %v3322_v2, %v3081_v57  ;;  %v3382_v13 = vrot.slane %v3353_v19, 4  ;;  %v3385_v35 = vsel %vm360_vm1, %v3353_v19, %v3384_v48  ;;  %v3229_v16 = vpop.f32.mrf.mxu0 }
 0x4a0   :  { %v3329_v37 = vperm.slane %v3323_v49, %v5256_v32  ;;  %v3393_v42 = vperm.slane %v3385_v35, %v5273_v0  ;;  %v3395_v1 = vsel %vm360_vm1, %v3394_v52, %v7228_v25  ;;  %v3460_v50 = vrot.slane %v3229_v16, 4 }
 0x4a1   :  { %v3325_v23 = vsel %vm360_vm1, %v3154_v58, %v3324_v27  ;;  %v3383_v17 = vsel %vm360_vm1, %v3382_v13, %v7233_v39  ;;  %v3401_v5 = vperm.slane %v3395_v1, %v5273_v0  ;;  %v3156_v48 = vpop.f32.mrf.mxu3  ;;  %v3418_v24 = vrot.slane %v3405_v60, 4  ;;  %v3302_v29 = vpop.f32.mrf.mxu1 }
 0x4a2   :  { %v3333_v63 = vperm.slane %v3325_v23, %v5256_v32  ;;  %v3358_v3 = vrot.slane %v3329_v37, 4  ;;  %v3361_v11 = vsel %vm360_vm1, %v3329_v37, %v3360_v46  ;;  %v7324_v41 = vperm.slane %v3383_v17, %v5273_v0 }
 0x4a3   :  { %v3369_v25 = vperm.slane %v3361_v11, %v5273_v0  ;;  %v3410_v34 = vrot.slane %v3393_v42, 4  ;;  %v3434_v8 = vrot.slane %v3156_v48, 4  ;;  %v3414_v18 = vrot.slane %v3401_v5, 4 }
 0x4a4   :  { %v3359_v58 = vsel %vm360_vm1, %v3358_v3, %v7251_v14  ;;  %v3370_v39 = vrot.slane %v3333_v63, 4  ;;  %v3373_v59 = vsel %vm360_vm1, %v3333_v63, %v3372_v33  ;;  %v3406_v14 = vrot.slane %v7324_v41, 4 }
 0x4a5   :  { %v3381_v21 = vperm.slane %v3373_v59, %v5273_v0  ;;  %v3412_v2 = vrot.slane %v3369_v25, 4  ;;  %v7332_v46 = vsel %vm360_vm1, %v3410_v34, %v3369_v25  ;;  %v7335_v31 = vperm.slane %v3359_v58, %v5273_v0 }
 0x4a6   :  { %v3371_v19 = vsel %vm360_vm1, %v3370_v39, %v7247_v51  ;;  %v3758_v52 = vrot.slane %v7332_v46, 4  ;;  %v3083_v33 = vpop.f32.mrf.mxu2  ;;  %v3458_v27 = vrot.slane %v3302_v29, 4  ;;  %v3461_v49 = vsel %vm360_vm1, %v3302_v29, %v3460_v50 }
 0x4a7   :  { %v3377_v30 = vperm.slane %v3371_v19, %v5273_v0  ;;  %v3420_v57 = vrot.slane %v3381_v21, 4  ;;  %v7344_v13 = vsel %vm360_vm1, %v3393_v42, %v3412_v2  ;;  %v3419_v35 = vsel %vm360_vm1, %v3418_v24, %v3381_v21 }
 0x4a8   :  { %v3436_v37 = vrot.slane %v3083_v33, 4  ;;  %v3435_v1 = vsel %vm360_vm1, %v3434_v8, %v3083_v33  ;;  %v3782_v63 = vrot.slane %v3419_v35, 4  ;;  %v3408_v3 = vrot.slane %v7335_v31, 4 }
 0x4a9   :  { %v3416_v51 = vrot.slane %v3377_v30, 4  ;;  %v3415_v23 = vsel %vm360_vm1, %v3414_v18, %v3377_v30  ;;  %v3421_v17 = vsel %vm360_vm1, %v3405_v60, %v3420_v57  ;;  %v3441_v50 = vperm.slane %v3435_v1, %v5256_v32 }
 0x4aa   :  { %v3784_v11 = vrot.slane %v3415_v23, 4  ;;  %v3437_v25 = vsel %vm360_vm1, %v3156_v48, %v3436_v37  ;;  %v3770_v34 = vrot.slane %v7344_v13, 4  ;;  %v3794_v24 = vrot.slane %v3421_v17, 4 }
 0x4ab   :  { %v3417_v42 = vsel %vm360_vm1, %v3401_v5, %v3416_v51  ;;  %v3445_v58 = vperm.slane %v3437_v25, %v5256_v32  ;;  %v3470_v8 = vrot.slane %v3441_v50, 4  ;;  %v3459_v60 = vsel %vm360_vm1, %v3458_v27, %v3229_v16 }
 0x4ac   :  { %v3785_v39 = vsel %vm360_vm1, %v3419_v35, %v3784_v11  ;;  %v3796_v59 = vrot.slane %v3417_v42, 4  ;;  %v7359_v29 = vsel %vm360_vm1, %v3782_v63, %v3415_v23  ;;  %v3473_v48 = vsel %vm360_vm1, %v3441_v50, %v3472_v9 }
 0x4ad   :  { %v3482_v21 = vrot.slane %v3445_v58, 4  ;;  %v3485_v5 = vsel %vm360_vm1, %v3445_v58, %v3484_v15  ;;  %v3471_v18 = vsel %vm360_vm1, %v3470_v8, %v7273_v20  ;;  %v3481_v19 = vperm.slane %v3473_v48, %v5273_v0 }
 0x4ae   :  { %v3797_v2 = vsel %vm360_vm1, %v3421_v17, %v3796_v59  ;;  %v3493_v16 = vperm.slane %v3485_v5, %v5273_v0  ;;  %v7373_v33 = vperm.slane %v3785_v39, %v5256_v32  ;;  %v7376_v30 = vsel %vm360_vm1, %v3794_v24, %v3417_v42  ;;  %v3159_v1 = vpop.f32.mrf.mxu3 }
 0x4af   :  { %v3483_v9 = vsel %vm360_vm1, %v3482_v21, %v7268_v61  ;;  %v3465_v15 = vperm.slane %v3459_v60, %v5256_v32  ;;  %v3086_v57 = vpop.f32.mrf.mxu2  ;;  %v7382_v27 = vperm.slane %v3797_v2, %v5256_v32  ;;  %v3524_v35 = vrot.slane %v3481_v19, 4  ;;  %v3232_v21 = vpop.f32.mrf.mxu0 }
 0x4b0   :  { %v3489_v20 = vperm.slane %v3483_v9, %v5273_v0  ;;  %v3469_v37 = vperm.slane %v3461_v49, %v5256_v32  ;;  %v7387_v51 = vperm.slane %v3471_v18, %v5273_v0  ;;  %v3532_v23 = vrot.slane %v3493_v16, 4 }
 0x4b1   :  { %v3494_v17 = vrot.slane %v3465_v15, 4  ;;  %v3497_v61 = vsel %vm360_vm1, %v3465_v15, %v3496_v45  ;;  %v3548_v50 = vrot.slane %v3086_v57, 4  ;;  %v3546_v58 = vrot.slane %v3159_v1, 4  ;;  %v3305_v9 = vpop.f32.mrf.mxu1 }
 0x4b2   :  { %v3505_v63 = vperm.slane %v3497_v61, %v5273_v0  ;;  %v3506_v11 = vrot.slane %v3469_v37, 4  ;;  %v3509_v25 = vsel %vm360_vm1, %v3469_v37, %v3508_v56  ;;  %v3528_v42 = vrot.slane %v3489_v20, 4 }
 0x4b3   :  { %v3495_v49 = vsel %vm360_vm1, %v3494_v17, %v7241_v10  ;;  %v3517_v24 = vperm.slane %v3509_v25, %v5273_v0  ;;  %v3520_v56 = vrot.slane %v7387_v51, 4  ;;  %v3547_v18 = vsel %vm360_vm1, %v3546_v58, %v3086_v57 }
 0x4b4   :  { %v7400_v39 = vperm.slane %v3495_v49, %v5273_v0  ;;  %v3507_v45 = vsel %vm360_vm1, %v3506_v11, %v7236_v40  ;;  %v3522_v59 = vrot.slane %v3505_v63, 4  ;;  %v7405_v8 = vsel %vm360_vm1, %v3505_v63, %v3524_v35 }
 0x4b5   :  { %v3513_v60 = vperm.slane %v3507_v45, %v5273_v0  ;;  %v3530_v48 = vrot.slane %v3517_v24, 4  ;;  %v3533_v10 = vsel %vm360_vm1, %v3517_v24, %v3532_v23  ;;  %v3549_v40 = vsel %vm360_vm1, %v3159_v1, %v3548_v50 }
 0x4b6   :  { %v7411_v5 = vsel %vm360_vm1, %v3522_v59, %v3481_v19  ;;  %v3906_v2 = vrot.slane %v3533_v10, 4  ;;  %v3882_v17 = vrot.slane %v7405_v8, 4  ;;  %v3518_v61 = vrot.slane %v7400_v39, 4 }
 0x4b7   :  { %v3526_v15 = vrot.slane %v3513_v60, 4  ;;  %v3529_v35 = vsel %vm360_vm1, %v3513_v60, %v3528_v42  ;;  %v3531_v37 = vsel %vm360_vm1, %v3530_v48, %v3493_v16  ;;  %v3870_v23 = vrot.slane %v7411_v5, 4 }
 0x4b8   :  { %v3908_v63 = vrot.slane %v3529_v35, 4  ;;  %v3553_v19 = vperm.slane %v3547_v18, %v5256_v32  ;;  %v3894_v57 = vrot.slane %v3531_v37, 4  ;;  %v3557_v1 = vperm.slane %v3549_v40, %v5256_v32  ;;  %v3088_v18 = vpop.f32.mrf.mxu2 }
 0x4b9   :  { %v3527_v11 = vsel %vm360_vm1, %v3526_v15, %v3489_v20  ;;  %v3570_v25 = vrot.slane %v3305_v9, 4  ;;  %v7424_v42 = vsel %vm360_vm1, %v3906_v2, %v3529_v35  ;;  %v3572_v49 = vrot.slane %v3232_v21, 4  ;;  %v3161_v15 = vpop.f32.mrf.mxu3 }
 0x4ba   :  { %v3896_v50 = vrot.slane %v3527_v11, 4  ;;  %v3582_v16 = vrot.slane %v3553_v19, 4  ;;  %v3909_v24 = vsel %vm360_vm1, %v3533_v10, %v3908_v63  ;;  %v3585_v58 = vsel %vm360_vm1, %v3553_v19, %v3584_v38 }
 0x4bb   :  { %v3594_v45 = vrot.slane %v3557_v1, 4  ;;  %v3597_v20 = vsel %vm360_vm1, %v3557_v1, %v3596_v26  ;;  %v3593_v48 = vperm.slane %v3585_v58, %v5273_v0  ;;  %v7439_v10 = vsel %vm360_vm1, %v3894_v57, %v3527_v11 }
 0x4bc   :  { %v3897_v59 = vsel %vm360_vm1, %v3531_v37, %v3896_v50  ;;  %v3583_v60 = vsel %vm360_vm1, %v3582_v16, %v7287_v36  ;;  %v3605_v2 = vperm.slane %v3597_v20, %v5273_v0  ;;  %v3571_v26 = vsel %vm360_vm1, %v3570_v25, %v3232_v21 }
 0x4bd   :  { %v7442_v38 = vperm.slane %v3583_v60, %v5273_v0  ;;  %v3595_v40 = vsel %vm360_vm1, %v3594_v45, %v7283_v12  ;;  %v7448_v35 = vperm.slane %v3897_v59, %v5256_v32  ;;  %v7451_v36 = vperm.slane %v3909_v24, %v5256_v32  ;;  %v3234_v12 = vpop.f32.mrf.mxu0 }
 0x4be   :  { %v3601_v37 = vperm.slane %v3595_v40, %v5273_v0  ;;  %v3573_v63 = vsel %vm360_vm1, %v3305_v9, %v3572_v49  ;;  %v3636_v19 = vrot.slane %v3593_v48, 4  ;;  %v3577_v11 = vperm.slane %v3571_v26, %v5256_v32  ;;  %v3307_v49 = vpop.f32.mrf.mxu1 }
 0x4bf   :  { %v3581_v57 = vperm.slane %v3573_v63, %v5256_v32  ;;  %v3660_v1 = vrot.slane %v3088_v18, 4  ;;  %v3632_v21 = vrot.slane %v7442_v38, 4  ;;  %v3644_v50 = vrot.slane %v3605_v2, 4 }
 0x4c0   :  { %v3640_v25 = vrot.slane %v3601_v37, 4  ;;  %v3658_v16 = vrot.slane %v3161_v15, 4  ;;  %v3606_v58 = vrot.slane %v3577_v11, 4  ;;  %v3609_v24 = vsel %vm360_vm1, %v3577_v11, %v3608_v6 }
 0x4c1   :  { %v3618_v45 = vrot.slane %v3581_v57, 4  ;;  %v3621_v9 = vsel %vm360_vm1, %v3581_v57, %v3620_v55  ;;  %v3617_v20 = vperm.slane %v3609_v24, %v5273_v0  ;;  %v3684_v40 = vrot.slane %v3234_v12, 4 }
 0x4c2   :  { %v3629_v59 = vperm.slane %v3621_v9, %v5273_v0  ;;  %v3659_v60 = vsel %vm360_vm1, %v3658_v16, %v3088_v18  ;;  %v3607_v26 = vsel %vm360_vm1, %v3606_v58, %v7265_v7  ;;  %v3661_v6 = vsel %vm360_vm1, %v3161_v15, %v3660_v1 }
 0x4c3   :  { %v3619_v63 = vsel %vm360_vm1, %v3618_v45, %v7256_v44  ;;  %v3665_v11 = vperm.slane %v3659_v60, %v5256_v32  ;;  %v3634_v57 = vrot.slane %v3617_v20, 4  ;;  %v7475_v24 = vsel %vm360_vm1, %v3617_v20, %v3636_v19 }
 0x4c4   :  { %v3625_v55 = vperm.slane %v3619_v63, %v5273_v0  ;;  %v3682_v9 = vrot.slane %v3307_v49, 4  ;;  %v7478_v18 = vperm.slane %v3607_v26, %v5273_v0  ;;  %v3642_v16 = vrot.slane %v3629_v59, 4 }
 0x4c5   :  { %v3645_v7 = vsel %vm360_vm1, %v3629_v59, %v3644_v50  ;;  %v3694_v58 = vrot.slane %v3665_v11, 4  ;;  %v7482_v44 = vsel %vm360_vm1, %v3634_v57, %v3593_v48  ;;  %v3669_v45 = vperm.slane %v3661_v6, %v5256_v32 }
 0x4c6   :  { %v3638_v15 = vrot.slane %v3625_v55, 4  ;;  %v3641_v1 = vsel %vm360_vm1, %v3625_v55, %v3640_v25  ;;  %v7487_v60 = vsel %vm360_vm1, %v3642_v16, %v3605_v2  ;;  %v3994_v19 = vrot.slane %v7475_v24, 4 }
 0x4c7   :  { %v4018_v20 = vrot.slane %v3645_v7, 4  ;;  %v4020_v26 = vrot.slane %v3641_v1, 4  ;;  %v4006_v50 = vrot.slane %v7487_v60, 4  ;;  %v3695_v48 = vsel %vm360_vm1, %v3694_v58, %v7301_v47 }
 0x4c8   :  { %v7491_v63 = vsel %vm360_vm1, %v3638_v15, %v3601_v37  ;;  %v3697_v25 = vsel %vm360_vm1, %v3665_v11, %v3696_v43  ;;  %v3630_v59 = vrot.slane %v7478_v18, 4  ;;  %v3982_v2 = vrot.slane %v7482_v44, 4 }
 0x4c9   :  { %v4021_v6 = vsel %vm360_vm1, %v3645_v7, %v4020_v26  ;;  %v3701_v55 = vperm.slane %v3695_v48, %v5273_v0  ;;  %v7505_v57 = vsel %vm360_vm1, %v4018_v20, %v3641_v1  ;;  %v3705_v16 = vperm.slane %v3697_v25, %v5273_v0 }
 0x4ca   :  { %v3706_v58 = vrot.slane %v3669_v45, 4  ;;  %v7510_v47 = vsel %vm360_vm1, %v4006_v50, %v7491_v63  ;;  %v3709_v43 = vsel %vm360_vm1, %v3669_v45, %v3708_v62  ;;  %v3683_v11 = vsel %vm360_vm1, %v3682_v9, %v3234_v12 }
 0x4cb   :  { %v3685_v7 = vsel %vm360_vm1, %v3307_v49, %v3684_v40  ;;  %v7518_v15 = vperm.slane %v4021_v6, %v5256_v32  ;;  %v3717_v20 = vperm.slane %v3709_v43, %v5273_v0  ;;  %v3689_v26 = vperm.slane %v3683_v11, %v5256_v32 }
 0x4cc   :  { %v3707_v1 = vsel %vm360_vm1, %v3706_v58, %v7297_v53  ;;  %v3744_v48 = vrot.slane %v3701_v55, 4  ;;  %v3748_v25 = vrot.slane %v3705_v16, 4  ;;  %v3693_v62 = vperm.slane %v3685_v7, %v5256_v32 }
 0x4cd   :  { %v3713_v50 = vperm.slane %v3707_v1, %v5273_v0  ;;  %v3756_v45 = vrot.slane %v3717_v20, 4  ;;  %v3718_v12 = vrot.slane %v3689_v26, 4  ;;  %v3721_v49 = vsel %vm360_vm1, %v3689_v26, %v3720_v54 }
 0x4ce   :  { %v7533_v53 = vsel %vm360_vm1, %v3406_v14, %v7335_v31  ;;  %v3729_v40 = vperm.slane %v3721_v49, %v5273_v0  ;;  %v3730_v9 = vrot.slane %v3693_v62, 4  ;;  %v3733_v6 = vsel %vm360_vm1, %v3693_v62, %v3732_v28 }
 0x4cf   :  { %v7543_v58 = vsel %vm360_vm1, %v7324_v41, %v3408_v3  ;;  %v3752_v54 = vrot.slane %v3713_v50, 4  ;;  %v3719_v43 = vsel %vm360_vm1, %v3718_v12, %v7280_v22  ;;  %v3741_v14 = vperm.slane %v3733_v6, %v5273_v0 }
 0x4d0   :  { %v7552_v11 = vsel %vm360_vm1, %v3518_v61, %v7387_v51  ;;  %v3725_v28 = vperm.slane %v3719_v43, %v5273_v0  ;;  %v3731_v31 = vsel %vm360_vm1, %v3730_v9, %v7276_v4  ;;  %v3746_v7 = vrot.slane %v3729_v40, 4 }
 0x4d1   :  { %v7561_v41 = vsel %vm360_vm1, %v7400_v39, %v3520_v56  ;;  %v3737_v22 = vperm.slane %v3731_v31, %v5273_v0  ;;  %v7565_v3 = vsel %vm360_vm1, %v3729_v40, %v3748_v25  ;;  %v3754_v1 = vrot.slane %v3741_v14, 4 }
 0x4d2   :  { %v3757_v61 = vsel %vm360_vm1, %v3741_v14, %v3756_v45  ;;  %v3742_v26 = vrot.slane %v3725_v28, 4  ;;  %v7569_v62 = vsel %vm360_vm1, %v3725_v28, %v3744_v48  ;;  %v7572_v4 = vsel %vm360_vm1, %v3746_v7, %v3705_v16 }
 0x4d3   :  { %v4130_v51 = vrot.slane %v3757_v61, 4  ;;  %v3750_v12 = vrot.slane %v3737_v22, 4  ;;  %v3753_v39 = vsel %vm360_vm1, %v3737_v22, %v3752_v54  ;;  %v7576_v56 = vsel %vm360_vm1, %v3754_v1, %v3717_v20 }
 0x4d4   :  { %v3759_v25 = vsel %vm360_vm1, %v3758_v52, %v7533_v53  ;;  %v7583_v45 = vsel %vm360_vm1, %v3742_v26, %v3701_v55  ;;  %v4106_v48 = vrot.slane %v7565_v3, 4  ;;  %v4108_v16 = vrot.slane %v7569_v62, 4 }
 0x4d5   :  { %v4118_v49 = vrot.slane %v7576_v56, 4  ;;  %v7589_v40 = vsel %vm360_vm1, %v3750_v12, %v3713_v50  ;;  %v4094_v20 = vrot.slane %v7572_v4, 4  ;;  %v7593_v9 = vsel %vm360_vm1, %v4130_v51, %v3753_v39 }
 0x4d6   :  { %v4132_v6 = vrot.slane %v3753_v39, 4  ;;  %v7598_v55 = vsel %vm360_vm1, %v7565_v3, %v4108_v16  ;;  %v3760_v54 = vrot.slane %v7533_v53, 4  ;;  %v3765_v43 = vperm.slane %v3759_v25, %v5256_v32 }
 0x4d7   :  { %v7604_v50 = vsel %vm360_vm1, %v4118_v49, %v7589_v40  ;;  %v3771_v28 = vsel %vm360_vm1, %v3770_v34, %v7543_v58  ;;  %v3789_v31 = vperm.slane %v7359_v29, %v5256_v32  ;;  %v3801_v22 = vperm.slane %v7376_v30, %v5256_v32 }
 0x4d8   :  { %v4133_v14 = vsel %vm360_vm1, %v3757_v61, %v4132_v6  ;;  %v3777_v53 = vperm.slane %v3771_v28, %v5256_v32  ;;  %v3808_v1 = vrot.slane %v3765_v43, 4  ;;  %v3772_v26 = vrot.slane %v7543_v58, 4 }
 0x4d9   :  { %v3832_v51 = vrot.slane %v3789_v31, 4  ;;  %v3871_v61 = vsel %vm360_vm1, %v3870_v23, %v7552_v11  ;;  %v3883_v34 = vsel %vm360_vm1, %v3882_v17, %v7561_v41  ;;  %v7627_v29 = vperm.slane %v4133_v14, %v5256_v32 }
 0x4da   :  { %v3809_v12 = vsel %vm360_vm1, %v3777_v53, %v3808_v1  ;;  %v3877_v30 = vperm.slane %v3871_v61, %v5256_v32  ;;  %v3889_v58 = vperm.slane %v3883_v34, %v5256_v32  ;;  %v3901_v23 = vperm.slane %v7439_v10, %v5256_v32 }
 0x4db   :  { %v3817_v39 = vperm.slane %v3809_v12, %v5273_v0  ;;  %v3833_v25 = vsel %vm360_vm1, %v3801_v22, %v3832_v51  ;;  %v3913_v16 = vperm.slane %v7424_v42, %v5256_v32  ;;  %v3806_v6 = vrot.slane %v3777_v53, 4 }
 0x4dc   :  { %v3841_v17 = vperm.slane %v3833_v25, %v5273_v0  ;;  %v3920_v49 = vrot.slane %v3877_v30, 4  ;;  %v3830_v14 = vrot.slane %v3801_v22, 4  ;;  %v3872_v28 = vrot.slane %v7552_v11, 4 }
 0x4dd   :  { %v3944_v1 = vrot.slane %v3901_v23, 4  ;;  %v3918_v61 = vrot.slane %v3889_v58, 4  ;;  %v3942_v34 = vrot.slane %v3913_v16, 4  ;;  %v3807_v51 = vsel %vm360_vm1, %v3806_v6, %v3765_v43 }
 0x4de   :  { %v3858_v7 = vrot.slane %v3841_v17, 4  ;;  %v3921_v12 = vsel %vm360_vm1, %v3889_v58, %v3920_v49  ;;  %v3831_v10 = vsel %vm360_vm1, %v3830_v14, %v3789_v31  ;;  %v7646_v25 = vperm.slane %v3807_v51, %v5273_v0 }
 0x4df   :  { %v3929_v52 = vperm.slane %v3921_v12, %v5273_v0  ;;  %v3945_v42 = vsel %vm360_vm1, %v3913_v16, %v3944_v1  ;;  %v3860_v53 = vrot.slane %v3817_v39, 4  ;;  %v3884_v11 = vrot.slane %v7561_v41, 4 }
 0x4e0   :  { %v3953_v22 = vperm.slane %v3945_v42, %v5273_v0  ;;  %v3919_v37 = vsel %vm360_vm1, %v3918_v61, %v3877_v30  ;;  %v3943_v58 = vsel %vm360_vm1, %v3942_v34, %v3901_v23  ;;  %v3859_v43 = vsel %vm360_vm1, %v3858_v7, %v3817_v39 }
 0x4e1   :  { %v7654_v31 = vperm.slane %v3831_v10, %v5273_v0  ;;  %v3856_v49 = vrot.slane %v7646_v25, 4  ;;  %v7658_v16 = vperm.slane %v3919_v37, %v5273_v0  ;;  %v7661_v14 = vperm.slane %v3943_v58, %v5273_v0 }
 0x4e2   :  { %v3970_v6 = vrot.slane %v3953_v22, 4  ;;  %v3972_v41 = vrot.slane %v3929_v52, 4  ;;  %v3761_v30 = vsel %vm360_vm1, %v7332_v46, %v3760_v54  ;;  %v3861_v39 = vsel %vm360_vm1, %v3841_v17, %v3860_v53 }
 0x4e3   :  { %v3857_v23 = vsel %vm360_vm1, %v7654_v31, %v3856_v49  ;;  %v3968_v7 = vrot.slane %v7658_v16, 4  ;;  %v3769_v1 = vperm.slane %v3761_v30, %v5256_v32  ;;  %v3773_v34 = vsel %vm360_vm1, %v7344_v13, %v3772_v26 }
 0x4e4   :  { %v3971_v37 = vsel %vm360_vm1, %v3970_v6, %v3929_v52  ;;  %v3973_v61 = vsel %vm360_vm1, %v3953_v22, %v3972_v41  ;;  %v3844_v12 = vrot.slane %v7373_v33, 4  ;;  %v3781_v10 = vperm.slane %v3773_v34, %v5256_v32 }
 0x4e5   :  { %v4739_v51 = vpack.i.bf16 %v3971_v37, %v3859_v43  ;;  %v3969_v46 = vsel %vm360_vm1, %v7661_v14, %v3968_v7  ;;  %v4744_v54 = vpack.i.bf16 %v3973_v61, %v3861_v39  ;;  %v3820_v17 = vrot.slane %v3769_v1, 4 }
 0x4e6   :  { %v4754_v42 = vpack.i.bf16 %v3969_v46, %v3857_v23  ;;  %v3845_v53 = vsel %vm360_vm1, %v7382_v27, %v3844_v12  ;;  %v3873_v52 = vsel %vm360_vm1, %v7411_v5, %v3872_v28  ;;  %v3885_v22 = vsel %vm360_vm1, %v7405_v8, %v3884_v11 }
 0x4e7   :  { %4740 = vrot.lane.b32.xlu2 %v4739_v51, %s5056_s5  ;;  %4745 = vrot.lane.b32.xlu0 %v4744_v54, %s5057_s20  ;;  %v3853_v13 = vperm.slane %v3845_v53, %v5273_v0  ;;  %v3881_v26 = vperm.slane %v3873_v52, %v5256_v32  ;;  %v3956_v58 = vrot.slane %v7448_v35, 4  ;;  %v3821_v43 = vsel %vm360_vm1, %v3781_v10, %v3820_v17 }
 0x4e8   :  { %4755 = vrot.lane.b32.xlu1 %v4754_v42, %s5041_s30  ;;  %v3893_v5 = vperm.slane %v3885_v22, %v5256_v32  ;;  %v3818_v28 = vrot.slane %v3781_v10, 4  ;;  %v3842_v49 = vrot.slane %v7382_v27, 4  ;;  %v3829_v6 = vperm.slane %v3821_v43, %v5273_v0 }
 0x4e9   :  { %v3866_v41 = vrot.slane %v3853_v13, 4  ;;  %v3932_v30 = vrot.slane %v3881_v26, 4  ;;  %v3957_v23 = vsel %vm360_vm1, %v7451_v36, %v3956_v58  ;;  %v3954_v54 = vrot.slane %v7451_v36, 4 }
 0x4ea   :  { %v3965_v8 = vperm.slane %v3957_v23, %v5273_v0  ;;  %v3819_v11 = vsel %vm360_vm1, %v3818_v28, %v3769_v1  ;;  %v3843_v7 = vsel %vm360_vm1, %v3842_v49, %v7373_v33  ;;  %v3930_v39 = vrot.slane %v3893_v5, 4 }
 0x4eb   :  { %v3867_v37 = vsel %vm360_vm1, %v3866_v41, %v3829_v6  ;;  %v3933_v61 = vsel %vm360_vm1, %v3893_v5, %v3932_v30  ;;  %v3825_v27 = vperm.slane %v3819_v11, %v5273_v0  ;;  %v3849_v34 = vperm.slane %v3843_v7, %v5273_v0 }
 0x4ec   :  { %v3941_v12 = vperm.slane %v3933_v61, %v5273_v0  ;;  %v3978_v51 = vrot.slane %v3965_v8, 4  ;;  %v3931_v46 = vsel %vm360_vm1, %v3930_v39, %v3881_v26  ;;  %v3868_v42 = vrot.slane %v3829_v6, 4 }
 0x4ed   :  { %v3862_v1 = vrot.slane %v3849_v34, 4  ;;  %v3937_v10 = vperm.slane %v3931_v46, %v5273_v0  ;;  %v3864_v33 = vrot.slane %v3825_v27, 4  ;;  %v3955_v53 = vsel %vm360_vm1, %v3954_v54, %v7448_v35 }
 0x4ee   :  { %v3979_v17 = vsel %vm360_vm1, %v3978_v51, %v3941_v12  ;;  %v3980_v52 = vrot.slane %v3941_v12, 4  ;;  %v7715_v22 = vsel %vm360_vm1, %v3630_v59, %v7442_v38  ;;  %v3854_v26 = vrot.slane %v7654_v31, 4 }
 0x4ef   :  { %v3966_v36 = vrot.slane %v7661_v14, 4  ;;  %v4749_v58 = vpack.i.bf16 %v3979_v17, %v3867_v37  ;;  %v3961_v43 = vperm.slane %v3955_v53, %v5273_v0  ;;  %v3863_v5 = vsel %vm360_vm1, %v3862_v1, %v3825_v27 }
 0x4f0   :  { %v3865_v28 = vsel %vm360_vm1, %v3849_v34, %v3864_v33  ;;  %v3976_v49 = vrot.slane %v3937_v10, 4  ;;  %v7726_v35 = vsel %vm360_vm1, %v7478_v18, %v3632_v21  ;;  %v3869_v6 = vsel %vm360_vm1, %v3853_v13, %v3868_v42  ;;  %v4541_v34 = vld [vmem:[%s7929_s2 + $0x18] sm:$0xff] }
 0x4f1   :  { %4750 = vrot.lane.b32.xlu2 %v4749_v58, %s5058_s21  ;;  %v3974_v59 = vrot.slane %v3961_v43, 4  ;;  %v3981_v41 = vsel %vm360_vm1, %v3965_v8, %v3980_v52  ;;  %v3983_v30 = vsel %vm360_vm1, %v3982_v2, %v7715_v22  ;;  %v3984_v38 = vrot.slane %v7715_v22, 4  ;;  %4395 = vmatpush.bf16.msra.mxu2 %v4541_v34 }
 0x4f2   :  { %v3977_v23 = vsel %vm360_vm1, %v3961_v43, %v3976_v49  ;;  %v3989_v21 = vperm.slane %v3983_v30, %v5256_v32  ;;  %v3995_v18 = vsel %vm360_vm1, %v3994_v19, %v7726_v35  ;;  %v4013_v7 = vperm.slane %v7510_v47, %v5256_v32 }
 0x4f3   :  { %v3975_v13 = vsel %vm360_vm1, %v3974_v59, %v3937_v10  ;;  %v4769_v11 = vpack.i.bf16 %v3977_v23, %v3865_v28  ;;  %v4001_v8 = vperm.slane %v3995_v18, %v5256_v32  ;;  %v4025_v39 = vperm.slane %v7505_v57, %v5256_v32 }
 0x4f4   :  { %v4759_v2 = vpack.i.bf16 %v3975_v13, %v3863_v5  ;;  %v4032_v37 = vrot.slane %v3989_v21, 4  ;;  %v4095_v61 = vsel %vm360_vm1, %v4094_v20, %v7583_v45  ;;  %v4056_v19 = vrot.slane %v4013_v7, 4 }
 0x4f5   :  { %4770 = vrot.lane.b32.xlu0 %v4769_v11, %s5059_s1  ;;  %v4101_v27 = vperm.slane %v4095_v61, %v5256_v32  ;;  %v4107_v47 = vsel %vm360_vm1, %v4106_v48, %v7569_v62  ;;  %v4125_v57 = vperm.slane %v7604_v50, %v5256_v32  ;;  %v4137_v51 = vperm.slane %v7593_v9, %v5256_v32 }
 0x4f6   :  { %4760 = vrot.lane.b32.xlu1 %v4759_v2, %s5046_s14  ;;  %v4033_v20 = vsel %vm360_vm1, %v4001_v8, %v4032_v37  ;;  %v4113_v12 = vperm.slane %v4107_v47, %v5256_v32  ;;  %v4030_v46 = vrot.slane %v4001_v8, 4  ;;  %v4057_v62 = vsel %vm360_vm1, %v4025_v39, %v4056_v19 }
 0x4f7   :  { %v4041_v3 = vperm.slane %v4033_v20, %v5273_v0  ;;  %v4144_v48 = vrot.slane %v4101_v27, 4  ;;  %v4168_v50 = vrot.slane %v4125_v57, 4  ;;  %v4065_v54 = vperm.slane %v4057_v62, %v5273_v0 }
 0x4f8   :  { %v4031_v1 = vsel %vm360_vm1, %v4030_v46, %v3989_v21  ;;  %v4054_v10 = vrot.slane %v4025_v39, 4  ;;  %v4142_v33 = vrot.slane %v4113_v12, 4  ;;  %v4166_v53 = vrot.slane %v4137_v51, 4 }
 0x4f9   :  { %v4145_v42 = vsel %vm360_vm1, %v4113_v12, %v4144_v48  ;;  %v4169_v17 = vsel %vm360_vm1, %v4137_v51, %v4168_v50  ;;  %v7775_v9 = vperm.slane %v4031_v1, %v5273_v0  ;;  %v4082_v52 = vrot.slane %v4065_v54, 4 }
 0x4fa   :  { %v4153_v22 = vperm.slane %v4145_v42, %v5273_v0  ;;  %v4177_v58 = vperm.slane %v4169_v17, %v5273_v0  ;;  %v4055_v43 = vsel %vm360_vm1, %v4054_v10, %v4013_v7  ;;  %v4764_v5 = vpack.i.bf16 %v3981_v41, %v3869_v6 }
 0x4fb   :  { %v4080_v28 = vrot.slane %v7775_v9, 4  ;;  %v4143_v49 = vsel %vm360_vm1, %v4142_v33, %v4101_v27  ;;  %v4167_v59 = vsel %vm360_vm1, %v4166_v53, %v4125_v57  ;;  %v3996_v30 = vrot.slane %v7726_v35, 4 }
 0x4fc   :  { %v4194_v23 = vrot.slane %v4177_v58, 4  ;;  %v7785_v21 = vperm.slane %v4055_v43, %v5273_v0  ;;  %v7788_v18 = vperm.slane %v4143_v49, %v5273_v0  ;;  %v4083_v13 = vsel %vm360_vm1, %v4082_v52, %v4041_v3 }
 0x4fd   :  { %v7792_v11 = vperm.slane %v4167_v59, %v5273_v0  ;;  %v4084_v6 = vrot.slane %v4041_v3, 4  ;;  %v4196_v41 = vrot.slane %v4153_v22, 4  ;;  %v3985_v2 = vsel %vm360_vm1, %v7482_v44, %v3984_v38 }
 0x4fe   :  { %4765 = vrot.lane.b32.xlu1 %v4764_v5, %s5060_s24  ;;  %v4195_v8 = vsel %vm360_vm1, %v4194_v23, %v4153_v22  ;;  %v4081_v35 = vsel %vm360_vm1, %v7785_v21, %v4080_v28  ;;  %v4192_v7 = vrot.slane %v7788_v18, 4  ;;  %v3993_v19 = vperm.slane %v3985_v2, %v5256_v32 }
 0x4ff   :  { %v4774_v39 = vpack.i.bf16 %v4195_v8, %v4083_v13  ;;  %v4085_v37 = vsel %vm360_vm1, %v4065_v54, %v4084_v6  ;;  %v4197_v61 = vsel %vm360_vm1, %v4177_v58, %v4196_v41  ;;  %v3997_v57 = vsel %vm360_vm1, %v7475_v24, %v3996_v30 }
 0x500   :  { %v4193_v27 = vsel %vm360_vm1, %v7792_v11, %v4192_v7  ;;  %v4779_v47 = vpack.i.bf16 %v4197_v61, %v4085_v37  ;;  %v8039_v34 = vrot.slane %v7491_v63, 4  ;;  %v4005_v38 = vperm.slane %v3997_v57, %v5256_v32 }
 0x501   :  { %4775 = vrot.lane.b32.xlu2 %v4774_v39, %s5056_s5  ;;  %v4784_v44 = vpack.i.bf16 %v4193_v27, %v4081_v35  ;;  %v4066_v51 = vrot.slane %v7518_v15, 4  ;;  %v8040_v46 = vrot.slane %v7583_v45, 4  ;;  %v4117_v24 = vperm.slane %v7598_v55, %v5256_v32 }
 0x502   :  { %v4009_v20 = vsel %vm360_vm1, %v7487_v60, %v8039_v34  ;;  %v8041_v63 = vrot.slane %v7589_v40, 4  ;;  %v4178_v62 = vrot.slane %v7627_v29, 4  ;;  %v4042_v48 = vrot.slane %v4005_v38, 4 }
 0x503   :  { %v4017_v12 = vperm.slane %v4009_v20, %v5256_v32  ;;  %v4097_v3 = vsel %vm360_vm1, %v7572_v4, %v8040_v46  ;;  %4785 = vrot.lane.b32.xlu0 %v4784_v44, %s5041_s30  ;;  %v4154_v1 = vrot.slane %v4117_v24, 4  ;;  %v4044_v55 = vrot.slane %v3993_v19, 4 }
 0x504   :  { %v4121_v60 = vsel %vm360_vm1, %v7576_v56, %v8041_v63  ;;  %v4105_v45 = vperm.slane %v4097_v3, %v5256_v32  ;;  %v4043_v40 = vsel %vm360_vm1, %v4042_v48, %v3993_v19  ;;  %v4078_v28 = vrot.slane %v7785_v21, 4 }
 0x505   :  { %v4067_v50 = vsel %vm360_vm1, %v4066_v51, %v4017_v12  ;;  %v4129_v54 = vperm.slane %v4121_v60, %v5256_v32  ;;  %v4068_v10 = vrot.slane %v4017_v12, 4  ;;  %v4049_v17 = vperm.slane %v4043_v40, %v5273_v0 }
 0x506   :  { %v4073_v4 = vperm.slane %v4067_v50, %v5273_v0  ;;  %v4156_v33 = vrot.slane %v4105_v45, 4  ;;  %4780 = vrot.lane.b32.xlu1 %v4779_v47, %s5057_s20  ;;  %v4155_v53 = vsel %vm360_vm1, %v4154_v1, %v4105_v45  ;;  %v4045_v58 = vsel %vm360_vm1, %v4005_v38, %v4044_v55 }
 0x507   :  { %v4179_v56 = vsel %vm360_vm1, %v4178_v62, %v4129_v54  ;;  %v4180_v42 = vrot.slane %v4129_v54, 4  ;;  %v4161_v22 = vperm.slane %v4155_v53, %v5273_v0  ;;  %v4069_v43 = vsel %vm360_vm1, %v7518_v15, %v4068_v10 }
 0x508   :  { %v4185_v52 = vperm.slane %v4179_v56, %v5273_v0  ;;  %v4086_v32 = vrot.slane %v4073_v4, 4  ;;  %v4157_v5 = vsel %vm360_vm1, %v4117_v24, %v4156_v33  ;;  %v4190_v49 = vrot.slane %v7792_v11, 4 }
 0x509   :  { %v4088_v59 = vrot.slane %v4049_v17, 4  ;;  %v4200_v23 = vrot.slane %v4161_v22, 4  ;;  %v4077_v13 = vperm.slane %v4069_v43, %v5273_v0  ;;  %v4165_v6 = vperm.slane %v4157_v5, %v5273_v0 }
 0x50a   :  { %v4198_v30 = vrot.slane %v4185_v52, 4  ;;  %v4181_v41 = vsel %vm360_vm1, %v7627_v29, %v4180_v42  ;;  %v4087_v8 = vsel %vm360_vm1, %v4086_v32, %v4049_v17  ;;  %v4053_v35 = vperm.slane %v4045_v58, %v5273_v0 }
 0x50b   :  { %v4189_v21 = vperm.slane %v4181_v41, %v5273_v0  ;;  %v4089_v11 = vsel %vm360_vm1, %v4073_v4, %v4088_v59  ;;  %v4201_v7 = vsel %vm360_vm1, %v4185_v52, %v4200_v23  ;;  %v4090_v39 = vrot.slane %v4077_v13, 4 }
 0x50c   :  { %v4199_v15 = vsel %vm360_vm1, %v4198_v30, %v4161_v22  ;;  %v4794_v37 = vpack.i.bf16 %v4201_v7, %v4089_v11  ;;  %v4204_v19 = vrot.slane %v4165_v6, 4  ;;  %v3855_v29 = vsel %vm360_vm1, %v3854_v26, %v7646_v25 }
 0x50d   :  { %v4789_v2 = vpack.i.bf16 %v4199_v15, %v4087_v8  ;;  %v4202_v61 = vrot.slane %v4189_v21, 4  ;;  %v3967_v0 = vsel %vm360_vm1, %v3966_v36, %v7658_v16  ;;  %v7866_v27 = vsel %vm360_vm1, %v4078_v28, %v7775_v9  ;;  %v4540_v36 = vld [vmem:[%s7929_s2 + $0x10] sm:$0xff]  ;;  %v4539_v9 = vld [vmem:[%s7929_s2 + $0x8] sm:$0xff] }
 0x50e   :  { %4795 = vrot.lane.b32.xlu2 %v4794_v37, %s5059_s1  ;;  %v4091_v47 = vsel %vm360_vm1, %v4090_v39, %v4053_v35  ;;  %v4092_v31 = vrot.slane %v4053_v35, 4  ;;  %v4191_v25 = vsel %vm360_vm1, %v4190_v49, %v7788_v18  ;;  %v4205_v34 = vsel %vm360_vm1, %v4189_v21, %v4204_v19  ;;  %4396 = vmatpush.bf16.msra.mxu2 %v4540_v36  ;;  %v4538_v18 = vld [vmem:[%s7929_s2] sm:$0xff]  ;;  %s5061_s2 = smov [#allocation8]  }
 0x50f   :  { %4790 = vrot.lane.b32.xlu0 %v4789_v2, %s5046_s14  ;;  %v4203_v57 = vsel %vm360_vm1, %v4202_v61, %v4165_v6  ;;  %s4418_s7 = sshll.u32 %s5061_s2, 4  ;;  %s4419_s7 = int_to_ptr.vmem [resolvable:$true] %s4418_s7 }
 0x510   :  { %v4799_v26 = vpack.i.bf16 %v4203_v57, %v4091_v47  ;;  %v4093_v16 = vsel %vm360_vm1, %v4077_v13, %v4092_v31 }
 0x511   :  { %v4804_v14 = vpack.i.bf16 %v4205_v34, %v4093_v16 }
 0x512   :  { %4800 = vrot.lane.b32.xlu1 %v4799_v26, %s5058_s21  ;;  %4397 = vmatpush.bf16.msra.mxu2 %v4539_v9 }
 0x516   :  { %4398 = vmatpush.bf16.msra.mxu2 %v4538_v18 }
 0x517   :  { %4805 = vrot.lane.b32.xlu0 %v4804_v14, %s5060_s24 }
 0x541   :  { %v4741_v51 = vpop.permute.xlu2 %4740 }
 0x542   :  { %v4743_v24 = vunpack.i.h.bf16 %v4741_v51  ;;  %v4742_v63 = vunpack.i.l.bf16 %v4741_v51 }
 0x54b   :  { %v4751_v17 = vpop.permute.xlu2 %4750 }
 0x54c   :  { %v4753_v32 = vunpack.i.h.bf16 %v4751_v17  ;;  %v4752_v22 = vunpack.i.l.bf16 %v4751_v17 }
 0x559   :  { %v4746_v44 = vpop.permute.xlu0 %4745 }
 0x55a   :  { %v4756_v20 = vpop.permute.xlu1 %4755  ;;  %v4748_v60 = vunpack.i.h.bf16 %v4746_v44  ;;  %v4747_v62 = vunpack.i.l.bf16 %v4746_v44 }
 0x55b   :  { %v4758_v38 = vunpack.i.h.bf16 %v4756_v20  ;;  %v4757_v12 = vunpack.i.l.bf16 %v4756_v20  ;;  %v4776_v6 = vpop.permute.xlu2 %4775 }
 0x55c   :  { %v4778_v2 = vunpack.i.h.bf16 %v4776_v6  ;;  %v4777_v39 = vunpack.i.l.bf16 %v4776_v6 }
 0x55d   :  { %v4318_v46 = vsel %vm2338_vm2, %v3855_v29, %v4757_v12  ;;  %v4319_v3 = vsel %vm2338_vm2, %v3967_v0, %v4758_v38 }
 0x55e   :  { %v4323_v48 = vsel %vm4322_vm4, %v4318_v46, %v4742_v63  ;;  %v4324_v50 = vsel %vm4322_vm4, %v4319_v3, %v4743_v24 }
 0x55f   :  { %v4328_v55 = vsel %vm4327_vm5, %v4323_v48, %v4747_v62  ;;  %v4329_v10 = vsel %vm4327_vm5, %v4324_v50, %v4748_v60 }
 0x567   :  { %v4771_v54 = vpop.permute.xlu0 %4770 }
 0x568   :  { %v4761_v45 = vpop.permute.xlu1 %4760  ;;  %v4773_v40 = vunpack.i.h.bf16 %v4771_v54  ;;  %v4772_v56 = vunpack.i.l.bf16 %v4771_v54  ;;  %v4796_v31 = vpop.permute.xlu2 %4795 }
 0x569   :  { %v4763_v4 = vunpack.i.h.bf16 %v4761_v45  ;;  %v4762_v1 = vunpack.i.l.bf16 %v4761_v45  ;;  %v4798_v34 = vunpack.i.h.bf16 %v4796_v31  ;;  %v4797_v16 = vunpack.i.l.bf16 %v4796_v31 }
 0x56b   :  { %v4332_v33 = vsel %vm2617_vm3, %v4328_v55, %v4762_v1  ;;  %v4333_v42 = vsel %vm2617_vm3, %v4329_v10, %v4763_v4 }
 0x56c   :  { %v4337_v53 = vsel %vm4336_vm6, %v4332_v33, %v4772_v56  ;;  %v4338_v52 = vsel %vm4336_vm6, %v4333_v42, %v4773_v40 }
 0x56d   :  { %v4342_v28 = vsel %vm4341_vm7, %v4337_v53, %v4752_v22  ;;  %v4343_v49 = vsel %vm4341_vm7, %v4338_v52, %v4753_v32 }
 0x570   :  { %v4766_v58 = vpop.permute.xlu1 %4765 }
 0x571   :  { %v4768_v43 = vunpack.i.h.bf16 %v4766_v58  ;;  %v4767_v5 = vunpack.i.l.bf16 %v4766_v58 }
 0x573   :  { %v4347_v59 = vsel %vm4346_vm8, %v4342_v28, %v4767_v5  ;;  %v4348_v30 = vsel %vm4346_vm8, %v4343_v49, %v4768_v43 }
 0x574   :  { %v4351_v23 = vpack.c.bf16 %v4348_v30, %v4347_v59 }
 0x575   :  { %v4786_v13 = vpop.permute.xlu0 %4785 }
 0x576   :  { %4526 = vmatmul.msk.bf16.vlgmr.msra.gmra.mxu2 %vm134_vm0, %v4351_v23  ;;  %v4788_v41 = vunpack.i.h.bf16 %v4786_v13  ;;  %v4787_v8 = vunpack.i.l.bf16 %v4786_v13 }
 0x578   :  { %v4781_v15 = vpop.permute.xlu1 %4780  ;;  %v4320_v35 = vsel %vm2338_vm2, %v7866_v27, %v4787_v8  ;;  %v4321_v21 = vsel %vm2338_vm2, %v4191_v25, %v4788_v41 }
 0x579   :  { %v4783_v11 = vunpack.i.h.bf16 %v4781_v15  ;;  %v4782_v7 = vunpack.i.l.bf16 %v4781_v15  ;;  %v4325_v37 = vsel %vm4322_vm4, %v4320_v35, %v4777_v39  ;;  %v4326_v61 = vsel %vm4322_vm4, %v4321_v21, %v4778_v2 }
 0x57b   :  { %v4330_v29 = vsel %vm4327_vm5, %v4325_v37, %v4782_v7  ;;  %v4331_v0 = vsel %vm4327_vm5, %v4326_v61, %v4783_v11 }
 0x581   :  { %v4791_v19 = vpop.permute.xlu0 %4790 }
 0x582   :  { %v4793_v47 = vunpack.i.h.bf16 %v4791_v19  ;;  %v4792_v57 = vunpack.i.l.bf16 %v4791_v19 }
 0x584   :  { %v4334_v27 = vsel %vm2617_vm3, %v4330_v29, %v4792_v57  ;;  %v4335_v25 = vsel %vm2617_vm3, %v4331_v0, %v4793_v47  ;;  %v4801_v26 = vpop.permute.xlu1 %4800 }
 0x585   :  { %v4803_v14 = vunpack.i.h.bf16 %v4801_v26  ;;  %v4802_v36 = vunpack.i.l.bf16 %v4801_v26  ;;  %v4339_v9 = vsel %vm4336_vm6, %v4334_v27, %v4797_v16  ;;  %v4340_v18 = vsel %vm4336_vm6, %v4335_v25, %v4798_v34 }
 0x587   :  { %v4344_v20 = vsel %vm4341_vm7, %v4339_v9, %v4802_v36  ;;  %v4345_v44 = vsel %vm4341_vm7, %v4340_v18, %v4803_v14 }
 0x589   :  { %v4806_v38 = vpop.permute.xlu0 %4805 }
 0x58a   :  { %v4808_v12 = vunpack.i.h.bf16 %v4806_v38  ;;  %v4807_v51 = vunpack.i.l.bf16 %v4806_v38 }
 0x58c   :  { %v4349_v46 = vsel %vm4346_vm8, %v4344_v20, %v4807_v51  ;;  %v4350_v3 = vsel %vm4346_vm8, %v4345_v44, %v4808_v12 }
 0x58d   :  { %v4352_v24 = vpack.c.bf16 %v4350_v3, %v4349_v46 }
 0x58f   :  { %4527 = vmatmul.msk.bf16.gmra.mxu2 %vm134_vm0, %v4352_v24 }
 0x5f9   :  { %v4400_v63 = vpop.f32.mrf.mxu2 }
 0x5fa   :  { %4410 = vst.msk [vmem:[#allocation8] sm:$0xff] %vm134_vm0, %v4400_v63 }
 0x601   :  { %v4402_v60 = vpop.f32.mrf.mxu2 }
 0x602   :  { %4411 = vst.msk [vmem:[#allocation8 + $0x8] sm:$0xff] %vm134_vm0, %v4402_v60 }
 0x612   :  { %v4405_v62 = vpop.f32.mrf.mxu2 }
 0x613   :  { %4412 = vst.msk [vmem:[#allocation8 + $0x10] sm:$0xff] %vm134_vm0, %v4405_v62 }
 0x61a   :  { %v4407_v48 = vpop.f32.mrf.mxu2 }
 0x61b   :  { %4413 = vst.msk [vmem:[#allocation8 + $0x18] sm:$0xff] %vm134_vm0, %v4407_v48 }
 0x61c   :  { %4426 = dma.vmem_to_hbm [thread:$0]  %s4419_s7, 512, %s4421_s10, [#allocation4], %s5040_s29, %s5040_s29, %s5041_s30  }
 0x61d   :  { %5037 = dma.done.wait [#allocation4], 512  }
 0x61e   :  { %5038 = vsyncadd [#allocation4], 4294966784 }
 0x61f   :  { %4431 = vsyncpa [#allocation3], 1 }
 0x620   :  { %4432 = vsyncpa [#allocation6], 1 }
 0x621   :  { %4433 = vsyncpa [#allocation4], 1 }

</bundles_post_ra>
